<compile_context>
chip_gen: v7x
topology: tpu7x:2x2x1
jax: 0.10.0
libtpu: 0.0.40
codegen_flags: <defaults>
</compile_context>

<pallas_src>
import math
import numpy as np
import jax
import jax.numpy as jnp
from jax import lax
from jax.experimental import pallas as pl
from jax.experimental.pallas import tpu as pltpu

# ---------------- model sizes (consistent with the PyTorch forward) ----------------
NVARS = 4
SAMPLE_LEN = 64
PATCH_LEN = 8
PATCH_STRIDE = 8                                            # args.shapelet_stride
PATCH_NUM = (SAMPLE_LEN - PATCH_LEN) // PATCH_STRIDE + 1    # 8 patches / bag
PATCH_DIM = 32
D_IN = NVARS * PATCH_LEN                                    # W_P input dim = 32
C1, C2, DMODEL = 64, 128, 128                               # FCN feature extractor channels
K1, K2, K3 = 7, 5, 3                                        # conv kernel sizes (same padding)
P1, P2, P3 = 3, 2, 1
ATTN_DIM = 64                                               # attention-MIL pool hidden dim
NCLASSES = 5                                                # args.nbins
MEAN_NORM = True
L = PATCH_NUM                                               # rows per bag (dense packing)
LANE_OUT = 128                                              # lane-dense padded logits width


def millet_kernel(x_ref, ssel_ref, bexp_ref, wp_ref, cmat_ref, pos_ref,
                  c1w_ref, c1b_ref, c2w_ref, c2b_ref, c3w_ref, c3b_ref,
                  av_ref, aw_ref, clsw_ref, clsb_ref,
                  out_ref,
                  im1_ref, im2_ref, im3_ref):
    M = x_ref.shape[0]                                      # dense rows this step = G*L
    # intra-bag patch index of every (densely packed) row
    pos = lax.broadcasted_iota(jnp.int32, (M, 1), 0) % L

    # --- W_P projection (bf16 MXU) with mean_norm folded in via constant matmuls ---
    #   h = (x - mean) @ Wp + bias + pos  =  x@Wp - Bexp @ ((Ssel@x) @ Cmat) + posbias
    x_bf = x_ref[...]                                                        # (M, D_IN) bf16
    h = jnp.dot(x_bf, wp_ref[...], preferred_element_type=jnp.float32)       # (M, PATCH_DIM)
    if MEAN_NORM:
        xf = x_bf.astype(jnp.float32)
        colsum = jnp.dot(ssel_ref[...], xf, preferred_element_type=jnp.float32)   # (G, D_IN)
        corr = jnp.dot(colsum, cmat_ref[...], preferred_element_type=jnp.float32) # (G, PATCH_DIM)
        h = h - jnp.dot(bexp_ref[...], corr, preferred_element_type=jnp.float32)
    h = h + pos_ref[...]

    # --- FCN feature extractor: 3 x (same-pad Conv1d + ReLU), im2col single matmul each ---
    def conv_same(inp, w_ref, b_ref, im_ref, K, P):
        Cin = inp.shape[1]
        inp_bf = inp.astype(jnp.bfloat16)
        for k in range(K):
            s = k - P
            if s == 0:
                tap = inp_bf                               # centre tap: reuse in-register value
            else:
                # rolled[r] = inp[(r + s) % M]; wrap rows are always masked below
                rolled = pltpu.roll(inp, shift=(-s) % M, axis=0)
                valid = ((pos + s) >= 0) & ((pos + s) < L)  # per-bag 'same' padding (select!)
                tap = jnp.where(valid, rolled, 0.0).astype(jnp.bfloat16)
            im_ref[:, k * Cin:(k + 1) * Cin] = tap
        # single deep bf16 matmul (uninterrupted -> MRB-friendly on v7x)
        acc = jnp.dot(im_ref[...], w_ref[...], preferred_element_type=jnp.float32)
        return jnp.maximum(acc + b_ref[...], 0.0)

    h1 = conv_same(h,  c1w_ref, c1b_ref, im1_ref, K1, P1)   # (M, C1)
    h2 = conv_same(h1, c2w_ref, c2b_ref, im2_ref, K2, P2)   # (M, C2)
    H  = conv_same(h2, c3w_ref, c3b_ref, im3_ref, K3, P3)   # (M, DMODEL)

    # --- attention-MIL pooling (per-bag softmax over patches) + classifier head ---
    A = jnp.tanh(jnp.dot(H.astype(jnp.bfloat16), av_ref[...],
                         preferred_element_type=jnp.float32))                # (M, ATTN_DIM)
    scores = jnp.sum(A * aw_ref[...], axis=-1, keepdims=True)                # (M, 1)
    # bag-independent bound (|scores| <= sum|aw| since |tanh|<=1): keeps exp in range
    # without a cross-row max that would serialize on all of H.
    bound = jnp.sum(jnp.abs(aw_ref[...]), axis=-1, keepdims=True)            # (1, 1)
    e = jnp.exp(scores - bound)                                              # (M, 1)
    denom = jnp.dot(ssel_ref[...], e, preferred_element_type=jnp.float32)        # (G, 1)
    bag_un = jnp.dot(ssel_ref[...], e * H, preferred_element_type=jnp.float32)   # (G, DMODEL)
    bag = bag_un / denom                                                     # exact normalization
    logits = jnp.dot(bag.astype(jnp.bfloat16), clsw_ref[...],
                     preferred_element_type=jnp.float32) + clsb_ref[...]
    out_ref[...] = logits                                                    # (G, 128) lane-dense


def make_params(key):
    ks = jax.random.split(key, 12)
    u = lambda k, shape, s: jax.random.uniform(k, shape, jnp.float32, -1.0, 1.0) * s
    return dict(
        wp=u(ks[0], (D_IN, PATCH_DIM), 1.0 / math.sqrt(D_IN)),
        bp=u(ks[1], (1, PATCH_DIM), 1.0 / math.sqrt(D_IN)),
        wpos=u(ks[2], (PATCH_NUM, PATCH_DIM), 0.02),          # positional_encoding('zeros', learn_pe)
        c1w=u(ks[3], (K1, PATCH_DIM, C1), 1.0 / math.sqrt(K1 * PATCH_DIM)),
        c1b=u(ks[4], (1, C1), 1.0 / math.sqrt(K1 * PATCH_DIM)),
        c2w=u(ks[5], (K2, C1, C2), 1.0 / math.sqrt(K2 * C1)),
        c2b=u(ks[6], (1, C2), 1.0 / math.sqrt(K2 * C1)),
        c3w=u(ks[7], (K3, C2, DMODEL), 1.0 / math.sqrt(K3 * C2)),
        c3b=u(ks[8], (1, DMODEL), 1.0 / math.sqrt(K3 * C2)),
        av=u(ks[9], (DMODEL, ATTN_DIM), 1.0 / math.sqrt(DMODEL)),
        aw=u(ks[10], (1, ATTN_DIM), 1.0 / math.sqrt(ATTN_DIM)),
        clsw=u(ks[11], (DMODEL, NCLASSES), 1.0 / math.sqrt(DMODEL)),
        clsb=jnp.zeros((1, NCLASSES), jnp.float32),
    )


def _unfold_patches(bags):
    # bags: (B, nvars, T) -> (B, patch_num, nvars*patch_len)  (torch.unfold + transpose(1,2).view)
    idx = jnp.arange(PATCH_NUM)[:, None] * PATCH_STRIDE + jnp.arange(PATCH_LEN)[None, :]
    xp = bags[:, :, idx]                                    # (B, nvars, patch_num, patch_len)
    return jnp.transpose(xp, (0, 2, 1, 3)).reshape(bags.shape[0], PATCH_NUM, D_IN), xp


def _choose_g(Bn):
    # prefer >=4 grid steps (v7x dual-TC pipelining) while keeping per-step work high
    for g in (32, 16, 8):
        if (Bn + g - 1) // g >= 4:
            return g
    return 8


def millet_forward(bags, p):
    Bn = bags.shape[0]
    xflat, _ = _unfold_patches(bags)                        # (B, L, D_IN) f32

    # ---- layout plumbing: dense rows (L per bag), bf16 input, G bags per grid step ----
    G = _choose_g(Bn)
    n_steps = (Bn + G - 1) // G
    Bpad = n_steps * G
    M = G * L
    xflat = jnp.pad(xflat, ((0, Bpad - Bn), (0, 0), (0, 0)))
    x_rows = xflat.reshape(Bpad * L, D_IN).astype(jnp.bfloat16)

    # per-bag row-sum selector / expander (constant) so bag reductions run on the MXU
    rows = np.arange(M)
    ssel = jnp.asarray((rows // L)[None, :] == np.arange(G)[:, None], jnp.float32)  # (G, M)
    bexp = ssel.T                                                                   # (M, G)

    # fold mean_norm into the projection: Cmat = (A^T A Wp) / (patch_num*patch_len)
    A_var = np.zeros((NVARS, D_IN), np.float32)
    for v in range(NVARS):
        A_var[v, v * PATCH_LEN:(v + 1) * PATCH_LEN] = 1.0
    A_var = jnp.asarray(A_var)
    cmat = (A_var.T @ (A_var @ p['wp'])) / float(PATCH_NUM * PATCH_LEN)             # (D_IN, PATCH_DIM)

    # positional encoding + W_P bias, tiled over the G bags of a step
    posbias = jnp.tile(p['wpos'] + p['bp'], (G, 1))                                 # (M, PATCH_DIM)

    # tap-stacked (im2col) conv weights, bf16
    c1w_s = p['c1w'].reshape(K1 * PATCH_DIM, C1).astype(jnp.bfloat16)               # (224, 64)
    c2w_s = p['c2w'].reshape(K2 * C1, C2).astype(jnp.bfloat16)                      # (320, 128)
    c3w_s = p['c3w'].reshape(K3 * C2, DMODEL).astype(jnp.bfloat16)                  # (384, 128)
    wp_bf = p['wp'].astype(jnp.bfloat16)
    av_bf = p['av'].astype(jnp.bfloat16)

    # lane-dense classifier head (pad 5 classes -> 128 lanes), bf16
    clsw_pad = jnp.zeros((DMODEL, LANE_OUT), jnp.float32).at[:, :NCLASSES].set(p['clsw'])
    clsw_pad = clsw_pad.astype(jnp.bfloat16)
    clsb_pad = jnp.zeros((1, LANE_OUT), jnp.float32).at[:, :NCLASSES].set(p['clsb'])

    # all constants are 2-D blocks; block index is always (0, 0)
    def const_spec(shape):
        return pl.BlockSpec(shape, lambda s: (0, 0))

    grid_spec = pltpu.PrefetchScalarGridSpec(
        num_scalar_prefetch=0,
        grid=(n_steps,),
        in_specs=[
            pl.BlockSpec((M, D_IN), lambda s: (s, 0)),      # per-step tile of G dense bags
            const_spec((G, M)), const_spec((M, G)),
            const_spec((D_IN, PATCH_DIM)), const_spec((D_IN, PATCH_DIM)),
            const_spec((M, PATCH_DIM)),
            const_spec((K1 * PATCH_DIM, C1)), const_spec((1, C1)),
            const_spec((K2 * C1, C2)), const_spec((1, C2)),
            const_spec((K3 * C2, DMODEL)), const_spec((1, DMODEL)),
            const_spec((DMODEL, ATTN_DIM)), const_spec((1, ATTN_DIM)),
            const_spec((DMODEL, LANE_OUT)), const_spec((1, LANE_OUT)),
        ],
        out_specs=pl.BlockSpec((G, LANE_OUT), lambda s: (s, 0)),
        scratch_shapes=[
            pltpu.VMEM((M, K1 * PATCH_DIM), jnp.bfloat16),  # im2col stacks (fully rewritten
            pltpu.VMEM((M, K2 * C1), jnp.bfloat16),         #  every step before being read)
            pltpu.VMEM((M, K3 * C2), jnp.bfloat16),
        ],
    )
    out = pl.pallas_call(
        millet_kernel,
        out_shape=jax.ShapeDtypeStruct((Bpad, LANE_OUT), jnp.float32),
        grid_spec=grid_spec,
        compiler_params=pltpu.CompilerParams(dimension_semantics=("parallel",)),
    )(x_rows, ssel, bexp, wp_bf, cmat, posbias,
      c1w_s, p['c1b'], c2w_s, p['c2b'], c3w_s, p['c3b'],
      av_bf, p['aw'], clsw_pad, clsb_pad)
    return out[:Bn, :NCLASSES]                              # bag_out: (B, NCLASSES)


def millet_ref(bags, p):
    # pure-JAX f32 reference mirroring the PyTorch semantics
    _, xp = _unfold_patches(bags)                           # (B, nvars, patch_num, patch_len)
    x = xp
    if MEAN_NORM:
        x_mean = x.mean(axis=2).mean(axis=-1)[:, :, None, None]
        x = x - x_mean
    xf = jnp.transpose(x, (0, 2, 1, 3)).reshape(bags.shape[0], PATCH_NUM, D_IN)
    h = xf @ p['wp'] + p['bp'] + p['wpos'][None]

    def conv(hh, w, b, pad):
        hp = jnp.pad(hh, ((0, 0), (pad, pad), (0, 0)))
        acc = jnp.zeros((hh.shape[0], PATCH_NUM, w.shape[2]), jnp.float32)
        for k in range(w.shape[0]):
            acc = acc + jnp.einsum('blc,cd->bld', hp[:, k:k + PATCH_NUM], w[k])
        return jax.nn.relu(acc + b[None])

    h1 = conv(h, p['c1w'], p['c1b'], P1)
    h2 = conv(h1, p['c2w'], p['c2b'], P2)
    H = conv(h2, p['c3w'], p['c3b'], P3)
    A = jnp.tanh(jnp.einsum('bld,da->bla', H, p['av']))
    scores = jnp.sum(A * p['aw'][None], axis=-1, keepdims=True)
    alpha = jax.nn.softmax(scores, axis=1)
    bag = jnp.sum(alpha * H, axis=1)
    return bag @ p['clsw'] + p['clsb']


if __name__ == "__main__":
    B = 32                                      # -> G=8, 4 grid steps (>=2 per v7x core)
    key = jax.random.PRNGKey(0)
    k_x, k_p = jax.random.split(key)
    bags = jax.random.normal(k_x, (B, NVARS, SAMPLE_LEN), jnp.float32)
    params = make_params(k_p)

    bag_out = jax.block_until_ready(millet_forward(bags, params))
    ref = jax.block_until_ready(millet_ref(bags, params))
    # bf16 MXU operands with f32 accumulation -> slightly looser tolerance than pure f32
    np.testing.assert_allclose(np.asarray(bag_out), np.asarray(ref), rtol=5e-2, atol=5e-2)

    # TODO(synk): recon/decoder, Sel_CL contrastive head, interpre/averagePool/predLabel
    # training buffers and dropout (p=0 here) are not on the default forward path and are
    # omitted; BatchNorm (if present in the injected FCN feature_extractor) would be folded
    # into the conv weights at inference time.
    print("KERNEL_OK")
</pallas_src>

<mosaic_0001>
module attributes {stable_mosaic.version = 11 : i64} {
  func.func @millet_kernel(%arg0: i32, %arg1: memref<64x32xbf16, #tpu.memory_space<vmem>>, %arg2: memref<8x64xf32, #tpu.memory_space<vmem>>, %arg3: memref<64x8xf32, #tpu.memory_space<vmem>>, %arg4: memref<32x32xbf16, #tpu.memory_space<vmem>>, %arg5: memref<32x32xf32, #tpu.memory_space<vmem>>, %arg6: memref<64x32xf32, #tpu.memory_space<vmem>>, %arg7: memref<224x64xbf16, #tpu.memory_space<vmem>>, %arg8: memref<1x64xf32, #tpu.memory_space<vmem>>, %arg9: memref<320x128xbf16, #tpu.memory_space<vmem>>, %arg10: memref<1x128xf32, #tpu.memory_space<vmem>>, %arg11: memref<384x128xbf16, #tpu.memory_space<vmem>>, %arg12: memref<1x128xf32, #tpu.memory_space<vmem>>, %arg13: memref<128x64xbf16, #tpu.memory_space<vmem>>, %arg14: memref<1x64xf32, #tpu.memory_space<vmem>>, %arg15: memref<128x128xbf16, #tpu.memory_space<vmem>>, %arg16: memref<1x128xf32, #tpu.memory_space<vmem>>, %arg17: memref<8x128xf32, #tpu.memory_space<vmem>>, %arg18: memref<64x224xbf16, #tpu.memory_space<vmem>>, %arg19: memref<64x320xbf16, #tpu.memory_space<vmem>>, %arg20: memref<64x384xbf16, #tpu.memory_space<vmem>>) attributes {dimension_semantics = [#tpu.dimension_semantics<parallel>], iteration_bounds = array<i64: 4>, scalar_prefetch = 0 : i64, scratch_operands = 3 : i64, tpu.core_type = #tpu.core_type<tc>, window_params = [{transform_indices = @transform_0, window_bounds = array<i64: 64, 32>}, {pipeline_mode = #tpu.pipeline_mode<synchronous>, transform_indices = @transform_1, window_bounds = array<i64: 8, 64>}, {pipeline_mode = #tpu.pipeline_mode<synchronous>, transform_indices = @transform_2, window_bounds = array<i64: 64, 8>}, {pipeline_mode = #tpu.pipeline_mode<synchronous>, transform_indices = @transform_3, window_bounds = array<i64: 32, 32>}, {pipeline_mode = #tpu.pipeline_mode<synchronous>, transform_indices = @transform_4, window_bounds = array<i64: 32, 32>}, {pipeline_mode = #tpu.pipeline_mode<synchronous>, transform_indices = @transform_5, window_bounds = array<i64: 64, 32>}, {pipeline_mode = #tpu.pipeline_mode<synchronous>, transform_indices = @transform_6, window_bounds = array<i64: 224, 64>}, {pipeline_mode = #tpu.pipeline_mode<synchronous>, transform_indices = @transform_7, window_bounds = array<i64: 1, 64>}, {pipeline_mode = #tpu.pipeline_mode<synchronous>, transform_indices = @transform_8, window_bounds = array<i64: 320, 128>}, {pipeline_mode = #tpu.pipeline_mode<synchronous>, transform_indices = @transform_9, window_bounds = array<i64: 1, 128>}, {pipeline_mode = #tpu.pipeline_mode<synchronous>, transform_indices = @transform_10, window_bounds = array<i64: 384, 128>}, {pipeline_mode = #tpu.pipeline_mode<synchronous>, transform_indices = @transform_11, window_bounds = array<i64: 1, 128>}, {pipeline_mode = #tpu.pipeline_mode<synchronous>, transform_indices = @transform_12, window_bounds = array<i64: 128, 64>}, {pipeline_mode = #tpu.pipeline_mode<synchronous>, transform_indices = @transform_13, window_bounds = array<i64: 1, 64>}, {pipeline_mode = #tpu.pipeline_mode<synchronous>, transform_indices = @transform_14, window_bounds = array<i64: 128, 128>}, {pipeline_mode = #tpu.pipeline_mode<synchronous>, transform_indices = @transform_15, window_bounds = array<i64: 1, 128>}, {transform_indices = @transform_16, window_bounds = array<i64: 8, 128>}]} {
    %0 = tpu.iota {dimensions = array<i32: 0>} : vector<64x1xi32>
    %c8_i32 = arith.constant 8 : i32
    %c0_i32 = arith.constant 0 : i32
    %1 = arith.cmpi eq, %c8_i32, %c0_i32 : i32
    %c1_i32 = arith.constant 1 : i32
    %2 = arith.select %1, %c1_i32, %c8_i32 : i32
    %3 = vector.broadcast %2 : i32 to vector<64x1xi32>
    %4 = arith.remsi %0, %3 : vector<64x1xi32>
    %c0_i32_0 = arith.constant 0 : i32
    %5 = vector.broadcast %c0_i32_0 : i32 to vector<64x1xi32>
    %6 = arith.cmpi ne, %4, %5 : vector<64x1xi32>
    %c0_i32_1 = arith.constant 0 : i32
    %7 = vector.broadcast %c0_i32_1 : i32 to vector<64x1xi32>
    %8 = arith.cmpi slt, %4, %7 : vector<64x1xi32>
    %c0_i32_2 = arith.constant 0 : i32
    %9 = arith.cmpi slt, %2, %c0_i32_2 : i32
    %10 = vector.broadcast %9 : i1 to vector<64x1xi1>
    %11 = vector.broadcast %10 : vector<64x1xi1> to vector<64x1xi1>
    %12 = arith.xori %8, %11 : vector<64x1xi1>
    %13 = arith.andi %12, %6 : vector<64x1xi1>
    %14 = vector.broadcast %2 : i32 to vector<64x1xi32>
    %15 = arith.addi %4, %14 : vector<64x1xi32>
    %16 = arith.select %13, %15, %4 : vector<64x1xi1>, vector<64x1xi32>
    %c0 = arith.constant 0 : index
    %c0_3 = arith.constant 0 : index
    %17 = vector.load %arg1[%c0, %c0_3] : memref<64x32xbf16, #tpu.memory_space<vmem>>, vector<64x32xbf16>
    %c0_4 = arith.constant 0 : index
    %c0_5 = arith.constant 0 : index
    %18 = vector.load %arg4[%c0_4, %c0_5] : memref<32x32xbf16, #tpu.memory_space<vmem>>, vector<32x32xbf16>
    %cst = arith.constant dense<0.000000e+00> : vector<64x32xf32>
    %19 = tpu.matmul %17, %18, %cst {dimension_numbers = #tpu.dot_dimension_numbers<[1], [0], [0], [1], [0, 0, 1, 1], [], []>} : vector<64x32xbf16>, vector<32x32xbf16>, vector<64x32xf32> -> vector<64x32xf32>
    %20 = arith.extf %17 : vector<64x32xbf16> to vector<64x32xf32>
    %c0_6 = arith.constant 0 : index
    %c0_7 = arith.constant 0 : index
    %21 = vector.load %arg2[%c0_6, %c0_7] : memref<8x64xf32, #tpu.memory_space<vmem>>, vector<8x64xf32>
    %cst_8 = arith.constant dense<0.000000e+00> : vector<8x32xf32>
    %22 = tpu.matmul %21, %20, %cst_8 {dimension_numbers = #tpu.dot_dimension_numbers<[1], [0], [0], [1], [0, 0, 1, 1], [], []>} : vector<8x64xf32>, vector<64x32xf32>, vector<8x32xf32> -> vector<8x32xf32>
    %c0_9 = arith.constant 0 : index
    %c0_10 = arith.constant 0 : index
    %23 = vector.load %arg5[%c0_9, %c0_10] : memref<32x32xf32, #tpu.memory_space<vmem>>, vector<32x32xf32>
    %cst_11 = arith.constant dense<0.000000e+00> : vector<8x32xf32>
    %24 = tpu.matmul %22, %23, %cst_11 {dimension_numbers = #tpu.dot_dimension_numbers<[1], [0], [0], [1], [0, 0, 1, 1], [], []>} : vector<8x32xf32>, vector<32x32xf32>, vector<8x32xf32> -> vector<8x32xf32>
    %c0_12 = arith.constant 0 : index
    %c0_13 = arith.constant 0 : index
    %25 = vector.load %arg3[%c0_12, %c0_13] : memref<64x8xf32, #tpu.memory_space<vmem>>, vector<64x8xf32>
    %cst_14 = arith.constant dense<0.000000e+00> : vector<64x32xf32>
    %26 = tpu.matmul %25, %24, %cst_14 {dimension_numbers = #tpu.dot_dimension_numbers<[1], [0], [0], [1], [0, 0, 1, 1], [], []>} : vector<64x8xf32>, vector<8x32xf32>, vector<64x32xf32> -> vector<64x32xf32>
    %27 = arith.subf %19, %26 : vector<64x32xf32>
    %c0_15 = arith.constant 0 : index
    %c0_16 = arith.constant 0 : index
    %28 = vector.load %arg6[%c0_15, %c0_16] : memref<64x32xf32, #tpu.memory_space<vmem>>, vector<64x32xf32>
    %29 = arith.addf %27, %28 : vector<64x32xf32>
    %30 = arith.truncf %29 : vector<64x32xf32> to vector<64x32xbf16>
    %c3_i32 = arith.constant 3 : i32
    %31 = tpu.dynamic_rotate %29 by %c3_i32 dim 0 : vector<64x32xf32>, i32 -> vector<64x32xf32>
    %c-3_i32 = arith.constant -3 : i32
    %32 = vector.broadcast %c-3_i32 : i32 to vector<64x1xi32>
    %33 = arith.addi %16, %32 : vector<64x1xi32>
    %c0_i32_17 = arith.constant 0 : i32
    %34 = vector.broadcast %c0_i32_17 : i32 to vector<64x1xi32>
    %35 = arith.cmpi sge, %33, %34 : vector<64x1xi32>
    %c-3_i32_18 = arith.constant -3 : i32
    %36 = vector.broadcast %c-3_i32_18 : i32 to vector<64x1xi32>
    %37 = arith.addi %16, %36 : vector<64x1xi32>
    %c8_i32_19 = arith.constant 8 : i32
    %38 = vector.broadcast %c8_i32_19 : i32 to vector<64x1xi32>
    %39 = arith.cmpi slt, %37, %38 : vector<64x1xi32>
    %40 = arith.andi %35, %39 : vector<64x1xi1>
    %cst_20 = arith.constant 0.000000e+00 : f32
    %41 = vector.shape_cast %40 : vector<64x1xi1> to vector<64x1xi1>
    %42 = vector.broadcast %41 : vector<64x1xi1> to vector<64x32xi1>
    %43 = vector.broadcast %cst_20 : f32 to vector<64x32xf32>
    %44 = arith.select %42, %31, %43 : vector<64x32xi1>, vector<64x32xf32>
    %45 = arith.truncf %44 : vector<64x32xf32> to vector<64x32xbf16>
    %c0_21 = arith.constant 0 : index
    %c0_22 = arith.constant 0 : index
    %46 = vector.load %arg18[%c0_21, %c0_22] : memref<64x224xbf16, #tpu.memory_space<vmem>>, vector<64x32xbf16>
    tpu.vector_store %arg18[%c0_21, %c0_22], %45 {strides = array<i32>} : memref<64x224xbf16, #tpu.memory_space<vmem>>, vector<64x32xbf16>,
    %c2_i32 = arith.constant 2 : i32
    %47 = tpu.dynamic_rotate %29 by %c2_i32 dim 0 : vector<64x32xf32>, i32 -> vector<64x32xf32>
    %c-2_i32 = arith.constant -2 : i32
    %48 = vector.broadcast %c-2_i32 : i32 to vector<64x1xi32>
    %49 = arith.addi %16, %48 : vector<64x1xi32>
    %c0_i32_23 = arith.constant 0 : i32
    %50 = vector.broadcast %c0_i32_23 : i32 to vector<64x1xi32>
    %51 = arith.cmpi sge, %49, %50 : vector<64x1xi32>
    %c-2_i32_24 = arith.constant -2 : i32
    %52 = vector.broadcast %c-2_i32_24 : i32 to vector<64x1xi32>
    %53 = arith.addi %16, %52 : vector<64x1xi32>
    %c8_i32_25 = arith.constant 8 : i32
    %54 = vector.broadcast %c8_i32_25 : i32 to vector<64x1xi32>
    %55 = arith.cmpi slt, %53, %54 : vector<64x1xi32>
    %56 = arith.andi %51, %55 : vector<64x1xi1>
    %cst_26 = arith.constant 0.000000e+00 : f32
    %57 = vector.shape_cast %56 : vector<64x1xi1> to vector<64x1xi1>
    %58 = vector.broadcast %57 : vector<64x1xi1> to vector<64x32xi1>
    %59 = vector.broadcast %cst_26 : f32 to vector<64x32xf32>
    %60 = arith.select %58, %47, %59 : vector<64x32xi1>, vector<64x32xf32>
    %61 = arith.truncf %60 : vector<64x32xf32> to vector<64x32xbf16>
    %c0_27 = arith.constant 0 : index
    %c32 = arith.constant 32 : index
    %62 = vector.load %arg18[%c0_27, %c32] : memref<64x224xbf16, #tpu.memory_space<vmem>>, vector<64x32xbf16>
    tpu.vector_store %arg18[%c0_27, %c32], %61 {strides = array<i32>} : memref<64x224xbf16, #tpu.memory_space<vmem>>, vector<64x32xbf16>,
    %c1_i32_28 = arith.constant 1 : i32
    %63 = tpu.dynamic_rotate %29 by %c1_i32_28 dim 0 : vector<64x32xf32>, i32 -> vector<64x32xf32>
    %c-1_i32 = arith.constant -1 : i32
    %64 = vector.broadcast %c-1_i32 : i32 to vector<64x1xi32>
    %65 = arith.addi %16, %64 : vector<64x1xi32>
    %c0_i32_29 = arith.constant 0 : i32
    %66 = vector.broadcast %c0_i32_29 : i32 to vector<64x1xi32>
    %67 = arith.cmpi sge, %65, %66 : vector<64x1xi32>
    %c-1_i32_30 = arith.constant -1 : i32
    %68 = vector.broadcast %c-1_i32_30 : i32 to vector<64x1xi32>
    %69 = arith.addi %16, %68 : vector<64x1xi32>
    %c8_i32_31 = arith.constant 8 : i32
    %70 = vector.broadcast %c8_i32_31 : i32 to vector<64x1xi32>
    %71 = arith.cmpi slt, %69, %70 : vector<64x1xi32>
    %72 = arith.andi %67, %71 : vector<64x1xi1>
    %cst_32 = arith.constant 0.000000e+00 : f32
    %73 = vector.shape_cast %72 : vector<64x1xi1> to vector<64x1xi1>
    %74 = vector.broadcast %73 : vector<64x1xi1> to vector<64x32xi1>
    %75 = vector.broadcast %cst_32 : f32 to vector<64x32xf32>
    %76 = arith.select %74, %63, %75 : vector<64x32xi1>, vector<64x32xf32>
    %77 = arith.truncf %76 : vector<64x32xf32> to vector<64x32xbf16>
    %c0_33 = arith.constant 0 : index
    %c64 = arith.constant 64 : index
    %78 = vector.load %arg18[%c0_33, %c64] : memref<64x224xbf16, #tpu.memory_space<vmem>>, vector<64x32xbf16>
    tpu.vector_store %arg18[%c0_33, %c64], %77 {strides = array<i32>} : memref<64x224xbf16, #tpu.memory_space<vmem>>, vector<64x32xbf16>,
    %c0_34 = arith.constant 0 : index
    %c96 = arith.constant 96 : index
    %79 = vector.load %arg18[%c0_34, %c96] : memref<64x224xbf16, #tpu.memory_space<vmem>>, vector<64x32xbf16>
    tpu.vector_store %arg18[%c0_34, %c96], %30 {strides = array<i32>} : memref<64x224xbf16, #tpu.memory_space<vmem>>, vector<64x32xbf16>,
    %c63_i32 = arith.constant 63 : i32
    %80 = tpu.dynamic_rotate %29 by %c63_i32 dim 0 : vector<64x32xf32>, i32 -> vector<64x32xf32>
    %c1_i32_35 = arith.constant 1 : i32
    %81 = vector.broadcast %c1_i32_35 : i32 to vector<64x1xi32>
    %82 = arith.addi %16, %81 : vector<64x1xi32>
    %c0_i32_36 = arith.constant 0 : i32
    %83 = vector.broadcast %c0_i32_36 : i32 to vector<64x1xi32>
    %84 = arith.cmpi sge, %82, %83 : vector<64x1xi32>
    %c1_i32_37 = arith.constant 1 : i32
    %85 = vector.broadcast %c1_i32_37 : i32 to vector<64x1xi32>
    %86 = arith.addi %16, %85 : vector<64x1xi32>
    %c8_i32_38 = arith.constant 8 : i32
    %87 = vector.broadcast %c8_i32_38 : i32 to vector<64x1xi32>
    %88 = arith.cmpi slt, %86, %87 : vector<64x1xi32>
    %89 = arith.andi %84, %88 : vector<64x1xi1>
    %cst_39 = arith.constant 0.000000e+00 : f32
    %90 = vector.shape_cast %89 : vector<64x1xi1> to vector<64x1xi1>
    %91 = vector.broadcast %90 : vector<64x1xi1> to vector<64x32xi1>
    %92 = vector.broadcast %cst_39 : f32 to vector<64x32xf32>
    %93 = arith.select %91, %80, %92 : vector<64x32xi1>, vector<64x32xf32>
    %94 = arith.truncf %93 : vector<64x32xf32> to vector<64x32xbf16>
    %c0_40 = arith.constant 0 : index
    %c128 = arith.constant 128 : index
    %95 = vector.load %arg18[%c0_40, %c128] : memref<64x224xbf16, #tpu.memory_space<vmem>>, vector<64x32xbf16>
    tpu.vector_store %arg18[%c0_40, %c128], %94 {strides = array<i32>} : memref<64x224xbf16, #tpu.memory_space<vmem>>, vector<64x32xbf16>,
    %c62_i32 = arith.constant 62 : i32
    %96 = tpu.dynamic_rotate %29 by %c62_i32 dim 0 : vector<64x32xf32>, i32 -> vector<64x32xf32>
    %c2_i32_41 = arith.constant 2 : i32
    %97 = vector.broadcast %c2_i32_41 : i32 to vector<64x1xi32>
    %98 = arith.addi %16, %97 : vector<64x1xi32>
    %c0_i32_42 = arith.constant 0 : i32
    %99 = vector.broadcast %c0_i32_42 : i32 to vector<64x1xi32>
    %100 = arith.cmpi sge, %98, %99 : vector<64x1xi32>
    %c2_i32_43 = arith.constant 2 : i32
    %101 = vector.broadcast %c2_i32_43 : i32 to vector<64x1xi32>
    %102 = arith.addi %16, %101 : vector<64x1xi32>
    %c8_i32_44 = arith.constant 8 : i32
    %103 = vector.broadcast %c8_i32_44 : i32 to vector<64x1xi32>
    %104 = arith.cmpi slt, %102, %103 : vector<64x1xi32>
    %105 = arith.andi %100, %104 : vector<64x1xi1>
    %cst_45 = arith.constant 0.000000e+00 : f32
    %106 = vector.shape_cast %105 : vector<64x1xi1> to vector<64x1xi1>
    %107 = vector.broadcast %106 : vector<64x1xi1> to vector<64x32xi1>
    %108 = vector.broadcast %cst_45 : f32 to vector<64x32xf32>
    %109 = arith.select %107, %96, %108 : vector<64x32xi1>, vector<64x32xf32>
    %110 = arith.truncf %109 : vector<64x32xf32> to vector<64x32xbf16>
    %c0_46 = arith.constant 0 : index
    %c160 = arith.constant 160 : index
    %111 = vector.load %arg18[%c0_46, %c160] : memref<64x224xbf16, #tpu.memory_space<vmem>>, vector<64x32xbf16>
    tpu.vector_store %arg18[%c0_46, %c160], %110 {strides = array<i32>} : memref<64x224xbf16, #tpu.memory_space<vmem>>, vector<64x32xbf16>,
    %c61_i32 = arith.constant 61 : i32
    %112 = tpu.dynamic_rotate %29 by %c61_i32 dim 0 : vector<64x32xf32>, i32 -> vector<64x32xf32>
    %c3_i32_47 = arith.constant 3 : i32
    %113 = vector.broadcast %c3_i32_47 : i32 to vector<64x1xi32>
    %114 = arith.addi %16, %113 : vector<64x1xi32>
    %c0_i32_48 = arith.constant 0 : i32
    %115 = vector.broadcast %c0_i32_48 : i32 to vector<64x1xi32>
    %116 = arith.cmpi sge, %114, %115 : vector<64x1xi32>
    %c3_i32_49 = arith.constant 3 : i32
    %117 = vector.broadcast %c3_i32_49 : i32 to vector<64x1xi32>
    %118 = arith.addi %16, %117 : vector<64x1xi32>
    %c8_i32_50 = arith.constant 8 : i32
    %119 = vector.broadcast %c8_i32_50 : i32 to vector<64x1xi32>
    %120 = arith.cmpi slt, %118, %119 : vector<64x1xi32>
    %121 = arith.andi %116, %120 : vector<64x1xi1>
    %cst_51 = arith.constant 0.000000e+00 : f32
    %122 = vector.shape_cast %121 : vector<64x1xi1> to vector<64x1xi1>
    %123 = vector.broadcast %122 : vector<64x1xi1> to vector<64x32xi1>
    %124 = vector.broadcast %cst_51 : f32 to vector<64x32xf32>
    %125 = arith.select %123, %112, %124 : vector<64x32xi1>, vector<64x32xf32>
    %126 = arith.truncf %125 : vector<64x32xf32> to vector<64x32xbf16>
    %c0_52 = arith.constant 0 : index
    %c192 = arith.constant 192 : index
    %127 = vector.load %arg18[%c0_52, %c192] : memref<64x224xbf16, #tpu.memory_space<vmem>>, vector<64x32xbf16>
    tpu.vector_store %arg18[%c0_52, %c192], %126 {strides = array<i32>} : memref<64x224xbf16, #tpu.memory_space<vmem>>, vector<64x32xbf16>,
    %c0_53 = arith.constant 0 : index
    %c0_54 = arith.constant 0 : index
    %128 = vector.load %arg18[%c0_53, %c0_54] : memref<64x224xbf16, #tpu.memory_space<vmem>>, vector<64x224xbf16>
    %c0_55 = arith.constant 0 : index
    %c0_56 = arith.constant 0 : index
    %129 = vector.load %arg7[%c0_55, %c0_56] : memref<224x64xbf16, #tpu.memory_space<vmem>>, vector<224x64xbf16>
    %cst_57 = arith.constant dense<0.000000e+00> : vector<64x64xf32>
    %130 = tpu.matmul %128, %129, %cst_57 {dimension_numbers = #tpu.dot_dimension_numbers<[1], [0], [0], [1], [0, 0, 1, 1], [], []>} : vector<64x224xbf16>, vector<224x64xbf16>, vector<64x64xf32> -> vector<64x64xf32>
    %c0_58 = arith.constant 0 : index
    %c0_59 = arith.constant 0 : index
    %131 = vector.load %arg8[%c0_58, %c0_59] : memref<1x64xf32, #tpu.memory_space<vmem>>, vector<1x64xf32>
    %132 = vector.broadcast %131 : vector<1x64xf32> to vector<64x64xf32>
    %133 = arith.addf %130, %132 : vector<64x64xf32>
    %cst_60 = arith.constant 0.000000e+00 : f32
    %134 = vector.broadcast %cst_60 : f32 to vector<64x64xf32>
    %135 = arith.maximumf %133, %134 : vector<64x64xf32>
    %136 = arith.truncf %135 : vector<64x64xf32> to vector<64x64xbf16>
    %c2_i32_61 = arith.constant 2 : i32
    %137 = tpu.dynamic_rotate %135 by %c2_i32_61 dim 0 : vector<64x64xf32>, i32 -> vector<64x64xf32>
    %c-2_i32_62 = arith.constant -2 : i32
    %138 = vector.broadcast %c-2_i32_62 : i32 to vector<64x1xi32>
    %139 = arith.addi %16, %138 : vector<64x1xi32>
    %c0_i32_63 = arith.constant 0 : i32
    %140 = vector.broadcast %c0_i32_63 : i32 to vector<64x1xi32>
    %141 = arith.cmpi sge, %139, %140 : vector<64x1xi32>
    %c-2_i32_64 = arith.constant -2 : i32
    %142 = vector.broadcast %c-2_i32_64 : i32 to vector<64x1xi32>
    %143 = arith.addi %16, %142 : vector<64x1xi32>
    %c8_i32_65 = arith.constant 8 : i32
    %144 = vector.broadcast %c8_i32_65 : i32 to vector<64x1xi32>
    %145 = arith.cmpi slt, %143, %144 : vector<64x1xi32>
    %146 = arith.andi %141, %145 : vector<64x1xi1>
    %cst_66 = arith.constant 0.000000e+00 : f32
    %147 = vector.shape_cast %146 : vector<64x1xi1> to vector<64x1xi1>
    %148 = vector.broadcast %147 : vector<64x1xi1> to vector<64x64xi1>
    %149 = vector.broadcast %cst_66 : f32 to vector<64x64xf32>
    %150 = arith.select %148, %137, %149 : vector<64x64xi1>, vector<64x64xf32>
    %151 = arith.truncf %150 : vector<64x64xf32> to vector<64x64xbf16>
    %c0_67 = arith.constant 0 : index
    %c0_68 = arith.constant 0 : index
    %152 = vector.load %arg19[%c0_67, %c0_68] : memref<64x320xbf16, #tpu.memory_space<vmem>>, vector<64x64xbf16>
    tpu.vector_store %arg19[%c0_67, %c0_68], %151 {strides = array<i32>} : memref<64x320xbf16, #tpu.memory_space<vmem>>, vector<64x64xbf16>,
    %c1_i32_69 = arith.constant 1 : i32
    %153 = tpu.dynamic_rotate %135 by %c1_i32_69 dim 0 : vector<64x64xf32>, i32 -> vector<64x64xf32>
    %c-1_i32_70 = arith.constant -1 : i32
    %154 = vector.broadcast %c-1_i32_70 : i32 to vector<64x1xi32>
    %155 = arith.addi %16, %154 : vector<64x1xi32>
    %c0_i32_71 = arith.constant 0 : i32
    %156 = vector.broadcast %c0_i32_71 : i32 to vector<64x1xi32>
    %157 = arith.cmpi sge, %155, %156 : vector<64x1xi32>
    %c-1_i32_72 = arith.constant -1 : i32
    %158 = vector.broadcast %c-1_i32_72 : i32 to vector<64x1xi32>
    %159 = arith.addi %16, %158 : vector<64x1xi32>
    %c8_i32_73 = arith.constant 8 : i32
    %160 = vector.broadcast %c8_i32_73 : i32 to vector<64x1xi32>
    %161 = arith.cmpi slt, %159, %160 : vector<64x1xi32>
    %162 = arith.andi %157, %161 : vector<64x1xi1>
    %cst_74 = arith.constant 0.000000e+00 : f32
    %163 = vector.shape_cast %162 : vector<64x1xi1> to vector<64x1xi1>
    %164 = vector.broadcast %163 : vector<64x1xi1> to vector<64x64xi1>
    %165 = vector.broadcast %cst_74 : f32 to vector<64x64xf32>
    %166 = arith.select %164, %153, %165 : vector<64x64xi1>, vector<64x64xf32>
    %167 = arith.truncf %166 : vector<64x64xf32> to vector<64x64xbf16>
    %c0_75 = arith.constant 0 : index
    %c64_76 = arith.constant 64 : index
    %168 = vector.load %arg19[%c0_75, %c64_76] : memref<64x320xbf16, #tpu.memory_space<vmem>>, vector<64x64xbf16>
    tpu.vector_store %arg19[%c0_75, %c64_76], %167 {strides = array<i32>} : memref<64x320xbf16, #tpu.memory_space<vmem>>, vector<64x64xbf16>,
    %c0_77 = arith.constant 0 : index
    %c128_78 = arith.constant 128 : index
    %169 = vector.load %arg19[%c0_77, %c128_78] : memref<64x320xbf16, #tpu.memory_space<vmem>>, vector<64x64xbf16>
    tpu.vector_store %arg19[%c0_77, %c128_78], %136 {strides = array<i32>} : memref<64x320xbf16, #tpu.memory_space<vmem>>, vector<64x64xbf16>,
    %c63_i32_79 = arith.constant 63 : i32
    %170 = tpu.dynamic_rotate %135 by %c63_i32_79 dim 0 : vector<64x64xf32>, i32 -> vector<64x64xf32>
    %c1_i32_80 = arith.constant 1 : i32
    %171 = vector.broadcast %c1_i32_80 : i32 to vector<64x1xi32>
    %172 = arith.addi %16, %171 : vector<64x1xi32>
    %c0_i32_81 = arith.constant 0 : i32
    %173 = vector.broadcast %c0_i32_81 : i32 to vector<64x1xi32>
    %174 = arith.cmpi sge, %172, %173 : vector<64x1xi32>
    %c1_i32_82 = arith.constant 1 : i32
    %175 = vector.broadcast %c1_i32_82 : i32 to vector<64x1xi32>
    %176 = arith.addi %16, %175 : vector<64x1xi32>
    %c8_i32_83 = arith.constant 8 : i32
    %177 = vector.broadcast %c8_i32_83 : i32 to vector<64x1xi32>
    %178 = arith.cmpi slt, %176, %177 : vector<64x1xi32>
    %179 = arith.andi %174, %178 : vector<64x1xi1>
    %cst_84 = arith.constant 0.000000e+00 : f32
    %180 = vector.shape_cast %179 : vector<64x1xi1> to vector<64x1xi1>
    %181 = vector.broadcast %180 : vector<64x1xi1> to vector<64x64xi1>
    %182 = vector.broadcast %cst_84 : f32 to vector<64x64xf32>
    %183 = arith.select %181, %170, %182 : vector<64x64xi1>, vector<64x64xf32>
    %184 = arith.truncf %183 : vector<64x64xf32> to vector<64x64xbf16>
    %c0_85 = arith.constant 0 : index
    %c192_86 = arith.constant 192 : index
    %185 = vector.load %arg19[%c0_85, %c192_86] : memref<64x320xbf16, #tpu.memory_space<vmem>>, vector<64x64xbf16>
    tpu.vector_store %arg19[%c0_85, %c192_86], %184 {strides = array<i32>} : memref<64x320xbf16, #tpu.memory_space<vmem>>, vector<64x64xbf16>,
    %c62_i32_87 = arith.constant 62 : i32
    %186 = tpu.dynamic_rotate %135 by %c62_i32_87 dim 0 : vector<64x64xf32>, i32 -> vector<64x64xf32>
    %c2_i32_88 = arith.constant 2 : i32
    %187 = vector.broadcast %c2_i32_88 : i32 to vector<64x1xi32>
    %188 = arith.addi %16, %187 : vector<64x1xi32>
    %c0_i32_89 = arith.constant 0 : i32
    %189 = vector.broadcast %c0_i32_89 : i32 to vector<64x1xi32>
    %190 = arith.cmpi sge, %188, %189 : vector<64x1xi32>
    %c2_i32_90 = arith.constant 2 : i32
    %191 = vector.broadcast %c2_i32_90 : i32 to vector<64x1xi32>
    %192 = arith.addi %16, %191 : vector<64x1xi32>
    %c8_i32_91 = arith.constant 8 : i32
    %193 = vector.broadcast %c8_i32_91 : i32 to vector<64x1xi32>
    %194 = arith.cmpi slt, %192, %193 : vector<64x1xi32>
    %195 = arith.andi %190, %194 : vector<64x1xi1>
    %cst_92 = arith.constant 0.000000e+00 : f32
    %196 = vector.shape_cast %195 : vector<64x1xi1> to vector<64x1xi1>
    %197 = vector.broadcast %196 : vector<64x1xi1> to vector<64x64xi1>
    %198 = vector.broadcast %cst_92 : f32 to vector<64x64xf32>
    %199 = arith.select %197, %186, %198 : vector<64x64xi1>, vector<64x64xf32>
    %200 = arith.truncf %199 : vector<64x64xf32> to vector<64x64xbf16>
    %c0_93 = arith.constant 0 : index
    %c256 = arith.constant 256 : index
    %201 = vector.load %arg19[%c0_93, %c256] : memref<64x320xbf16, #tpu.memory_space<vmem>>, vector<64x64xbf16>
    tpu.vector_store %arg19[%c0_93, %c256], %200 {strides = array<i32>} : memref<64x320xbf16, #tpu.memory_space<vmem>>, vector<64x64xbf16>,
    %c0_94 = arith.constant 0 : index
    %c0_95 = arith.constant 0 : index
    %202 = vector.load %arg19[%c0_94, %c0_95] : memref<64x320xbf16, #tpu.memory_space<vmem>>, vector<64x320xbf16>
    %c0_96 = arith.constant 0 : index
    %c0_97 = arith.constant 0 : index
    %203 = vector.load %arg9[%c0_96, %c0_97] : memref<320x128xbf16, #tpu.memory_space<vmem>>, vector<320x128xbf16>
    %cst_98 = arith.constant dense<0.000000e+00> : vector<64x128xf32>
    %204 = tpu.matmul %202, %203, %cst_98 {dimension_numbers = #tpu.dot_dimension_numbers<[1], [0], [0], [1], [0, 0, 1, 1], [], []>} : vector<64x320xbf16>, vector<320x128xbf16>, vector<64x128xf32> -> vector<64x128xf32>
    %c0_99 = arith.constant 0 : index
    %c0_100 = arith.constant 0 : index
    %205 = vector.load %arg10[%c0_99, %c0_100] : memref<1x128xf32, #tpu.memory_space<vmem>>, vector<1x128xf32>
    %206 = vector.broadcast %205 : vector<1x128xf32> to vector<64x128xf32>
    %207 = arith.addf %204, %206 : vector<64x128xf32>
    %cst_101 = arith.constant 0.000000e+00 : f32
    %208 = vector.broadcast %cst_101 : f32 to vector<64x128xf32>
    %209 = arith.maximumf %207, %208 : vector<64x128xf32>
    %210 = arith.truncf %209 : vector<64x128xf32> to vector<64x128xbf16>
    %c1_i32_102 = arith.constant 1 : i32
    %211 = tpu.dynamic_rotate %209 by %c1_i32_102 dim 0 : vector<64x128xf32>, i32 -> vector<64x128xf32>
    %c-1_i32_103 = arith.constant -1 : i32
    %212 = vector.broadcast %c-1_i32_103 : i32 to vector<64x1xi32>
    %213 = arith.addi %16, %212 : vector<64x1xi32>
    %c0_i32_104 = arith.constant 0 : i32
    %214 = vector.broadcast %c0_i32_104 : i32 to vector<64x1xi32>
    %215 = arith.cmpi sge, %213, %214 : vector<64x1xi32>
    %c-1_i32_105 = arith.constant -1 : i32
    %216 = vector.broadcast %c-1_i32_105 : i32 to vector<64x1xi32>
    %217 = arith.addi %16, %216 : vector<64x1xi32>
    %c8_i32_106 = arith.constant 8 : i32
    %218 = vector.broadcast %c8_i32_106 : i32 to vector<64x1xi32>
    %219 = arith.cmpi slt, %217, %218 : vector<64x1xi32>
    %220 = arith.andi %215, %219 : vector<64x1xi1>
    %cst_107 = arith.constant 0.000000e+00 : f32
    %221 = vector.shape_cast %220 : vector<64x1xi1> to vector<64x1xi1>
    %222 = vector.broadcast %221 : vector<64x1xi1> to vector<64x128xi1>
    %223 = vector.broadcast %cst_107 : f32 to vector<64x128xf32>
    %224 = arith.select %222, %211, %223 : vector<64x128xi1>, vector<64x128xf32>
    %225 = arith.truncf %224 : vector<64x128xf32> to vector<64x128xbf16>
    %c0_108 = arith.constant 0 : index
    %c0_109 = arith.constant 0 : index
    %226 = vector.load %arg20[%c0_108, %c0_109] : memref<64x384xbf16, #tpu.memory_space<vmem>>, vector<64x128xbf16>
    tpu.vector_store %arg20[%c0_108, %c0_109], %225 {strides = array<i32>} : memref<64x384xbf16, #tpu.memory_space<vmem>>, vector<64x128xbf16>,
    %c0_110 = arith.constant 0 : index
    %c128_111 = arith.constant 128 : index
    %227 = vector.load %arg20[%c0_110, %c128_111] : memref<64x384xbf16, #tpu.memory_space<vmem>>, vector<64x128xbf16>
    tpu.vector_store %arg20[%c0_110, %c128_111], %210 {strides = array<i32>} : memref<64x384xbf16, #tpu.memory_space<vmem>>, vector<64x128xbf16>,
    %c63_i32_112 = arith.constant 63 : i32
    %228 = tpu.dynamic_rotate %209 by %c63_i32_112 dim 0 : vector<64x128xf32>, i32 -> vector<64x128xf32>
    %c1_i32_113 = arith.constant 1 : i32
    %229 = vector.broadcast %c1_i32_113 : i32 to vector<64x1xi32>
    %230 = arith.addi %16, %229 : vector<64x1xi32>
    %c0_i32_114 = arith.constant 0 : i32
    %231 = vector.broadcast %c0_i32_114 : i32 to vector<64x1xi32>
    %232 = arith.cmpi sge, %230, %231 : vector<64x1xi32>
    %c1_i32_115 = arith.constant 1 : i32
    %233 = vector.broadcast %c1_i32_115 : i32 to vector<64x1xi32>
    %234 = arith.addi %16, %233 : vector<64x1xi32>
    %c8_i32_116 = arith.constant 8 : i32
    %235 = vector.broadcast %c8_i32_116 : i32 to vector<64x1xi32>
    %236 = arith.cmpi slt, %234, %235 : vector<64x1xi32>
    %237 = arith.andi %232, %236 : vector<64x1xi1>
    %cst_117 = arith.constant 0.000000e+00 : f32
    %238 = vector.shape_cast %237 : vector<64x1xi1> to vector<64x1xi1>
    %239 = vector.broadcast %238 : vector<64x1xi1> to vector<64x128xi1>
    %240 = vector.broadcast %cst_117 : f32 to vector<64x128xf32>
    %241 = arith.select %239, %228, %240 : vector<64x128xi1>, vector<64x128xf32>
    %242 = arith.truncf %241 : vector<64x128xf32> to vector<64x128xbf16>
    %c0_118 = arith.constant 0 : index
    %c256_119 = arith.constant 256 : index
    %243 = vector.load %arg20[%c0_118, %c256_119] : memref<64x384xbf16, #tpu.memory_space<vmem>>, vector<64x128xbf16>
    tpu.vector_store %arg20[%c0_118, %c256_119], %242 {strides = array<i32>} : memref<64x384xbf16, #tpu.memory_space<vmem>>, vector<64x128xbf16>,
    %c0_120 = arith.constant 0 : index
    %c0_121 = arith.constant 0 : index
    %244 = vector.load %arg20[%c0_120, %c0_121] : memref<64x384xbf16, #tpu.memory_space<vmem>>, vector<64x384xbf16>
    %c0_122 = arith.constant 0 : index
    %c0_123 = arith.constant 0 : index
    %245 = vector.load %arg11[%c0_122, %c0_123] : memref<384x128xbf16, #tpu.memory_space<vmem>>, vector<384x128xbf16>
    %cst_124 = arith.constant dense<0.000000e+00> : vector<64x128xf32>
    %246 = tpu.matmul %244, %245, %cst_124 {dimension_numbers = #tpu.dot_dimension_numbers<[1], [0], [0], [1], [0, 0, 1, 1], [], []>} : vector<64x384xbf16>, vector<384x128xbf16>, vector<64x128xf32> -> vector<64x128xf32>
    %c0_125 = arith.constant 0 : index
    %c0_126 = arith.constant 0 : index
    %247 = vector.load %arg12[%c0_125, %c0_126] : memref<1x128xf32, #tpu.memory_space<vmem>>, vector<1x128xf32>
    %248 = vector.broadcast %247 : vector<1x128xf32> to vector<64x128xf32>
    %249 = arith.addf %246, %248 : vector<64x128xf32>
    %cst_127 = arith.constant 0.000000e+00 : f32
    %250 = vector.broadcast %cst_127 : f32 to vector<64x128xf32>
    %251 = arith.maximumf %249, %250 : vector<64x128xf32>
    %252 = arith.truncf %251 : vector<64x128xf32> to vector<64x128xbf16>
    %c0_128 = arith.constant 0 : index
    %c0_129 = arith.constant 0 : index
    %253 = vector.load %arg13[%c0_128, %c0_129] : memref<128x64xbf16, #tpu.memory_space<vmem>>, vector<128x64xbf16>
    %cst_130 = arith.constant dense<0.000000e+00> : vector<64x64xf32>
    %254 = tpu.matmul %252, %253, %cst_130 {dimension_numbers = #tpu.dot_dimension_numbers<[1], [0], [0], [1], [0, 0, 1, 1], [], []>} : vector<64x128xbf16>, vector<128x64xbf16>, vector<64x64xf32> -> vector<64x64xf32>
    %255 = math.tanh %254 : vector<64x64xf32>
    %c0_131 = arith.constant 0 : index
    %c0_132 = arith.constant 0 : index
    %256 = vector.load %arg14[%c0_131, %c0_132] : memref<1x64xf32, #tpu.memory_space<vmem>>, vector<1x64xf32>
    %257 = vector.broadcast %256 : vector<1x64xf32> to vector<64x64xf32>
    %258 = arith.mulf %255, %257 : vector<64x64xf32>
    %cst_133 = arith.constant dense<0.000000e+00> : vector<64xf32>
    %259 = vector.multi_reduction <add>, %258, %cst_133 [1] : vector<64x64xf32> to vector<64xf32>
    %260 = vector.shape_cast %259 : vector<64xf32> to vector<64x1xf32>
    %c0_134 = arith.constant 0 : index
    %c0_135 = arith.constant 0 : index
    %261 = vector.load %arg14[%c0_134, %c0_135] : memref<1x64xf32, #tpu.memory_space<vmem>>, vector<1x64xf32>
    %262 = math.absf %261 : vector<1x64xf32>
    %cst_136 = arith.constant dense<0.000000e+00> : vector<1xf32>
    %263 = vector.multi_reduction <add>, %262, %cst_136 [1] : vector<1x64xf32> to vector<1xf32>
    %264 = vector.shape_cast %263 : vector<1xf32> to vector<1x1xf32>
    %265 = vector.broadcast %264 : vector<1x1xf32> to vector<64x1xf32>
    %266 = arith.subf %260, %265 : vector<64x1xf32>
    %267 = math.exp %266 : vector<64x1xf32>
    %c0_137 = arith.constant 0 : index
    %c0_138 = arith.constant 0 : index
    %268 = vector.load %arg2[%c0_137, %c0_138] : memref<8x64xf32, #tpu.memory_space<vmem>>, vector<8x64xf32>
    %cst_139 = arith.constant dense<0.000000e+00> : vector<8x1xf32>
    %269 = tpu.matmul %268, %267, %cst_139 {dimension_numbers = #tpu.dot_dimension_numbers<[1], [0], [0], [1], [0, 0, 1, 1], [], []>} : vector<8x64xf32>, vector<64x1xf32>, vector<8x1xf32> -> vector<8x1xf32>
    %c0_140 = arith.constant 0 : index
    %c0_141 = arith.constant 0 : index
    %270 = vector.load %arg2[%c0_140, %c0_141] : memref<8x64xf32, #tpu.memory_space<vmem>>, vector<8x64xf32>
    %271 = vector.broadcast %267 : vector<64x1xf32> to vector<64x128xf32>
    %272 = arith.mulf %271, %251 : vector<64x128xf32>
    %cst_142 = arith.constant dense<0.000000e+00> : vector<8x128xf32>
    %273 = tpu.matmul %270, %272, %cst_142 {dimension_numbers = #tpu.dot_dimension_numbers<[1], [0], [0], [1], [0, 0, 1, 1], [], []>} : vector<8x64xf32>, vector<64x128xf32>, vector<8x128xf32> -> vector<8x128xf32>
    %274 = vector.broadcast %269 : vector<8x1xf32> to vector<8x128xf32>
    %275 = arith.divf %273, %274 : vector<8x128xf32>
    %276 = arith.truncf %275 : vector<8x128xf32> to vector<8x128xbf16>
    %c0_143 = arith.constant 0 : index
    %c0_144 = arith.constant 0 : index
    %277 = vector.load %arg15[%c0_143, %c0_144] : memref<128x128xbf16, #tpu.memory_space<vmem>>, vector<128x128xbf16>
    %cst_145 = arith.constant dense<0.000000e+00> : vector<8x128xf32>
    %278 = tpu.matmul %276, %277, %cst_145 {dimension_numbers = #tpu.dot_dimension_numbers<[1], [0], [0], [1], [0, 0, 1, 1], [], []>} : vector<8x128xbf16>, vector<128x128xbf16>, vector<8x128xf32> -> vector<8x128xf32>
    %c0_146 = arith.constant 0 : index
    %c0_147 = arith.constant 0 : index
    %279 = vector.load %arg16[%c0_146, %c0_147] : memref<1x128xf32, #tpu.memory_space<vmem>>, vector<1x128xf32>
    %280 = vector.broadcast %279 : vector<1x128xf32> to vector<8x128xf32>
    %281 = arith.addf %278, %280 : vector<8x128xf32>
    %c0_148 = arith.constant 0 : index
    %c0_149 = arith.constant 0 : index
    %282 = vector.load %arg17[%c0_148, %c0_149] : memref<8x128xf32, #tpu.memory_space<vmem>>, vector<8x128xf32>
    tpu.vector_store %arg17[%c0_148, %c0_149], %281 {strides = array<i32>} : memref<8x128xf32, #tpu.memory_space<vmem>>, vector<8x128xf32>,
    return
  }
  func.func @transform_0(%arg0: i32) -> (i32, i32) {
    %c0_i32 = arith.constant 0 : i32
    %c0_i32_0 = arith.constant 0 : i32
    return %arg0, %c0_i32 : i32, i32
  }
  func.func @transform_1(%arg0: i32) -> (i32, i32) {
    %c0_i32 = arith.constant 0 : i32
    %c0_i32_0 = arith.constant 0 : i32
    %c0_i32_1 = arith.constant 0 : i32
    return %c0_i32, %c0_i32_0 : i32, i32
  }
  func.func @transform_2(%arg0: i32) -> (i32, i32) {
    %c0_i32 = arith.constant 0 : i32
    %c0_i32_0 = arith.constant 0 : i32
    %c0_i32_1 = arith.constant 0 : i32
    return %c0_i32, %c0_i32_0 : i32, i32
  }
  func.func @transform_3(%arg0: i32) -> (i32, i32) {
    %c0_i32 = arith.constant 0 : i32
    %c0_i32_0 = arith.constant 0 : i32
    %c0_i32_1 = arith.constant 0 : i32
    return %c0_i32, %c0_i32_0 : i32, i32
  }
  func.func @transform_4(%arg0: i32) -> (i32, i32) {
    %c0_i32 = arith.constant 0 : i32
    %c0_i32_0 = arith.constant 0 : i32
    %c0_i32_1 = arith.constant 0 : i32
    return %c0_i32, %c0_i32_0 : i32, i32
  }
  func.func @transform_5(%arg0: i32) -> (i32, i32) {
    %c0_i32 = arith.constant 0 : i32
    %c0_i32_0 = arith.constant 0 : i32
    %c0_i32_1 = arith.constant 0 : i32
    return %c0_i32, %c0_i32_0 : i32, i32
  }
  func.func @transform_6(%arg0: i32) -> (i32, i32) {
    %c0_i32 = arith.constant 0 : i32
    %c0_i32_0 = arith.constant 0 : i32
    %c0_i32_1 = arith.constant 0 : i32
    return %c0_i32, %c0_i32_0 : i32, i32
  }
  func.func @transform_7(%arg0: i32) -> (i32, i32) {
    %c0_i32 = arith.constant 0 : i32
    %c0_i32_0 = arith.constant 0 : i32
    %c0_i32_1 = arith.constant 0 : i32
    return %c0_i32, %c0_i32_0 : i32, i32
  }
  func.func @transform_8(%arg0: i32) -> (i32, i32) {
    %c0_i32 = arith.constant 0 : i32
    %c0_i32_0 = arith.constant 0 : i32
    %c0_i32_1 = arith.constant 0 : i32
    return %c0_i32, %c0_i32_0 : i32, i32
  }
  func.func @transform_9(%arg0: i32) -> (i32, i32) {
    %c0_i32 = arith.constant 0 : i32
    %c0_i32_0 = arith.constant 0 : i32
    %c0_i32_1 = arith.constant 0 : i32
    return %c0_i32, %c0_i32_0 : i32, i32
  }
  func.func @transform_10(%arg0: i32) -> (i32, i32) {
    %c0_i32 = arith.constant 0 : i32
    %c0_i32_0 = arith.constant 0 : i32
    %c0_i32_1 = arith.constant 0 : i32
    return %c0_i32, %c0_i32_0 : i32, i32
  }
  func.func @transform_11(%arg0: i32) -> (i32, i32) {
    %c0_i32 = arith.constant 0 : i32
    %c0_i32_0 = arith.constant 0 : i32
    %c0_i32_1 = arith.constant 0 : i32
    return %c0_i32, %c0_i32_0 : i32, i32
  }
  func.func @transform_12(%arg0: i32) -> (i32, i32) {
    %c0_i32 = arith.constant 0 : i32
    %c0_i32_0 = arith.constant 0 : i32
    %c0_i32_1 = arith.constant 0 : i32
    return %c0_i32, %c0_i32_0 : i32, i32
  }
  func.func @transform_13(%arg0: i32) -> (i32, i32) {
    %c0_i32 = arith.constant 0 : i32
    %c0_i32_0 = arith.constant 0 : i32
    %c0_i32_1 = arith.constant 0 : i32
    return %c0_i32, %c0_i32_0 : i32, i32
  }
  func.func @transform_14(%arg0: i32) -> (i32, i32) {
    %c0_i32 = arith.constant 0 : i32
    %c0_i32_0 = arith.constant 0 : i32
    %c0_i32_1 = arith.constant 0 : i32
    return %c0_i32, %c0_i32_0 : i32, i32
  }
  func.func @transform_15(%arg0: i32) -> (i32, i32) {
    %c0_i32 = arith.constant 0 : i32
    %c0_i32_0 = arith.constant 0 : i32
    %c0_i32_1 = arith.constant 0 : i32
    return %c0_i32, %c0_i32_0 : i32, i32
  }
  func.func @transform_16(%arg0: i32) -> (i32, i32) {
    %c0_i32 = arith.constant 0 : i32
    %c0_i32_0 = arith.constant 0 : i32
    return %arg0, %c0_i32 : i32, i32
  }
}

</mosaic_0001>

<bundles_post_ra>
// kernel: tpu_custom_call.1
= control target key start
LH: loop header
LB: loop body
LE: loop exit
PB: predicated region body
PF: predicated region fallthrough
CT: control target
= control target key end

     0   :  { %s5773_s0 = inlined_call_operand.vmem [shape: bf16[256,32], index: 0, kind: input, shape index: {}]   ;;  %s5774_s1 = inlined_call_operand.vmem [shape: f32[8,64], index: 1, kind: input, shape index: {}]   ;;  %s5775_s2 = inlined_call_operand.vmem [shape: f32[64,8], index: 2, kind: input, shape index: {}]   ;;  %s5776_s3 = inlined_call_operand.vmem [shape: bf16[32,32], index: 3, kind: input, shape index: {}]   ;;  %s5777_s4 = inlined_call_operand.hbm [shape: f32[32,32], index: 4, kind: input, shape index: {}]   ;;  %s5778_s5 = inlined_call_operand.vmem [shape: f32[64,32], index: 5, kind: input, shape index: {}]   ;;  %s5779_s6 = inlined_call_operand.vmem [shape: bf16[224,64], index: 6, kind: input, shape index: {}]   ;;  %s5780_s7 = inlined_call_operand.vmem [shape: f32[1,64], index: 7, kind: input, shape index: {}]   ;;  %s5781_s8 = inlined_call_operand.vmem [shape: bf16[320,128], index: 8, kind: input, shape index: {}]   ;;  %s5782_s9 = inlined_call_operand.vmem [shape: f32[1,128], index: 9, kind: input, shape index: {}]   ;;  %s5783_s10 = inlined_call_operand.vmem [shape: bf16[384,128], index: 10, kind: input, shape index: {}]   ;;  %s5784_s11 = inlined_call_operand.vmem [shape: f32[1,128], index: 11, kind: input, shape index: {}]   ;;  %s5785_s12 = inlined_call_operand.vmem [shape: bf16[128,64], index: 12, kind: input, shape index: {}]   ;;  %s5786_s13 = inlined_call_operand.vmem [shape: f32[1,64], index: 13, kind: input, shape index: {}]   ;;  %s5787_s14 = inlined_call_operand.vmem [shape: bf16[128,128], index: 14, kind: input, shape index: {}]   ;;  %s5788_s15 = inlined_call_operand.vmem [shape: f32[1,128], index: 15, kind: input, shape index: {}]   ;;  %s5789_s16 = inlined_call_operand.hbm [shape: f32[32,128], index: 16, kind: output, shape index: {}]  }
   0x1   :  { %5851 = sst [smem:[#allocation36_spill]] %s5773_s0 }
   0x2   :  { %21 = vsyncpa [#allocation6], 0 }
   0x3   :  { %22 = vsyncpa [#allocation7], 0 }
   0x4   :  { %24 = vsyncpa [#allocation7 + $0x1], 0  ;;  %s4269_s21 = smov 0   ;;  %s4271_s22 = smov 0  }
   0x5   :  { %s4273_s23 = smov 0   ;;  %s4275_s24 = smov 0  }
   0x6 LB: > { %5852 = sst [smem:[#allocation11_spill]] %s4159_s21  ;;  %s4290_s25 = sadd.s32 4294967295, %s4171_s24   ;;  %s4171_s24 = sphi %s4275_s24, %s6057_s24   ;;  %s4167_s23 = sphi %s4273_s23, %s6059_s23   ;;  %s4163_s22 = sphi %s4271_s22, %s6061_s22   ;;  %s4159_s21 = sphi %s4269_s21, %s6060_s21  }
   0x7   : > { %5853 = sst [smem:[#allocation12_spill]] %s4167_s23  ;;  %s3366_s26 = sadd.s32 4294967294, %s4171_s24  }
   0x8   : > { %5854 = sst [smem:[#allocation13_spill]] %s4171_s24  ;;  %s4294_s27 = sadd.s32 1, %s4171_s24  }
   0x9   : > { %5855 = sst [smem:[#allocation14_spill]] %s4294_s27  ;;  %s378_s28 = sadd.s32 1, %s4167_s23 }
   0xa   : > { %s375_s29 = ssub.s32 %s4171_s24, %s4294_s27  ;;  %p388_p0 = scmp.ne.s32.totalorder %s4167_s23, %s4163_s22 }
   0xb   : > { %p376_p1 = scmp.eq.s32.totalorder %s375_s29, 0  ;;  %p389_p2 = scmp.eq.s32.totalorder %s4290_s25, 3 }
   0xc   : > { %p394_p3 = scmp.ne.s32.totalorder %s4163_s22, %s4159_s21  ;;  %p395_p4 = scmp.eq.s32.totalorder %s3366_s26, 3 }
   0xd   : > { %s4305_s30 = scalar_select %p376_p1, %s4167_s23, %s378_s28  }
   0xe   : > { %p4307_p5 = por %p389_p2, %p388_p0  ;;  %p4311_p6 = por %p395_p4, %p394_p3 }
   0xf   : > { %5856 = sst [smem:[#allocation15_spill]] %s4305_s30  ;;  %p3367_p7 = scmp.ge.s32.totalorder %s4171_s24, 1 }
  0x10   : > { %s5857_s0 = scalar_select %p4307_p5, 1, 0 }
  0x11   : > { %s5858_s17 = scalar_select %p4311_p6, 1, 0 }
  0x12   : > { %p402_p8 = scmp.lt.s32.totalorder %s4171_s24, 5  ;;  %p5795_p9 = scmp.eq.s32.totalorder %s4290_s25, 0 }
  0x13   : > { %5859 = sst [smem:[#allocation16_spill]] %s5858_s17  ;;  %s4173_s19 = smov [#allocation5]  }
  0x14   : > { %p4318_p10 = pnand %p3367_p7, %p402_p8  ;;  %s423_s20 = sshll.u32 %s4173_s19, 4  ;;  %s424_s20 = int_to_ptr.vmem [resolvable:$true] %s423_s20 }
  0x15   : > { %s4077_s30 = scalar_lea.hbm %s5777_s4, 512 }
  0x16   : > { %s5860_s18 = scalar_select %p4318_p10, 1, 0 }
  0x17   : > { %p3909_p11 = pneg %p4318_p10  ;;  %p4078_p13 = scmp.ne.s32.totalorder %s5777_s4, %s4077_s30 }
  0x18   : > { %p4084_p3 = scmp.lt.u32.totalorder %s4077_s30, %s5777_s4 }
  0x19   : > { %p4326_p12 = pnand %p5795_p9, %p3909_p11 }
  0x1b   : > { %p4079_p0 = pneg %p4326_p12 }
  0x1d   : > { %p4080_p1 = pnand %p4079_p0, %p4078_p13 }
  0x1f   : > { %p4081_p2 = pneg %p4080_p1 }
  0x21   : > { %p4086_p4 = pnand %p4084_p3, %p4081_p2 }
  0x23   : > { %4089 = shalt.err (!%p4086_p4)
}
  0x24   : > { %s4090_s21 = scalar_lea.vmem %s424_s20, 512  ;;  %p4098_p9 = scmp.lt.s32.totalorder %s424_s20, %s424_s20 }
  0x25   : > { %p4091_p7 = scmp.ne.s32.totalorder %s424_s20, %s4090_s21  ;;  %p4099_p6 = scmp.lt.s32.totalorder %s4090_s21, %s4090_s21 }
  0x27   : > { %p4093_p8 = pnand %p4091_p7, %p4079_p0  ;;  %p4100_p5 = por %p4099_p6, %p4098_p9 }
  0x29   : > { %p4094_p11 = pneg %p4093_p8 }
  0x2b   : > { %p4101_p10 = pnand %p4100_p5, %p4094_p11 }
  0x2d   : > { %4104 = shalt.err (!%p4101_p10)
}
  0x2e   : > { %s4174_s23 = smov 128   ;;  %s4175_s27 = smov 8  }
  0x2f   : > { %3912 = dma.hbm_to_vmem [thread:$0]  (!%p4326_p12), %s5777_s4, 512, %s424_s20, [#allocation6], %s4174_s23, %s4174_s23, %s4175_s27  }
  0x30   : > { %p5862_p13 = scmp.ne.s32.totalorder %s5860_s18, 0 }
  0x32   : > { %481 = sbr.rel (%p5862_p13) target bundleno = 2750 (0xabe), region = 84 }
  0x39   : > { %p5863_p1 = scmp.eq.s32.totalorder %s4290_s25, 0 }
  0x3b   : > { %4150 = dma.done.wait (%p5863_p1), [#allocation6], 512   ;;  %p5864_p0 = pmov %p5863_p1 }
  0x3c   : > { %s3373_s21 = sshll.u32 %s4290_s25, 3  ;;  %s5865_s19 = sld [smem:[#allocation36_spill]]  ;;  %v3963_v0 = vld [vmem:[%s5776_s3] sm:$0xff]   ;;  %v3964_v1 = vld [vmem:[%s5776_s3 + $0x8] sm:$0xff]   ;;  %vm5819_vm0 = vcmask 261120   ;;  %v5801_v5 = vmov 0.0|0.0   ;;  %v538_v44 = vlaneseq }
  0x3d   : > { %4152 = vsyncadd (%p5864_p0), [#allocation6], 4294966784  ;;  %p532_p5 = scmp.lt.s32.totalorder %s3373_s21, 31  ;;  %3679 = vmatprep.subr.bf16.mxu0 %v3963_v0  ;;  %vm5818_vm1 = vcmask 523264   ;;  %vm5814_vm2 = vmmov 0   ;;  %v5799_v7 = vmov 0.0  }
  0x3e   : > { %3680 = vmatpush3.bf16.msra.mxu0 %v3963_v0  ;;  %v773_v8 = vld [vmem:[%s5774_s1] sm:$0xff]  ;;  %v849_v10 = vld [vmem:[#allocation5 + $0x8] sm:$0xff]  ;;  %v850_v12 = vld [vmem:[#allocation5 + $0x10] sm:$0xff]  ;;  %vm933_vm3 = vcmask 64512   ;;  %v5803_v36 = vmov 0   ;;  %v4463_v45 = vshrl.u32 %v538_v44, 7 }
  0x3f   : > { %s6063_s21 = smov (!%p532_p5, %s3373_s21), 31  ;;  %3681 = vmatprep.subr.bf16.mxu0 %v3964_v1  ;;  %v848_v9 = vld [vmem:[#allocation5] sm:$0xff]  ;;  %v851_v13 = vld [vmem:[#allocation5 + $0x18] sm:$0xff]  ;;  %v926_v27 = vld [vmem:[%s5775_s2 + $0x8] sm:$0xff]  ;;  %3962 = vset.pattern.permute.xlu0 %v5803_v36  ;;  %s4182_s17 = smov 32  }
  0x40   : > { %s3374_s30 = sshll.u32 %s6063_s21, 2  ;;  %v3870_v11 = vpack.c.bf16 %v849_v10, %v848_v9  ;;  %v3873_v14 = vpack.c.bf16 %v851_v13, %v850_v12  ;;  %v925_v25 = vld [vmem:[%s5775_s2] sm:$0xff]  ;;  %v927_v29 = vld [vmem:[%s5775_s2 + $0x10] sm:$0xff]  ;;  %v928_v30 = vld [vmem:[%s5775_s2 + $0x18] sm:$0xff]  ;;  %v540_v46 = vadd.s32 8, %v4463_v45  ;;  %v541_v47 = vadd.s32 16, %v4463_v45 }
  0x41   : > { %3723 = vmatprep.mubr.msk.f32.mxu1 %vm933_vm3, %v925_v25  ;;  %v929_v31 = vld [vmem:[%s5775_s2 + $0x20] sm:$0xff]  ;;  %v930_v32 = vld [vmem:[%s5775_s2 + $0x28] sm:$0xff]  ;;  %v931_v33 = vld [vmem:[%s5775_s2 + $0x30] sm:$0xff]  ;;  %v542_v48 = vadd.s32 24, %v4463_v45  ;;  %v4469_v49 = vand.u32 7, %v4463_v45  ;;  %v543_v52 = vadd.s32 32, %v4463_v45 }
  0x42   : > { %s535_s24 = scalar_lea.vmem %s5865_s19, %s3374_s30  ;;  %3682 = vmatpush3.bf16.msra.mxu0 %v3964_v1  ;;  %v932_v34 = vld [vmem:[%s5775_s2 + $0x38] sm:$0xff]  ;;  %v3969_v35 = vld [vmem:[%s5779_s6] sm:$0xff]   ;;  %v3970_v37 = vld [vmem:[%s5779_s6 + $0x8] sm:$0xff]   ;;  %v558_v50 = vand.u32 7, %v540_v46  ;;  %v4471_v51 = vand.u32 7, %v541_v47  ;;  %v544_v53 = vadd.s32 40, %v4463_v45 }
  0x43   : > { %v3965_v2 = vld [vmem:[%s535_s24] sm:$0xff]   ;;  %v3966_v3 = vld [vmem:[%s535_s24 + $0x8] sm:$0xff]   ;;  %v3967_v4 = vld [vmem:[%s535_s24 + $0x10] sm:$0xff]   ;;  %3857 = vmatprep.subr.bf16.mxu0 %v5801_v5  ;;  %v572_v54 = vand.u32 7, %v542_v48  ;;  %v545_v55 = vadd.s32 48, %v4463_v45  ;;  %v546_v56 = vadd.s32 56, %v4463_v45 }
  0x44   : > { %3683 = vmatprep.mubr.msk.bf16.mxu0 %vm5819_vm0, %v3965_v2  ;;  %v3968_v6 = vld [vmem:[%s535_s24 + $0x18] sm:$0xff]   ;;  %v3971_v38 = vld [vmem:[%s5779_s6 + $0x10] sm:$0xff]   ;;  %v3973_v40 = vld [vmem:[%s5779_s6 + $0x20] sm:$0xff]   ;;  %v4478_v57 = vadd.s32 3, %v4469_v49  ;;  %v4480_v58 = vadd.s32 3, %v558_v50  ;;  %v4483_v59 = vadd.s32 2, %v4469_v49 }
  0x45   : > { %3684 = vmatmul.mubr.msk.bf16.vlgmr.msra.gmra.mrb[0].mxu0 %vm5819_vm0, %v3966_v3  ;;  %v3972_v39 = vld [vmem:[%s5779_s6 + $0x18] sm:$0xff]   ;;  %v3974_v41 = vld [vmem:[%s5779_s6 + $0x28] sm:$0xff]   ;;  %v3975_v42 = vld [vmem:[%s5779_s6 + $0x30] sm:$0xff]   ;;  %v4485_v60 = vadd.s32 4294967294, %v558_v50  ;;  %v4487_v61 = vadd.s32 2, %v558_v50  ;;  %v4490_v62 = vadd.s32 4294967294, %v4471_v51 }
  0x46   : > { %3859 = vmatpush3.bf16.msra.mxu0 %v3965_v2  ;;  %3687 = vmatprep.mubr.msk.bf16.mxu0 %vm5819_vm0, %v3967_v4  ;;  %v3976_v43 = vld [vmem:[%s5779_s6 + $0x38] sm:$0xff]   ;;  %5866 = vst [vmem:[#allocation17_spill] sm:$0xff] %v4483_v59  ;;  %v579_v63 = vand.u32 7, %v543_v52  ;;  %v586_v0 = vand.u32 7, %v544_v53  ;;  %v4492_v1 = vadd.s32 4294967294, %v572_v54  ;;  %v4494_v2 = vadd.s32 4294967295, %v558_v50 }
  0x47   : > { %3860 = vmatprep.subr.bf16.mxu0 %v5801_v5  ;;  %v4507_v9 = vand.u32 7, %v545_v55  ;;  %v4509_v10 = vand.u32 7, %v546_v56  ;;  %v4515_v12 = vadd.s32 4294967295, %v4469_v49  ;;  %v4517_v13 = vadd.s32 2, %v572_v54  ;;  %v1071_v55 = vld [vmem:[%s5778_s5] sm:$0xff]  ;;  %s4180_s24 = smov 96  }
  0x48   : > { %v4526_v25 = vadd.s32 4294967294, %v586_v0  ;;  %vm1575_vm4 = vcmp.lt.s32.totalorder %v4463_v45, 5  ;;  %vm5849_vm5 = vcmp.lt.s32.totalorder %v4463_v45, 6  ;;  %vm1600_vm6 = vcmp.lt.s32.totalorder %v4478_v57, 8  ;;  %s4181_s30 = smov 64   ;;  %s528_s26 = sand.u32 1, %s4163_s22  }
  0x49   : > { %vm5823_vm7 = vcmp.lt.s32.totalorder %v4483_v59, 8  ;;  %vm5845_vm8 = vcmp.lt.s32.totalorder %v4463_v45, 2  ;;  %vm5847_vm9 = vcmp.lt.s32.totalorder %v4463_v45, 1  ;;  %v4578_v44 = vadd.s32 1, %v4469_v49  ;;  %s3372_s19 = sshll.u32 %s528_s26, 3  ;;  %s3484_s20 = sshll.u32 %s4290_s25, 7 }
  0x4a   : > { %3862 = vmatpush3.bf16.msra.mxu0 %v3966_v3  ;;  %v4497_v3 = vadd.s32 2, %v4471_v51  ;;  %v4580_v46 = vadd.s32 1, %v558_v50  ;;  %v4583_v47 = vadd.s32 4294967293, %v4471_v51  ;;  %v4585_v48 = vadd.s32 4294967293, %v558_v50  ;;  %s530_s18 = scalar_lea.vmem [#allocation8], %s3372_s19  ;;  %s5731_s21 = scalar_lea.hbm %s5789_s16, %s3484_s20 }
  0x4b   : > { %3863 = vmatprep.subr.bf16.mxu0 %v5801_v5  ;;  %v4592_v56 = vadd.s32 4294967293, %v572_v54  ;;  %vm1601_vm10 = vcmp.lt.s32.totalorder %v4480_v58, 8  ;;  %vm5828_vm11 = vcmp.lt.s32.totalorder %v4487_v61, 8  ;;  %v4604_v50 = vadd.s32 4294967293, %v586_v0  ;;  %s3295_s23 = sshll.u32 %s530_s18, 4  ;;  %p6052_p9 = scmp.ne.s32.totalorder %s5857_s0, 0  ;;  %s5733_s23 = int_to_ptr.vmem [resolvable:$true] %s3295_s23 }
  0x4c   : > { %5870 = vst [vmem:[#allocation21_spill] sm:$0xff] %v4580_v46  ;;  %5871 = vst [vmem:[#allocation22_spill] sm:$0xff] %v4583_v47  ;;  %vm5832_vm12 = vcmp.ge.s32.totalorder %v4490_v62, 0  ;;  %vm5831_vm13 = vcmp.ge.s32.totalorder %v4492_v1, 0  ;;  %vm5829_vm14 = vcmp.ge.s32.totalorder %v4485_v60, 0  ;;  %vm5830_vm15 = vcmp.ge.s32.totalorder %v4494_v2, 0 }
  0x4d   : > { %3688 = vmatmul.mubr.msk.bf16.gmra.mrb[4].mxu0 %vm5819_vm0, %v3968_v6  ;;  %5872 = vst [vmem:[#allocation23_spill] sm:$0xff] %v4585_v48  ;;  %5873 = vst [vmem:[#allocation24_spill] sm:$0xff] %v4592_v56  ;;  %s4105_s25 = scalar_lea.vmem %s5733_s23, 128 }
  0x4e   : > { %3865 = vmatpush3.bf16.msra.mxu0 %v3967_v4  ;;  %3707 = vmatprep.mubr.msk.f32.mxu0 %vm5814_vm2, %v5799_v7  ;;  %v4500_v4 = vadd.s32 4294967295, %v4471_v51  ;;  %5877 = vst [vmem:[#allocation28_spill] sm:$0xff] %v4604_v50  ;;  %p4106_p6 = scmp.ne.s32.totalorder %s5733_s23, %s4105_s25 }
  0x4f   : > { %3866 = vmatprep.subr.bf16.mxu0 %v5801_v5 }
  0x50   : > { %p4107_p10 = pnand %p4106_p6, %p6052_p9 }
  0x52   : > { %3868 = vmatpush3.bf16.msra.mxu0 %v3968_v6  ;;  %v4503_v6 = vadd.s32 4294967294, %v4469_v49  ;;  %p4108_p12 = pneg %p4107_p10 }
  0x53   : > { %3869 = vmatprep.subr.bf16.mxu0 %v5801_v5 }
  0x54   : > { %5867 = vst [vmem:[#allocation18_spill] sm:$0xff] %v4503_v6 }
  0x55   : > { %3708 = vmatmul.mubr.msk.f32.vlgmr.msra.gmra.mrb[8].mxu0 %vm5818_vm1, %v773_v8  ;;  %v4505_v8 = vadd.s32 4294967295, %v572_v54  ;;  %vm5834_vm1 = vcmp.ge.s32.totalorder %v4503_v6, 0 }
  0x56   : > { %3718 = vmatprep.mubr.msk.f32.mxu0 %vm5814_vm2, %v5799_v7  ;;  %3871 = vmatpush3.bf16.msra.mxu0 %v3870_v11  ;;  %v3977_v11 = vld [vmem:[%s5779_s6 + $0x40] sm:$0xff]   ;;  %vm5836_vm2 = vcmp.ge.s32.totalorder %v4500_v4, 0 }
  0x57   : > { %3872 = vmatprep.subr.bf16.mxu0 %v5801_v5 }
  0x5a   : > { %3874 = vmatpush3.bf16.msra.mxu0 %v3873_v14  ;;  %v4520_v14 = vadd.s32 3, %v4471_v51 }
 0x118   : > { %v4380_v15 = vpop.f32.mrb[0].mxu0 }
 0x119   : > { %v4382_v16 = vpop.f32.mrb[1].mxu0 }
 0x11a   : > { %v4384_v17 = vpop.f32.mrb[2].mxu0 }
 0x11b   : > { %v4386_v18 = vpop.f32.mrb[3].mxu0 }
 0x120   : > { %v4388_v19 = vpop.f32.mrb[4].mxu0 }
 0x121   : > { %v4390_v20 = vpop.f32.mrb[5].mxu0 }
 0x122   : > { %v4392_v21 = vpop.f32.mrb[6].mxu0 }
 0x123   : > { %v4394_v22 = vpop.f32.mrb[7].mxu0 }
 0x128   : > { %v844_v23 = vpop.f32.mrb[8].mxu0 }
 0x129   : > { %v3709_v24 = vpop.f32.mrb[9].mxu0  ;;  %3719 = vmatmul.mubr.msk.f32.vlgmr.msra.gmra.mrb[10].mxu0 %vm5819_vm0, %v844_v23  ;;  %v4522_v23 = vadd.s32 3, %v572_v54  ;;  %vm5835_vm0 = vcmp.ge.s32.totalorder %v4515_v12, 0 }
 0x12a   : > { %v4524_v24 = vadd.s32 4294967294, %v579_v63 }
 0x1fc   : > { %v921_v26 = vpop.f32.mrb[10].mxu0 }
 0x1fd   : > { %v3720_v28 = vpop.f32.mrb[11].mxu0  ;;  %3721 = vmatprep.subr.mxu1 %v921_v26 }
 0x1fe   : > { %3722 = vmatpush3.msra.mxu1 %v921_v26  ;;  %v4528_v26 = vadd.s32 2, %v579_v63  ;;  %v3978_v28 = vld [vmem:[%s5779_s6 + $0x48] sm:$0xff]  }
 0x1ff   : > { %3724 = vmatmul.mubr.msk.f32.vlgmr.msra.gmra.mrb[0].mxu1 %vm933_vm3, %v926_v27  ;;  %1804 = vmatprep.subr.bf16.mxu1 %v5803_v36  ;;  %v4530_v27 = vadd.s32 4294967295, %v579_v63 }
 0x200   : > { %3726 = vmatprep.mubr.msk.f32.mxu1 %vm933_vm3, %v927_v29  ;;  %1805 = vmatpush1.bf16.msra.mxu1 %v3969_v35  ;;  %v4537_v29 = vadd.s32 2, %v586_v0  ;;  %v4555_v35 = vadd.s32 2, %v4507_v9 }
 0x201   : > { %1806 = vmatprep.subr.bf16.mxu1 %v5803_v36 }
 0x203   : > { %3727 = vmatmul.mubr.msk.f32.gmra.mrb[2].mxu1 %vm933_vm3, %v928_v30  ;;  %v4539_v30 = vadd.s32 4294967295, %v586_v0 }
 0x204   : > { %3729 = vmatprep.mubr.msk.f32.mxu1 %vm933_vm3, %v929_v31  ;;  %1807 = vmatpush1.bf16.msra.mxu1 %v3970_v37  ;;  %v4541_v31 = vadd.s32 3, %v579_v63  ;;  %v4558_v37 = vadd.s32 2, %v4509_v10 }
 0x205   : > { %1808 = vmatprep.subr.bf16.mxu1 %v5803_v36 }
 0x207   : > { %3730 = vmatmul.mubr.msk.f32.gmra.mrb[4].mxu1 %vm933_vm3, %v930_v32  ;;  %v4543_v32 = vadd.s32 3, %v586_v0 }
 0x208   : > { %3732 = vmatprep.mubr.msk.f32.mxu1 %vm933_vm3, %v931_v33  ;;  %1809 = vmatpush1.bf16.msra.mxu1 %v3971_v38  ;;  %v4549_v33 = vadd.s32 4294967294, %v4507_v9  ;;  %v4561_v38 = vadd.s32 4294967295, %v4507_v9 }
 0x209   : > { %1810 = vmatprep.subr.bf16.mxu1 %v5803_v36 }
 0x20a   : > { %5868 = vst [vmem:[#allocation19_spill] sm:$0xff] %v4549_v33 }
 0x20b   : > { %3733 = vmatmul.mubr.msk.f32.gmra.mrb[6].mxu1 %vm933_vm3, %v932_v34  ;;  %v4552_v34 = vadd.s32 4294967294, %v4509_v10  ;;  %vm5833_vm3 = vcmp.lt.s32.totalorder %v4497_v3, 8 }
 0x20c   : > { %1811 = vmatpush1.bf16.msra.mxu1 %v3972_v39  ;;  %v4564_v39 = vadd.s32 4294967295, %v4509_v10 }
 0x20d   : > { %1812 = vmatprep.subr.bf16.mxu1 %v5803_v36  ;;  %5869 = vst [vmem:[#allocation20_spill] sm:$0xff] %v4552_v34 }
 0x210   : > { %1813 = vmatpush1.bf16.msra.mxu1 %v3973_v40  ;;  %v4567_v40 = vadd.s32 3, %v4507_v9 }
 0x211   : > { %1814 = vmatprep.subr.bf16.mxu1 %v5803_v36 }
 0x214   : > { %1815 = vmatpush1.bf16.msra.mxu1 %v3974_v41  ;;  %v4570_v41 = vadd.s32 3, %v4509_v10 }
 0x215   : > { %1816 = vmatprep.subr.bf16.mxu1 %v5803_v36 }
 0x218   : > { %1817 = vmatpush1.bf16.msra.mxu1 %v3975_v42 }
 0x219   : > { %1818 = vmatprep.subr.bf16.mxu1 %v5803_v36 }
 0x21c   : > { %1819 = vmatpush1.bf16.msra.mxu1 %v3976_v43  ;;  %v1072_v43 = vld [vmem:[%s5778_s5 + $0x8] sm:$0xff] }
 0x21d   : > { %1820 = vmatprep.subr.bf16.mxu1 %v5803_v36 }
 0x220   : > { %1821 = vmatpush1.bf16.msra.mxu1 %v3977_v11  ;;  %v4595_v11 = vadd.s32 1, %v4471_v51  ;;  %v4612_v51 = vadd.s32 4294967293, %v4469_v49  ;;  %v3979_v49 = vld [vmem:[%s5779_s6 + $0x50] sm:$0xff]  }
 0x221   : > { %1822 = vmatprep.subr.bf16.mxu1 %v5803_v36 }
 0x222   : > { %5874 = vst [vmem:[#allocation25_spill] sm:$0xff] %v4595_v11  ;;  %5879 = vst [vmem:[#allocation30_spill] sm:$0xff] %v4612_v51 }
 0x224   : > { %1823 = vmatpush1.bf16.msra.mxu1 %v3978_v28  ;;  %v4597_v28 = vadd.s32 1, %v572_v54  ;;  %v4614_v54 = vadd.s32 1, %v586_v0  ;;  %v4631_v0 = vadd.s32 4294967293, %v4507_v9 }
 0x225   : > { %1824 = vmatprep.subr.bf16.mxu1 %v5803_v36 }
 0x226   : > { %5875 = vst [vmem:[#allocation26_spill] sm:$0xff] %v4597_v28  ;;  %5880 = vst [vmem:[#allocation31_spill] sm:$0xff] %v4614_v54  ;;  %v5885_v28 = vmov 0  }
 0x227   : > { %5882 = vst [vmem:[#allocation33_spill] sm:$0xff] %v4631_v0 }
 0x228   : > { %1825 = vmatpush1.bf16.msra.mxu1 %v3979_v49 }
 0x229   : > { %1826 = vmatprep.subr.bf16.mxu1 %v5885_v28 }
 0x2d2   : > { %v3725_v42 = vpop.f32.mrb[0].mxu1 }
 0x2d3   : > { %v1064_v52 = vsub.f32 %v4386_v18, %v3725_v42  ;;  %v1024_v53 = vpop.f32.mrb[1].mxu1  ;;  %v4602_v18 = vadd.s32 4294967293, %v579_v63  ;;  %v4606_v42 = vadd.s32 1, %v579_v63  ;;  %v1074_v63 = vld [vmem:[%s5778_s5 + $0x18] sm:$0xff] }
 0x2d4   : > { %v1063_v7 = vsub.f32 %v4382_v16, %v1024_v53  ;;  %v4617_v16 = vadd.s32 1, %v4509_v10 }
 0x2d5   : > { %5876 = vst [vmem:[#allocation27_spill] sm:$0xff] %v4602_v18  ;;  %5878 = vst [vmem:[#allocation29_spill] sm:$0xff] %v4606_v42  ;;  %v4608_v5 = vadd.f32 %v1072_v43, %v1064_v52  ;;  %v4637_v43 = vadd.s32 1, %v4507_v9  ;;  %v1075_v18 = vld [vmem:[%s5778_s5 + $0x20] sm:$0xff] }
 0x2d6   : > { %5881 = vst [vmem:[#allocation32_spill] sm:$0xff] %v4617_v16  ;;  %v4619_v53 = vadd.f32 %v1071_v55, %v1063_v7  ;;  %v3728_v36 = vpop.f32.mrb[2].mxu1  ;;  %v4634_v7 = vadd.s32 4294967293, %v4509_v10  ;;  %v1073_v16 = vld [vmem:[%s5778_s5 + $0x10] sm:$0xff] }
 0x2d7   : > { %5884 = vst [vmem:[#allocation35_spill] sm:$0xff] %v4637_v43  ;;  %v1066_v52 = vsub.f32 %v4384_v17, %v3728_v36  ;;  %v1034_v55 = vpop.f32.mrb[3].mxu1  ;;  %v1568_v54 = vrot.slane %v4608_v5, 3  ;;  %v1471_v42 = vrot.slane %v4608_v5, 2  ;;  %v1173_v50 = vrot.slane %v4608_v5, 6 }
 0x2d8   : > { %5883 = vst [vmem:[#allocation34_spill] sm:$0xff] %v4634_v7  ;;  %v1065_v0 = vsub.f32 %v4380_v15, %v1034_v55  ;;  %v1087_v10 = vpack.c.bf16 %v4608_v5, %v4619_v53  ;;  %v5816_v9 = vrot.slane %v4619_v53, 3  ;;  %v5820_v17 = vrot.slane %v4619_v53, 2  ;;  %v3980_v15 = vld [vmem:[%s5779_s6 + $0x58] sm:$0xff]  }
 0x2d9   : > { %v4652_v36 = vadd.f32 %v1074_v63, %v1066_v52  ;;  %v1076_v63 = vld [vmem:[%s5778_s5 + $0x28] sm:$0xff]  ;;  %1827 = vmatpush1.bf16.msra.mxu1 %v3980_v15 }
 0x2da   : > { %v4661_v55 = vadd.f32 %v1073_v16, %v1065_v0  ;;  %1372 = vrot.lane.b32.xlu0 %v1087_v10, %s4180_s24  ;;  %v3731_v49 = vpop.f32.mrb[4].mxu1  ;;  %v1582_v52 = vsel %vm1575_vm4, %v5816_v9, %v1568_v54  ;;  %v1485_v7 = vsel %vm5849_vm5, %v5820_v17, %v1471_v42  ;;  %1828 = vmatprep.subr.bf16.mxu1 %v5885_v28 }
 0x2db   : > { %v1068_v0 = vsub.f32 %v4394_v22, %v3731_v49  ;;  %v1044_v10 = vpop.f32.mrb[5].mxu1  ;;  %v1632_v43 = vsel %vm1600_vm6, %v1582_v52, 0.0  ;;  %v1535_v9 = vsel %vm5823_vm7, %v1485_v7, 0.0  ;;  %v5886_v7 = vrot.slane %v4619_v53, 6 }
 0x2dc   : > { %v1067_v16 = vsub.f32 %v4390_v20, %v1044_v10  ;;  %v1472_v49 = vrot.slane %v4661_v55, 2  ;;  %v1174_v17 = vrot.slane %v4661_v55, 6  ;;  %v5887_v20 = vrot.slane %v4608_v5, 7 }
 0x2dd   : > { %v4694_v57 = vadd.f32 %v1076_v63, %v1068_v0  ;;  %v1187_v52 = vsel %vm5845_vm8, %v5886_v7, %v1173_v50  ;;  %v5888_v10 = vrot.slane %v4619_v53, 7  ;;  %v1473_v22 = vrot.slane %v4652_v36, 2  ;;  %v1078_v63 = vld [vmem:[%s5778_s5 + $0x38] sm:$0xff] }
 0x2de   : > { %v4708_v59 = vadd.f32 %v1075_v18, %v1067_v16  ;;  %v3734_v15 = vpop.f32.mrb[6].mxu1  ;;  %v5889_v0 = vrot.slane %v4661_v55, 3  ;;  %v1484_v48 = vsel %vm5849_vm5, %v1471_v42, %v1472_v49  ;;  %vm1602_vm7 = vcmp.lt.s32.totalorder %v4520_v14, 8  ;;  %v3981_v18 = vld [vmem:[%s5779_s6 + $0x60] sm:$0xff]   ;;  %v1077_v42 = vld [vmem:[%s5778_s5 + $0x30] sm:$0xff] }
 0x2df   : > { %v1285_v11 = vsel %vm5847_vm9, %v5888_v10, %v5887_v20  ;;  %v5890_v20 = vrot.slane %v4652_v36, 6  ;;  %vm1603_vm6 = vcmp.lt.s32.totalorder %v4522_v23, 8  ;;  %v1070_v16 = vsub.f32 %v4392_v21, %v3734_v15  ;;  %v1054_v51 = vpop.f32.mrb[7].mxu1  ;;  %1829 = vmatpush1.bf16.msra.mxu1 %v3981_v18 }
 0x2e0   : > { %v1581_v7 = vsel %vm1575_vm4, %v1568_v54, %v5889_v0  ;;  %v1536_v0 = vsel %vm5828_vm11, %v1484_v48, 0.0  ;;  %v1069_v56 = vsub.f32 %v4388_v19, %v1054_v51  ;;  %v1336_v48 = vsel %vm5830_vm15, %v1285_v11, 0.0  ;;  %1830 = vmatprep.subr.bf16.mxu1 %v5885_v28  ;;  %v3982_v19 = vld [vmem:[%s5779_s6 + $0x68] sm:$0xff]  }
 0x2e1   : > { %v1185_v10 = vsel %vm5845_vm8, %v1174_v17, %v5890_v20  ;;  %v1633_v54 = vsel %vm1601_vm10, %v1581_v7, 0.0  ;;  %v1186_v20 = vsel %vm5845_vm8, %v1173_v50, %v1174_v17  ;;  %v1543_v46 = vpack.c.bf16 %v1536_v0, %v1535_v9 }
 0x2e2   : > { %v1640_v47 = vpack.c.bf16 %v1633_v54, %v1632_v43  ;;  %v1239_v21 = vsel %vm5832_vm12, %v1186_v20, 0.0  ;;  %v4741_v15 = vadd.f32 %v1078_v63, %v1070_v16  ;;  %v1240_v58 = vsel %vm5831_vm13, %v1185_v10, 0.0 }
 0x2e3   : > { %v1238_v7 = vsel %vm5829_vm14, %v1187_v52, 0.0  ;;  %vm5838_vm10 = vcmp.ge.s32.totalorder %v4524_v24, 0  ;;  %vm5837_vm11 = vcmp.ge.s32.totalorder %v4526_v25, 0  ;;  %v4755_v50 = vadd.f32 %v1077_v42, %v1069_v56  ;;  %1551 = vrot.lane.b32.xlu0 %v1543_v46, %s4182_s17  ;;  %1831 = vmatpush1.bf16.msra.mxu1 %v3982_v19 }
 0x2e4   : > { %1648 = vrot.lane.b32.xlu1 %v1640_v47, %s4181_s30  ;;  %v1246_v51 = vpack.c.bf16 %v1240_v58, %v1239_v21  ;;  %v1474_v11 = vrot.slane %v4708_v59, 2  ;;  %v1483_v43 = vsel %vm5849_vm5, %v1472_v49, %v1473_v22  ;;  %vm5839_vm14 = vcmp.lt.s32.totalorder %v4528_v26, 8 }
 0x2e5   : > { %vm5840_vm15 = vcmp.lt.s32.totalorder %v4537_v29, 8  ;;  %v1179_v28 = vrot.slane %v4741_v15, 6  ;;  %v1277_v56 = vrot.slane %v4741_v15, 7  ;;  %v1537_v47 = vsel %vm5833_vm3, %v1483_v43, 0.0 }
 0x2e6   : > { %v1272_v9 = vrot.slane %v4661_v55, 7  ;;  %v1482_v46 = vsel %vm5849_vm5, %v1473_v22, %v1474_v11  ;;  %v1273_v17 = vrot.slane %v4652_v36, 7  ;;  %v1570_v49 = vrot.slane %v4652_v36, 3 }
 0x2e7   : > { %v1571_v52 = vrot.slane %v4708_v59, 3  ;;  %v5891_v63 = vrot.slane %v4619_v53, 6  ;;  %v5892_v18 = vrot.slane %v4619_v53, 7  ;;  %vm5893_vm3 = vcmp.lt.s32.totalorder %v4517_v13, 8 }
 0x2e8   : > { %v1538_v16 = vsel %vm5893_vm3, %v1482_v46, 0.0  ;;  %v5894_v42 = vrot.slane %v4608_v5, 7  ;;  %1255 = vrot.lane.b32.xlu1 %v1246_v51, %s4182_s17  ;;  %v1283_v58 = vsel %vm5847_vm9, %v1272_v9, %v1273_v17  ;;  %vm1605_vm3 = vcmp.lt.s32.totalorder %v4543_v32, 8 }
 0x2e9   : > { %v1188_v10 = vsel %vm5845_vm8, %v1179_v28, %v5891_v63  ;;  %v1286_v22 = vsel %vm5847_vm9, %v1277_v56, %v5892_v18  ;;  %v1544_v21 = vpack.c.bf16 %v1538_v16, %v1537_v47  ;;  %vm5895_vm12 = vcmp.ge.s32.totalorder %v4505_v8, 0 }
 0x2ea   : > { %v1284_v54 = vsel %vm5847_vm9, %v5894_v42, %v1272_v9  ;;  %v1237_v0 = vsel %vm5834_vm1, %v1188_v10, 0.0  ;;  %v1335_v20 = vsel %vm5835_vm0, %v1286_v22, 0.0  ;;  %v1338_v51 = vsel %vm5895_vm12, %v1283_v58, 0.0 }
 0x2eb   : > { %v1245_v19 = vpack.c.bf16 %v1238_v7, %v1237_v0  ;;  %v1343_v43 = vpack.c.bf16 %v1336_v48, %v1335_v20  ;;  %v1337_v46 = vsel %vm5836_vm2, %v1284_v54, 0.0  ;;  %vm5842_vm13 = vcmp.ge.s32.totalorder %v4549_v33, 0  ;;  %v5922_v33 = vld [vmem:[#allocation35_spill] sm:$0xff] }
 0x2ec   : > { %vm5841_vm1 = vcmp.ge.s32.totalorder %v4552_v34, 0  ;;  %v1344_v63 = vpack.c.bf16 %v1338_v51, %v1337_v46  ;;  %v1579_v47 = vsel %vm1575_vm4, %v1570_v49, %v1571_v52  ;;  %v5896_v9 = vrot.slane %v4661_v55, 3  ;;  %v5921_v34 = vld [vmem:[#allocation34_spill] sm:$0xff] }
 0x2ed   : > { %v1088_v48 = vpack.c.bf16 %v4652_v36, %v4661_v55  ;;  %vm5844_vm12 = vcmp.lt.s32.totalorder %v4555_v35, 8  ;;  %1253 = vrot.lane.b32.xlu0 %v1245_v19, %s4182_s17  ;;  %v1635_v18 = vsel %vm1603_vm6, %v1579_v47, 0.0  ;;  %v1176_v22 = vrot.slane %v4708_v59, 6  ;;  %1351 = vrot.lane.b32.xlu1 %v1343_v43, %s4181_s30 }
 0x2ee   : > { %v1580_v7 = vsel %vm1575_vm4, %v5896_v9, %v1570_v49  ;;  %v1177_v16 = vrot.slane %v4694_v57, 6  ;;  %vm5843_vm0 = vcmp.lt.s32.totalorder %v4558_v37, 8  ;;  %v1475_v42 = vrot.slane %v4694_v57, 2 }
 0x2ef   : > { %v1634_v10 = vsel %vm1602_vm7, %v1580_v7, 0.0  ;;  %v1476_v54 = vrot.slane %v4755_v50, 2  ;;  %v1274_v14 = vrot.slane %v4708_v59, 7  ;;  %v5897_v0 = vrot.slane %v4652_v36, 6 }
 0x2f0   : > { %v1641_v49 = vpack.c.bf16 %v1635_v18, %v1634_v10  ;;  %v1183_v23 = vsel %vm5845_vm8, %v1176_v22, %v1177_v16  ;;  %v1275_v58 = vrot.slane %v4694_v57, 7  ;;  %v1572_v19 = vrot.slane %v4694_v57, 3 }
 0x2f1   : > { %v1184_v20 = vsel %vm5845_vm8, %v5897_v0, %v1176_v22  ;;  %v1242_v46 = vsel %vm5837_vm11, %v1183_v23, 0.0  ;;  %v1480_v51 = vsel %vm5849_vm5, %v1475_v42, %v1476_v54  ;;  %v1481_v47 = vsel %vm5849_vm5, %v1474_v11, %v1475_v42  ;;  %1553 = vrot.lane.b32.xlu0 %v1544_v21, %s4182_s17  ;;  %1353 = vrot.lane.b32.xlu1 %v1344_v63, %s4181_s30  ;;  %v5899_v23 = vld [vmem:[#allocation21_spill] sm:$0xff] }
 0x2f2   : > { %v1241_v43 = vsel %vm5838_vm10, %v1184_v20, 0.0  ;;  %vm1606_vm6 = vcmp.lt.s32.totalorder %v4567_v40, 8  ;;  %vm1607_vm7 = vcmp.lt.s32.totalorder %v4570_v41, 8  ;;  %vm1397_vm2 = vcmp.lt.s32.totalorder %v4463_v45, 7 }
 0x2f3   : > { %v1247_v9 = vpack.c.bf16 %v1242_v46, %v1241_v43  ;;  %v1539_v7 = vsel %vm5839_vm14, %v1481_v47, 0.0  ;;  %v1540_v10 = vsel %vm5840_vm15, %v1480_v51, 0.0  ;;  %v1281_v18 = vsel %vm5847_vm9, %v1274_v14, %v1275_v58 }
 0x2f4   : > { %v1545_v11 = vpack.c.bf16 %v1540_v10, %v1539_v7  ;;  %v1282_v22 = vsel %vm5847_vm9, %v1273_v17, %v1274_v14  ;;  %vm5898_vm10 = vcmp.ge.s32.totalorder %v4539_v30, 0  ;;  %v1573_v42 = vrot.slane %v4755_v50, 3  ;;  %v5902_v7 = vld [vmem:[#allocation22_spill] sm:$0xff]  ;;  %v5903_v10 = vld [vmem:[#allocation24_spill] sm:$0xff] }
 0x2f5   : > { %v1340_v21 = vsel %vm5898_vm10, %v1281_v18, 0.0  ;;  %vm5900_vm15 = vcmp.ge.s32.totalorder %v4530_v27, 0  ;;  %v1578_v20 = vsel %vm1575_vm4, %v1571_v52, %v1572_v19  ;;  %v1178_v17 = vrot.slane %v4755_v50, 6  ;;  %1650 = vrot.lane.b32.xlu0 %v1641_v49, %s4181_s30  ;;  %v5904_v18 = vld [vmem:[#allocation30_spill] sm:$0xff]  ;;  %v5905_v49 = vld [vmem:[#allocation23_spill] sm:$0xff]  ;;  %1374 = vrot.lane.b32.xlu1 %v1088_v48, %s4180_s24 }
 0x2f6   : > { %v1339_v0 = vsel %vm5900_vm15, %v1282_v22, 0.0  ;;  %v1577_v43 = vsel %vm1575_vm4, %v1572_v19, %v1573_v42  ;;  %vm5901_vm10 = vcmp.lt.s32.totalorder %v4541_v31, 8  ;;  %v1477_v51 = vrot.slane %v4741_v15, 2 }
 0x2f7   : > { %v1345_v14 = vpack.c.bf16 %v1340_v21, %v1339_v0  ;;  %v1636_v46 = vsel %vm5901_vm10, %v1578_v20, 0.0  ;;  %v1637_v52 = vsel %vm1605_vm3, %v1577_v43, 0.0  ;;  %v1181_v47 = vsel %vm5845_vm8, %v1178_v17, %v1179_v28  ;;  %v5907_v43 = vld [vmem:[#allocation25_spill] sm:$0xff] }
 0x2f8   : > { %v1182_v19 = vsel %vm5845_vm8, %v1177_v16, %v1178_v17  ;;  %v1276_v31 = vrot.slane %v4755_v50, 7  ;;  %vm1118_vm10 = vcmp.ge.s32.totalorder %v5902_v7, 0  ;;  %vm1119_vm14 = vcmp.ge.s32.totalorder %v5903_v10, 0 }
 0x2f9   : > { %vm1116_vm15 = vcmp.ge.s32.totalorder %v5904_v18, 0  ;;  %vm1117_vm11 = vcmp.ge.s32.totalorder %v5905_v49, 0  ;;  %v1642_v32 = vpack.c.bf16 %v1637_v52, %v1636_v46  ;;  %v1243_v22 = vsel %vm5842_vm13, %v1182_v19, 0.0  ;;  %1257 = vrot.lane.b32.xlu0 %v1247_v9, %s4182_s17  ;;  %1555 = vrot.lane.b32.xlu1 %v1545_v11, %s4182_s17 }
 0x2fa   : > { %v1244_v28 = vsel %vm5841_vm1, %v1181_v47, 0.0  ;;  %v1479_v16 = vsel %vm5849_vm5, %v1476_v54, %v1477_v51  ;;  %v5906_v0 = vrot.slane %v4619_v53, 2  ;;  %v1279_v48 = vsel %vm5847_vm9, %v1276_v31, %v1277_v56  ;;  %v5920_v56 = vld [vmem:[#allocation32_spill] sm:$0xff] }
 0x2fb   : > { %v1248_v21 = vpack.c.bf16 %v1244_v28, %v1243_v22  ;;  %v4910_v17 = vsel %vm5844_vm12, %v1479_v16, 0.0  ;;  %vm1424_vm3 = vcmp.lt.s32.totalorder %v5907_v43, 8  ;;  %v1280_v46 = vsel %vm5847_vm9, %v1275_v58, %v1276_v31  ;;  %v5910_v31 = vld [vmem:[#allocation26_spill] sm:$0xff] }
 0x2fc   : > { %v1486_v20 = vsel %vm5849_vm5, %v1477_v51, %v5906_v0  ;;  %vm5908_vm1 = vcmp.ge.s32.totalorder %v4564_v39, 0  ;;  %v1574_v52 = vrot.slane %v4741_v15, 3  ;;  %vm5909_vm13 = vcmp.ge.s32.totalorder %v4561_v38, 0 }
 0x2fd   : > { %v4919_v54 = vsel %vm5843_vm0, %v1486_v20, 0.0  ;;  %v4925_v51 = vsel %vm5908_vm1, %v1279_v48, 0.0  ;;  %v4933_v47 = vsel %vm5909_vm13, %v1280_v46, 0.0  ;;  %v1390_v58 = vrot.slane %v4608_v5, 1  ;;  %v5912_v20 = vld [vmem:[#allocation27_spill] sm:$0xff]  ;;  %v5913_v48 = vld [vmem:[#allocation28_spill] sm:$0xff]  ;;  %1355 = vrot.lane.b32.xlu0 %v1345_v14, %s4181_s30  ;;  %1652 = vrot.lane.b32.xlu1 %v1642_v32, %s4181_s30 }
 0x2fe   : > { %vm1425_vm0 = vcmp.lt.s32.totalorder %v5910_v31, 8  ;;  %v1346_v22 = vpack.c.bf16 %v4925_v51, %v4933_v47  ;;  %v1576_v9 = vsel %vm1575_vm4, %v1573_v42, %v1574_v52  ;;  %v5911_v28 = vrot.slane %v4619_v53, 3  ;;  %v5914_v46 = vld [vmem:[#allocation29_spill] sm:$0xff] }
 0x2ff   : > { %v1391_v0 = vrot.slane %v4661_v55, 1  ;;  %vm1120_vm1 = vcmp.ge.s32.totalorder %v5912_v20, 0  ;;  %vm1121_vm13 = vcmp.ge.s32.totalorder %v5913_v48, 0  ;;  %v4954_v11 = vsel %vm1606_vm6, %v1576_v9, 0.0  ;;  %v5917_v9 = vld [vmem:[#allocation31_spill] sm:$0xff] }
 0x300   : > { %v1583_v16 = vsel %vm1575_vm4, %v1574_v52, %v5911_v28  ;;  %v5915_v51 = vrot.slane %v4619_v53, 1  ;;  %v1092_v47 = vrot.slane %v4608_v5, 5  ;;  %vm5916_vm4 = vcmp.lt.s32.totalorder %v4578_v44, 8 }
 0x301   : > { %v4958_v42 = vsel %vm1607_vm7, %v1583_v16, 0.0  ;;  %v1403_v40 = vsel %vm1397_vm2, %v1390_v58, %v1391_v0  ;;  %v1094_v41 = vrot.slane %v4652_v36, 5  ;;  %v5918_v16 = vld [vmem:[#allocation33_spill] sm:$0xff]  ;;  %vm5919_vm8 = vcmp.lt.s32.totalorder %v5899_v23, 8  ;;  %1259 = vrot.lane.b32.xlu1 %v1248_v21, %s4182_s17 }
 0x302   : > { %v1404_v52 = vsel %vm1397_vm2, %v5915_v51, %v1390_v58  ;;  %v1455_v5 = vsel %vm5919_vm8, %v1403_v40, 0.0  ;;  %v1093_v51 = vrot.slane %v4661_v55, 5  ;;  %v1091_v28 = vrot.slane %v4619_v53, 5 }
 0x303   : > { %v1454_v19 = vsel %vm5916_vm4, %v1404_v52, 0.0  ;;  %v1098_v52 = vrot.slane %v4741_v15, 5  ;;  %v1392_v63 = vrot.slane %v4652_v36, 1  ;;  %vm1123_vm9 = vcmp.ge.s32.totalorder %v5921_v34, 0 }
 0x304   : > { %v1462_v58 = vpack.c.bf16 %v1455_v5, %v1454_v19  ;;  %vm1428_vm5 = vcmp.lt.s32.totalorder %v5922_v33, 8  ;;  %vm5923_vm6 = vcmp.lt.s32.totalorder %v4463_v45, 3  ;;  %vm5927_vm12 = vcmask 261120   ;;  %v4034_v33 = vld [vmem:[%s5785_s12 + $0x38] sm:$0xff]  }
 0x305   : > { %v1104_v14 = vsel %vm5923_vm6, %v1093_v51, %v1094_v41  ;;  %vm5924_vm8 = vmmov %vm5923_vm6  ;;  %v1402_v7 = vsel %vm1397_vm2, %v1391_v0, %v1392_v63  ;;  %v1095_v18 = vrot.slane %v4708_v59, 5  ;;  %v1394_v49 = vrot.slane %v4694_v57, 1  ;;  %1357 = vrot.lane.b32.xlu1 %v1346_v22, %s4181_s30 }
 0x306   : > { %v1105_v55 = vsel %vm5924_vm8, %v1092_v47, %v1093_v51  ;;  %vm5925_vm7 = vmmov %vm5923_vm6  ;;  %1466 = vst.msk [vmem:[#allocation2 + $0x8] sm:$0xff] %vm5927_vm12, %v1462_v58  ;;  %v1159_v32 = vsel %vm1119_vm14, %v1104_v14, 0.0  ;;  %v1393_v58 = vrot.slane %v4708_v59, 1  ;;  %v1456_v10 = vsel %vm1424_vm3, %v1402_v7, 0.0 }
 0x307   : > { %v1106_v40 = vsel %vm5925_vm7, %v1091_v28, %v1092_v47  ;;  %vm5926_vm4 = vmmov %vm5923_vm6  ;;  %v1158_v36 = vsel %vm1118_vm10, %v1105_v55, 0.0  ;;  %v5928_v47 = vpack.c.bf16 %v4694_v57, %v4708_v59  ;;  %v1395_v0 = vrot.slane %v4755_v50, 1 }
 0x308   : > { %v1107_v6 = vsel %vm5926_vm4, %v1098_v52, %v1091_v28  ;;  %v1157_v19 = vsel %vm1117_vm11, %v1106_v40, 0.0  ;;  %v1165_v28 = vpack.c.bf16 %v1159_v32, %v1158_v36  ;;  %vm5929_vm11 = vmmov %vm5927_vm12  ;;  %v1401_v14 = vsel %vm1397_vm2, %v1392_v63, %v1393_v58 }
 0x309   : > { %v1156_v5 = vsel %vm1116_vm15, %v1107_v6, 0.0  ;;  %1376 = vrot.lane.b32.xlu0 %v5928_v47, %s4180_s24  ;;  %v1096_v6 = vrot.slane %v4694_v57, 5  ;;  %vm5930_vm14 = vmmov %vm5929_vm11  ;;  %v1097_v21 = vrot.slane %v4755_v50, 5  ;;  %v1396_v55 = vrot.slane %v4741_v15, 1 }
 0x30a   : > { %v1164_v51 = vpack.c.bf16 %v1157_v19, %v1156_v5  ;;  %1169 = vst.msk [vmem:[#allocation2 + $0x10] sm:$0xff] %vm5929_vm11, %v1165_v28  ;;  %v1457_v59 = vsel %vm1425_vm0, %v1401_v14, 0.0  ;;  %vm5931_vm12 = vmmov %vm5926_vm4  ;;  %v1400_v36 = vsel %vm1397_vm2, %v1393_v58, %v1394_v49  ;;  %v5933_v63 = vpack.c.bf16 %v4919_v54, %v4910_v17 }
 0x30b   : > { %v1102_v40 = vsel %vm5931_vm12, %v1095_v18, %v1096_v6  ;;  %vm5932_vm15 = vmmov %vm5926_vm4  ;;  %v1463_v32 = vpack.c.bf16 %v1457_v59, %v1456_v10  ;;  %vm5934_vm10 = vcmp.lt.s32.totalorder %v5914_v46, 8  ;;  %v1399_v28 = vsel %vm1397_vm2, %v1394_v49, %v1395_v0 }
 0x30c   : > { %1168 = vst.msk [vmem:[#allocation2] sm:$0xff] %vm5930_vm14, %v1164_v51  ;;  %v1103_v57 = vsel %vm5932_vm15, %v1094_v41, %v1095_v18  ;;  %v1161_v5 = vsel %vm1121_vm13, %v1102_v40, 0.0  ;;  %v1458_v47 = vsel %vm5934_vm10, %v1400_v36, 0.0  ;;  %vm5935_vm7 = vmmov %vm5926_vm4  ;;  %vm5939_vm13 = vcmp.ge.s32.totalorder %v5918_v16, 0 }
 0x30d   : > { %1557 = vrot.lane.b32.xlu0 %v5933_v63, %s4182_s17  ;;  %v1160_v19 = vsel %vm1120_vm1, %v1103_v57, 0.0  ;;  %v1100_v17 = vsel %vm5935_vm7, %v1097_v21, %v1098_v52  ;;  %vm5936_vm6 = vmmov %vm5926_vm4  ;;  %vm5938_vm1 = vcmp.lt.s32.totalorder %v5917_v9, 8  ;;  %v5940_v51 = vrot.slane %v4619_v53, 1  ;;  %s3282_s17 = scalar_lea.sflag [#allocation7], %s528_s26 }
 0x30e   : > { %v1166_v41 = vpack.c.bf16 %v1161_v5, %v1160_v19  ;;  %v1101_v54 = vsel %vm5936_vm6, %v1096_v6, %v1097_v21  ;;  %vm5937_vm4 = vmmov %vm5929_vm11  ;;  %v1459_v20 = vsel %vm5938_vm1, %v1399_v28, 0.0  ;;  %v1163_v22 = vsel %vm1123_vm9, %v1100_v17, 0.0 }
 0x30f   : > { %1467 = vst.msk [vmem:[#allocation2 + $0x18] sm:$0xff] %vm5937_vm4, %v1463_v32  ;;  %v1162_v48 = vsel %vm5939_vm13, %v1101_v54, 0.0  ;;  %v1405_v58 = vsel %vm1397_vm2, %v1396_v55, %v5940_v51  ;;  %vm5941_vm8 = vmmov %vm5937_vm4  ;;  %v1464_v52 = vpack.c.bf16 %v1459_v20, %v1458_v47  ;;  %vm5942_vm11 = vcmp.lt.s32.totalorder %v5920_v56, 8 }
 0x310   : > { %1170 = vst.msk [vmem:[#allocation2 + $0x20] sm:$0xff] %vm5941_vm8, %v1166_v41  ;;  %v1167_v7 = vpack.c.bf16 %v1163_v22, %v1162_v48  ;;  %v1461_v10 = vsel %vm5942_vm11, %v1405_v58, 0.0  ;;  %v1398_v18 = vsel %vm1397_vm2, %v1395_v0, %v1396_v55  ;;  %v5943_v34 = vpack.c.bf16 %v4958_v42, %v4954_v11  ;;  %vm5945_vm9 = vmmov %vm5937_vm4 }
 0x311   : > { %v1460_v53 = vsel %vm1428_vm5, %v1398_v18, 0.0  ;;  %v5944_v16 = vpack.c.bf16 %v4741_v15, %v4755_v50  ;;  %1468 = vst.msk [vmem:[#allocation2 + $0x28] sm:$0xff] %vm5945_vm9, %v1464_v52  ;;  %vm5946_vm14 = vmmov %vm5937_vm4  ;;  %vm1265_vm15 = vcmask 523520   ;;  %vm1363_vm10 = vcmask 785920   ;;  %v5109_v18 = vld [vmem:[%s5780_s7] ss:$0 sm:$0xff] }
 0x312   : > { %1654 = vrot.lane.b32.xlu0 %v5943_v34, %s4181_s30  ;;  %1171 = vst.msk [vmem:[#allocation2 + $0x30] sm:$0xff] %vm5946_vm14, %v1167_v7  ;;  %v1465_v6 = vpack.c.bf16 %v1461_v10, %v1460_v53  ;;  %vm5947_vm12 = vmmov %vm5937_vm4  ;;  %vm1384_vm7 = vcmask 1048320   ;;  %vm1791_vm6 = vcmask 785408   ;;  %v3983_v7 = vld [vmem:[%s5781_s8 + $0x40] sm:$0xff]   ;;  %vm5948_vm4 = vcmp.lt.s32.totalorder %v4463_v45, 6 }
 0x313   : > { %1378 = vrot.lane.b32.xlu1 %v5944_v16, %s4180_s24  ;;  %v3984_v10 = vld [vmem:[%s5781_s8] sm:$0xff]   ;;  %3540 = vmatprep.subr.bf16.mxu0 %v3983_v7  ;;  %vm5949_vm1 = vcmp.lt.s32.totalorder %v4463_v45, 1  ;;  %vm5950_vm13 = vcmask 523264   ;;  %vm5951_vm8 = vcmp.lt.s32.totalorder %v4463_v45, 2  ;;  %vm5954_vm9 = vcmp.lt.s32.totalorder %v4578_v44, 8  ;;  %vm5955_vm14 = vmmov %vm5948_vm4  ;;  %s4183_s24 = smov [#allocation8]  }
 0x314   : > { %1469 = vst.msk [vmem:[#allocation2 + $0x38] sm:$0xff] %vm5947_vm12, %v1465_v6  ;;  %3541 = vmatpush3.bf16.msra.mxu0 %v3984_v10  ;;  %vm5956_vm12 = vcmp.lt.s32.totalorder %v4487_v61, 8  ;;  %s4109_s19 = sshll.u32 %s4183_s24, 4  ;;  %s4110_s19 = int_to_ptr.vmem [resolvable:$false] %s4109_s19 }
 0x315   : > { %p4112_p2 = scmp.lt.s32.totalorder %s5733_s23, %s4110_s19 }
 0x34c   : > { %v1373_v49 = vpop.permute.xlu0 %1372 }
 0x355   : > { %v1552_v42 = vpop.permute.xlu0 %1551 }
 0x356   : > { %v1649_v11 = vpop.permute.xlu1 %1648  ;;  %1563 = vst.msk [vmem:[#allocation2 + $0x8] sm:$0xff] %vm1265_vm15, %v1552_v42 }
 0x357   : > { %1660 = vst.msk [vmem:[#allocation2 + $0x8] sm:$0xff] %vm1363_vm10, %v1649_v11 }
 0x35a   : > { %v1256_v14 = vpop.permute.xlu1 %1255 }
 0x35b   : > { %1267 = vst.msk [vmem:[#allocation2 + $0x10] sm:$0xff] %vm1265_vm15, %v1256_v14 }
 0x35e   : > { %v1665_v0 = vld [vmem:[#allocation2 + $0x8] sm:$0xff] }
 0x35f   : > { %v1254_v15 = vpop.permute.xlu0 %1253  ;;  %v1352_v50 = vpop.permute.xlu1 %1351  ;;  %3410 = vmatprep.mubr.msk.bf16.mxu1 %vm1791_vm6, %v1665_v0 }
 0x360   : > { %1266 = vst.msk [vmem:[#allocation2] sm:$0xff] %vm1265_vm15, %v1254_v15 }
 0x361   : > { %1364 = vst.msk [vmem:[#allocation2] sm:$0xff] %vm1363_vm10, %v1352_v50 }
 0x362   : > { %1385 = vst.msk [vmem:[#allocation2] sm:$0xff] %vm1384_vm7, %v1373_v49 }
 0x363   : > { %v1554_v21 = vpop.permute.xlu0 %1553  ;;  %v1354_v55 = vpop.permute.xlu1 %1353 }
 0x364   : > { %1564 = vst.msk [vmem:[#allocation2 + $0x18] sm:$0xff] %vm1265_vm15, %v1554_v21  ;;  %v3985_v21 = vld [vmem:[%s5781_s8 + $0x48] sm:$0xff]  }
 0x365   : > { %1365 = vst.msk [vmem:[#allocation2 + $0x10] sm:$0xff] %vm1363_vm10, %v1354_v55  ;;  %v3986_v55 = vld [vmem:[%s5781_s8 + $0x8] sm:$0xff]   ;;  %3542 = vmatprep.subr.bf16.mxu0 %v3985_v21  ;;  %v3989_v21 = vld [vmem:[%s5781_s8 + $0x58] sm:$0xff]  }
 0x366   : > { %3543 = vmatpush3.bf16.msra.mxu0 %v3986_v55 }
 0x367   : > { %v1651_v59 = vpop.permute.xlu0 %1650  ;;  %v1375_v40 = vpop.permute.xlu1 %1374 }
 0x368   : > { %1661 = vst.msk [vmem:[#allocation2 + $0x18] sm:$0xff] %vm1363_vm10, %v1651_v59  ;;  %v3987_v59 = vld [vmem:[%s5781_s8 + $0x50] sm:$0xff]  }
 0x369   : > { %1386 = vst.msk [vmem:[#allocation2 + $0x10] sm:$0xff] %vm1384_vm7, %v1375_v40  ;;  %v1664_v57 = vld [vmem:[#allocation2] sm:$0xff]  ;;  %3544 = vmatprep.subr.bf16.mxu0 %v3987_v59 }
 0x36a   : > { %1837 = vmatmul.mubr.bf16.vlgmr.msra.gmra.mrb[8].mxu1 %v1664_v57 }
 0x36b   : > { %v1258_v36 = vpop.permute.xlu0 %1257  ;;  %v1556_v63 = vpop.permute.xlu1 %1555 }
 0x36c   : > { %1268 = vst.msk [vmem:[#allocation2 + $0x20] sm:$0xff] %vm1265_vm15, %v1258_v36  ;;  %1565 = vst.msk [vmem:[#allocation2 + $0x28] sm:$0xff] %vm1265_vm15, %v1556_v63 }
 0x36f   : > { %v1356_v32 = vpop.permute.xlu0 %1355  ;;  %v1667_v19 = vld [vmem:[#allocation2 + $0x18] sm:$0xff]  ;;  %v1653_v5 = vpop.permute.xlu1 %1652 }
 0x370   : > { %1366 = vst.msk [vmem:[#allocation2 + $0x20] sm:$0xff] %vm1363_vm10, %v1356_v32  ;;  %3411 = vmatprep.mubr.msk.bf16.mxu1 %vm1791_vm6, %v1667_v19  ;;  %v1666_v47 = vld [vmem:[#allocation2 + $0x10] sm:$0xff]  ;;  %1662 = vst.msk [vmem:[#allocation2 + $0x28] sm:$0xff] %vm1363_vm10, %v1653_v5 }
 0x372   : > { %1845 = vmatmul.mubr.bf16.gmra.mrb[12].mxu1 %v1666_v47 }
 0x373   : > { %v1260_v28 = vpop.permute.xlu1 %1259 }
 0x374   : > { %1269 = vst.msk [vmem:[#allocation2 + $0x30] sm:$0xff] %vm1265_vm15, %v1260_v28 }
 0x377   : > { %v1358_v54 = vpop.permute.xlu1 %1357  ;;  %v1669_v20 = vld [vmem:[#allocation2 + $0x28] sm:$0xff] }
 0x378   : > { %1367 = vst.msk [vmem:[#allocation2 + $0x30] sm:$0xff] %vm1363_vm10, %v1358_v54  ;;  %3412 = vmatprep.mubr.msk.bf16.mxu1 %vm1791_vm6, %v1669_v20  ;;  %v3988_v20 = vld [vmem:[%s5781_s8 + $0x10] sm:$0xff]  }
 0x379   : > { %3545 = vmatpush3.bf16.msra.mxu0 %v3988_v20  ;;  %v3991_v20 = vld [vmem:[%s5781_s8 + $0x60] sm:$0xff]  }
 0x37a   : > { %3546 = vmatprep.subr.bf16.mxu0 %v3989_v21 }
 0x37b   : > { %v1377_v41 = vpop.permute.xlu0 %1376 }
 0x37c   : > { %1387 = vst.msk [vmem:[#allocation2 + $0x20] sm:$0xff] %vm1384_vm7, %v1377_v41 }
 0x37f   : > { %v1558_v17 = vpop.permute.xlu0 %1557 }
 0x380   : > { %1566 = vst.msk [vmem:[#allocation2 + $0x38] sm:$0xff] %vm1265_vm15, %v1558_v17  ;;  %vm5957_vm15 = vcmp.lt.s32.totalorder %v5899_v23, 8 }
 0x383   : > { %v1668_v22 = vld [vmem:[#allocation2 + $0x20] sm:$0xff] }
 0x384   : > { %v1655_v48 = vpop.permute.xlu0 %1654  ;;  %1853 = vmatmul.mubr.bf16.gmra.mrb[16].mxu1 %v1668_v22 }
 0x385   : > { %1663 = vst.msk [vmem:[#allocation2 + $0x38] sm:$0xff] %vm1363_vm10, %v1655_v48  ;;  %v1379_v51 = vpop.permute.xlu1 %1378  ;;  %vm5958_vm10 = vmmov %vm5948_vm4 }
 0x386   : > { %1388 = vst.msk [vmem:[#allocation2 + $0x30] sm:$0xff] %vm1384_vm7, %v1379_v51  ;;  %vm5959_vm7 = vmmov %vm5949_vm1 }
 0x38c   : > { %v1671_v58 = vld [vmem:[#allocation2 + $0x38] sm:$0xff] }
 0x38d   : > { %3413 = vmatprep.mubr.msk.bf16.mxu1 %vm1791_vm6, %v1671_v58  ;;  %v1670_v52 = vld [vmem:[#allocation2 + $0x30] sm:$0xff]  ;;  %vm5960_vm6 = vmmov %vm5949_vm1 }
 0x38e   : > { %1861 = vmatmul.mubr.bf16.gmra.mrb[20].mxu1 %v1670_v52 }
 0x43d   : > { %v1838_v34 = vpop.f32.mrb[8].mxu1 }
 0x43e   : > { %v1839_v53 = vadd.f32 %v5109_v18, %v1838_v34  ;;  %v1840_v16 = vpop.f32.mrb[9].mxu1 }
 0x43f   : > { %v1841_v6 = vpop.f32.mrb[10].mxu1 }
 0x440   : > { %v5112_v49 = vmax.f32 %v1839_v53, 0.0  ;;  %v1842_v11 = vadd.f32 %v5109_v18, %v1841_v6  ;;  %v1843_v42 = vpop.f32.mrb[11].mxu1  ;;  %v5952_v53 = vld [vmem:[#allocation17_spill] sm:$0xff] }
 0x441   : > { %vm5953_vm11 = vcmp.lt.s32.totalorder %v5952_v53, 8 }
 0x442   : > { %v5115_v14 = vmax.f32 %v1842_v11, 0.0  ;;  %v2014_v15 = vrot.slane %v5112_v49, 2  ;;  %v1966_v50 = vrot.slane %v5112_v49, 1  ;;  %v1913_v0 = vrot.slane %v5112_v49, 7 }
 0x443   : > { %v1881_v32 = vrot.slane %v5112_v49, 6 }
 0x444   : > { %v1882_v40 = vrot.slane %v5115_v14, 6  ;;  %v2015_v57 = vrot.slane %v5115_v14, 2  ;;  %v1967_v36 = vrot.slane %v5115_v14, 1  ;;  %v1914_v63 = vrot.slane %v5115_v14, 7 }
 0x445   : > { %v1846_v19 = vpop.f32.mrb[12].mxu1  ;;  %v1877_v5 = vpack.c.bf16 %v5115_v14, %v5112_v49  ;;  %v3994_v14 = vld [vmem:[%s5781_s8 + $0x28] sm:$0xff]  }
 0x446   : > { %v2028_v47 = vsel %vm5948_vm4, %v2014_v15, %v2015_v57  ;;  %v1847_v41 = vadd.f32 %v5109_v18, %v1846_v19  ;;  %v1848_v28 = vpop.f32.mrb[13].mxu1  ;;  %v1980_v17 = vsel %vm1397_vm2, %v1966_v50, %v1967_v36  ;;  %v5149_v54 = vsel %vm5949_vm1, %v1913_v0, %v1914_v63  ;;  %vm5961_vm4 = vmmov %vm5950_vm13 }
 0x447   : > { %v1849_v48 = vpop.f32.mrb[14].mxu1  ;;  %1962 = vst.msk [vmem:[#allocation3 + $0x8] sm:$0xff] %vm5950_vm13, %v1877_v5  ;;  %v5161_v22 = vsel %vm5951_vm8, %v1881_v32, %v1882_v40  ;;  %v2030_v16 = vsel %vm5953_vm11, %v2028_v47, 0.0  ;;  %v1982_v11 = vsel %vm5954_vm9, %v1980_v17, 0.0  ;;  %vm5962_vm1 = vcmp.ge.s32.totalorder %v4500_v4, 0  ;;  %vm5964_vm11 = vmmov %vm5951_vm8 }
 0x448   : > { %v1871_v51 = vmax.f32 %v1847_v41, 0.0  ;;  %v1850_v58 = vadd.f32 %v5109_v18, %v1849_v48  ;;  %v1851_v52 = vpop.f32.mrb[15].mxu1  ;;  %vm5963_vm13 = vcmp.ge.s32.totalorder %v4505_v8, 0  ;;  %vm5965_vm9 = vmmov %vm5961_vm4 }
 0x44a   : > { %v2016_v7 = vrot.slane %v1871_v51, 2  ;;  %v5164_v10 = vmax.f32 %v1850_v58, 0.0  ;;  %v1968_v34 = vrot.slane %v1871_v51, 1  ;;  %v1883_v6 = vrot.slane %v1871_v51, 6 }
 0x44b   : > { %v1915_v42 = vrot.slane %v1871_v51, 7 }
 0x44c   : > { %v2027_v55 = vsel %vm5955_vm14, %v2015_v57, %v2016_v7  ;;  %v1884_v59 = vrot.slane %v5164_v10, 6  ;;  %v2017_v19 = vrot.slane %v5164_v10, 2  ;;  %v1979_v5 = vsel %vm1397_vm2, %v1967_v36, %v1968_v34  ;;  %v3990_v57 = vld [vmem:[%s5781_s8 + $0x18] sm:$0xff]  }
 0x44d   : > { %v2031_v47 = vsel %vm5956_vm12, %v2027_v55, 0.0  ;;  %v1983_v41 = vsel %vm5957_vm15, %v1979_v5, 0.0  ;;  %v1969_v28 = vrot.slane %v5164_v10, 1  ;;  %v1916_v17 = vrot.slane %v5164_v10, 7  ;;  %3547 = vmatpush3.bf16.msra.mxu0 %v3990_v57  ;;  %v3992_v55 = vld [vmem:[%s5781_s8 + $0x20] sm:$0xff]  }
 0x44e   : > { %v2038_v36 = vpack.c.bf16 %v2031_v47, %v2030_v16  ;;  %v2026_v61 = vsel %vm5958_vm10, %v2016_v7, %v2017_v19  ;;  %v1990_v48 = vpack.c.bf16 %v1983_v41, %v1982_v11  ;;  %v1926_v58 = vsel %vm5959_vm7, %v1914_v63, %v1915_v42  ;;  %3548 = vmatprep.subr.bf16.mxu0 %v3991_v20  ;;  %vm5969_vm10 = vmmov %vm5961_vm4 }
 0x44f   : > { %v1978_v53 = vsel %vm1397_vm2, %v1968_v34, %v1969_v28  ;;  %v1925_v21 = vsel %vm5960_vm6, %v1915_v42, %v1916_v17  ;;  %v5207_v63 = vsel %vm5962_vm1, %v1926_v58, 0.0  ;;  %v1878_v11 = vpack.c.bf16 %v5164_v10, %v1871_v51  ;;  %v3993_v42 = vld [vmem:[%s5781_s8 + $0x68] sm:$0xff]  }
 0x450   : > { %2042 = vst.msk [vmem:[#allocation3 + $0x10] sm:$0xff] %vm5961_vm4, %v2038_v36  ;;  %1998 = vrot.lane.b32.xlu0 %v1990_v48, %s4181_s30  ;;  %v5211_v34 = vsel %vm5963_vm13, %v1925_v21, 0.0  ;;  %v1893_v41 = vsel %vm5951_vm8, %v1883_v6, %v1884_v59  ;;  %v1894_v57 = vsel %vm5964_vm11, %v1882_v40, %v1883_v6  ;;  %vm5966_vm14 = vcmp.ge.s32.totalorder %v4490_v62, 0  ;;  %vm5975_vm8 = vmmov %vm5965_vm9 }
 0x451   : > { %v1938_v47 = vpack.c.bf16 %v5211_v34, %v5207_v63  ;;  %1963 = vst.msk [vmem:[#allocation3 + $0x20] sm:$0xff] %vm5965_vm9, %v1878_v11  ;;  %v1899_v48 = vsel %vm5966_vm14, %v1894_v57, 0.0  ;;  %vm5967_vm12 = vcmp.ge.s32.totalorder %v4492_v1, 0  ;;  %3549 = vmatpush3.bf16.msra.mxu0 %v3992_v55  ;;  %vm5968_vm15 = vcmp.lt.s32.totalorder %v4497_v3, 8 }
 0x452   : > { %v1900_v58 = vsel %vm5967_vm12, %v1893_v41, 0.0  ;;  %3550 = vmatprep.subr.bf16.mxu0 %v3993_v42  ;;  %v1984_v62 = vsel %vm1424_vm3, %v1978_v53, 0.0  ;;  %vm5970_vm7 = vcmp.lt.s32.totalorder %v4463_v45, 6  ;;  %vm5971_vm6 = vcmp.lt.s32.totalorder %v4517_v13, 8 }
 0x453   : > { %vm5972_vm4 = vmmov %vm5970_vm7  ;;  %vm5973_vm1 = vcmp.lt.s32.totalorder %v4463_v45, 1  ;;  %vm5976_vm11 = vcmp.ge.s32.totalorder %v4530_v27, 0  ;;  %vm5977_vm9 = vcmp.ge.s32.totalorder %v4539_v30, 0  ;;  %vm5978_vm14 = vcmp.lt.s32.totalorder %v4463_v45, 2 }
 0x454   : > { %vm5974_vm13 = vmmov %vm5973_vm1  ;;  %vm5979_vm12 = vcmp.lt.s32.totalorder %v4528_v26, 8 }
 0x455   : > { %3551 = vmatpush3.bf16.msra.mxu0 %v3994_v14 }
 0x457   : > { %v1854_v52 = vpop.f32.mrb[16].mxu1 }
 0x458   : > { %v1855_v7 = vadd.f32 %v5109_v18, %v1854_v52  ;;  %v1856_v16 = vpop.f32.mrb[17].mxu1  ;;  %v1906_v52 = vpack.c.bf16 %v1900_v58, %v1899_v48 }
 0x459   : > { %v1857_v5 = vpop.f32.mrb[18].mxu1 }
 0x45a   : > { %v1873_v51 = vmax.f32 %v1855_v7, 0.0  ;;  %v1858_v20 = vadd.f32 %v5109_v18, %v1857_v5  ;;  %v1859_v36 = vpop.f32.mrb[19].mxu1  ;;  %v2032_v7 = vsel %vm5968_vm15, %v2026_v61, 0.0  ;;  %1910 = vst.msk [vmem:[#allocation3 + $0x18] sm:$0xff] %vm5969_vm10, %v1906_v52  ;;  %v3995_v52 = vld [vmem:[%s5781_s8 + $0x70] sm:$0xff]   ;;  %vm5980_vm15 = vcmp.ge.s32.totalorder %v4494_v2, 0  ;;  %vm5981_vm10 = vmmov %vm5975_vm8 }
 0x45b   : > { %3552 = vmatprep.subr.bf16.mxu0 %v3995_v52 }
 0x45c   : > { %v2018_v21 = vrot.slane %v1873_v51, 2  ;;  %v5236_v40 = vmax.f32 %v1858_v20, 0.0  ;;  %v1970_v6 = vrot.slane %v1873_v51, 1  ;;  %v1885_v16 = vrot.slane %v1873_v51, 6 }
 0x45d   : > { %v1917_v1 = vrot.slane %v1873_v51, 7 }
 0x45e   : > { %v2025_v55 = vsel %vm5970_vm7, %v2017_v19, %v2018_v21  ;;  %v1886_v11 = vrot.slane %v5236_v40, 6  ;;  %v2019_v5 = vrot.slane %v5236_v40, 2  ;;  %v1977_v42 = vsel %vm1397_vm2, %v1969_v28, %v1970_v6 }
 0x45f   : > { %v2033_v3 = vsel %vm5971_vm6, %v2025_v55, 0.0  ;;  %v1985_v61 = vsel %vm1425_vm0, %v1977_v42, 0.0  ;;  %v1971_v53 = vrot.slane %v5236_v40, 1  ;;  %v1918_v41 = vrot.slane %v5236_v40, 7  ;;  %vm5983_vm6 = vmmov %vm5978_vm14 }
 0x460   : > { %v2039_v57 = vpack.c.bf16 %v2033_v3, %v2032_v7  ;;  %v2024_v19 = vsel %vm5972_vm4, %v2018_v21, %v2019_v5  ;;  %v1991_v36 = vpack.c.bf16 %v1985_v61, %v1984_v62  ;;  %v1924_v28 = vsel %vm5973_vm1, %v1916_v17, %v1917_v1  ;;  %v3996_v21 = vld [vmem:[%s5781_s8 + $0x30] sm:$0xff]  }
 0x461   : > { %v1862_v20 = vpop.f32.mrb[20].mxu1  ;;  %v1976_v58 = vsel %vm1397_vm2, %v1970_v6, %v1971_v53  ;;  %v1923_v14 = vsel %vm5974_vm13, %v1917_v1, %v1918_v41  ;;  %v5276_v6 = vsel %vm5976_vm11, %v1924_v28, 0.0  ;;  %v1879_v62 = vpack.c.bf16 %v5236_v40, %v1873_v51  ;;  %3553 = vmatpush3.bf16.msra.mxu0 %v3996_v21  ;;  %v3997_v28 = vld [vmem:[%s5781_s8 + $0x78] sm:$0xff]  }
 0x462   : > { %v1863_v13 = vadd.f32 %v5109_v18, %v1862_v20  ;;  %v1864_v48 = vpop.f32.mrb[21].mxu1  ;;  %2043 = vst.msk [vmem:[#allocation3 + $0x28] sm:$0xff] %vm5975_vm8, %v2039_v57  ;;  %2000 = vrot.lane.b32.xlu0 %v1991_v36, %s4181_s30  ;;  %v5280_v7 = vsel %vm5977_vm9, %v1923_v14, 0.0  ;;  %v1891_v61 = vsel %vm5978_vm14, %v1885_v16, %v1886_v11  ;;  %v2034_v57 = vsel %vm5979_vm12, %v2024_v19, 0.0  ;;  %3554 = vmatprep.subr.bf16.mxu0 %v3997_v28 }
 0x463   : > { %v1865_v17 = vpop.f32.mrb[22].mxu1  ;;  %v1939_v3 = vpack.c.bf16 %v5280_v7, %v5276_v6  ;;  %v1930_v51 = vsel %vm5980_vm15, %v5149_v54, 0.0  ;;  %1964 = vst.msk [vmem:[#allocation3 + $0x38] sm:$0xff] %vm5981_vm10, %v1879_v62  ;;  %vm5982_vm7 = vcmp.ge.s32.totalorder %v4485_v60, 0  ;;  %v1892_v20 = vsel %vm5983_vm6, %v1884_v59, %v1885_v16  ;;  %v3998_v60 = vld [vmem:[%s5781_s8 + $0x38] sm:$0xff]   ;;  %v4000_v7 = vld [vmem:[%s5781_s8 + $0x88] sm:$0xff]  }
 0x464   : > { %v5283_v1 = vmax.f32 %v1863_v13, 0.0  ;;  %v1866_v55 = vadd.f32 %v5109_v18, %v1865_v17  ;;  %v1867_v42 = vpop.f32.mrb[23].mxu1  ;;  %v1898_v18 = vsel %vm5982_vm7, %v5161_v22, 0.0  ;;  %vm5984_vm4 = vcmp.lt.s32.totalorder %v5914_v46, 8 }
 0x465   : > { %v1986_v54 = vsel %vm5984_vm4, %v1976_v58, 0.0  ;;  %vm5985_vm1 = vcmp.ge.s32.totalorder %v4524_v24, 0  ;;  %vm5986_vm13 = vcmp.ge.s32.totalorder %v4526_v25, 0  ;;  %vm5987_vm8 = vcmp.lt.s32.totalorder %v4463_v45, 6  ;;  %3555 = vmatpush3.bf16.msra.mxu0 %v3998_v60 }
 0x466   : > { %v2020_v36 = vrot.slane %v5283_v1, 2  ;;  %v1876_v26 = vmax.f32 %v1866_v55, 0.0  ;;  %v1972_v19 = vrot.slane %v5283_v1, 1  ;;  %v1887_v22 = vrot.slane %v5283_v1, 6  ;;  %vm5990_vm14 = vmmov %vm5987_vm8 }
 0x467   : > { %v1919_v10 = vrot.slane %v5283_v1, 7  ;;  %v1901_v59 = vsel %vm5985_vm1, %v1892_v20, 0.0  ;;  %v1902_v16 = vsel %vm5986_vm13, %v1891_v61, 0.0  ;;  %vm5988_vm11 = vcmp.lt.s32.totalorder %v4537_v29, 8  ;;  %vm5991_vm12 = vmmov %vm5987_vm8  ;;  %v3999_v29 = vld [vmem:[%s5781_s8 + $0x80] sm:$0xff]  }
 0x468   : > { %v2023_v13 = vsel %vm5987_vm8, %v2019_v5, %v2020_v36  ;;  %v1888_v48 = vrot.slane %v1876_v26, 6  ;;  %v2021_v58 = vrot.slane %v1876_v26, 2  ;;  %v1975_v14 = vsel %vm1397_vm2, %v1971_v53, %v1972_v19  ;;  %3735 = vmatprep.subr.bf16.mxu0 %v3999_v29 }
 0x469   : > { %v2035_v52 = vsel %vm5988_vm11, %v2023_v13, 0.0  ;;  %vm5989_vm9 = vcmp.lt.s32.totalorder %v5917_v9, 8  ;;  %v1920_v24 = vrot.slane %v1876_v26, 7  ;;  %v1973_v17 = vrot.slane %v1876_v26, 1 }
 0x46a   : > { %v1987_v21 = vsel %vm5989_vm9, %v1975_v14, 0.0  ;;  %v2040_v25 = vpack.c.bf16 %v2035_v52, %v2034_v57  ;;  %v2022_v62 = vsel %vm5990_vm14, %v2020_v36, %v2021_v58  ;;  %v2029_v5 = vsel %vm5991_vm12, %v2021_v58, %v2014_v15  ;;  %v6004_v58 = vld [vmem:[#allocation18_spill] sm:$0xff] }
 0x46b   : > { %v1992_v53 = vpack.c.bf16 %v1987_v21, %v1986_v54  ;;  %vm5992_vm15 = vcmp.lt.s32.totalorder %v4555_v35, 8  ;;  %vm5993_vm10 = vcmp.lt.s32.totalorder %v4558_v37, 8  ;;  %vm5994_vm7 = vcmp.lt.s32.totalorder %v4463_v45, 1 }
 0x46c   : > { %v2036_v55 = vsel %vm5992_vm15, %v2022_v62, 0.0  ;;  %v2037_v42 = vsel %vm5993_vm10, %v2029_v5, 0.0  ;;  %v1928_v61 = vsel %vm5994_vm7, %v1920_v24, %v1913_v0  ;;  %v1974_v57 = vsel %vm1397_vm2, %v1972_v19, %v1973_v17  ;;  %vm5998_vm13 = vmmov %vm5994_vm7 }
 0x46d   : > { %vm5995_vm6 = vcmask 523264   ;;  %v2041_v15 = vpack.c.bf16 %v2037_v42, %v2036_v55  ;;  %2002 = vrot.lane.b32.xlu0 %v1992_v53, %s4181_s30  ;;  %vm5996_vm4 = vcmp.ge.s32.totalorder %v4515_v12, 0  ;;  %v1981_v37 = vsel %vm1397_vm2, %v1973_v17, %v1966_v50  ;;  %vm5999_vm8 = vmmov %vm5994_vm7  ;;  %v2048_v42 = vld [vmem:[#allocation3 + $0x10] sm:$0xff] }
 0x46e   : > { %2044 = vst.msk [vmem:[#allocation3 + $0x40] sm:$0xff] %vm5995_vm6, %v2040_v25  ;;  %v1929_v35 = vsel %vm5996_vm4, %v1928_v61, 0.0  ;;  %v1988_v20 = vsel %vm1428_vm5, %v1974_v57, 0.0  ;;  %vm5997_vm1 = vcmp.lt.s32.totalorder %v5920_v56, 8  ;;  %v1921_v19 = vsel %vm5998_vm13, %v1919_v10, %v1920_v24  ;;  %vm6000_vm11 = vmmov %vm5995_vm6  ;;  %v4002_v25 = vld [vmem:[%s5781_s8 + $0x98] sm:$0xff]   ;;  %v2051_v61 = vld [vmem:[#allocation3 + $0x28] sm:$0xff] }
 0x46f   : > { %v1937_v0 = vpack.c.bf16 %v1930_v51, %v1929_v35  ;;  %v1989_v36 = vsel %vm5997_vm1, %v1981_v37, 0.0  ;;  %v1922_v54 = vsel %vm5999_vm8, %v1918_v41, %v1919_v10  ;;  %2045 = vst.msk [vmem:[#allocation3 + $0x58] sm:$0xff] %vm6000_vm11, %v2041_v15  ;;  %vm6001_vm9 = vcmp.ge.s32.totalorder %v4561_v38, 0  ;;  %vm6008_vm4 = vmmov %vm5995_vm6  ;;  %v4003_v35 = vld [vmem:[%s5783_s10 + $0x80] sm:$0xff]  }
 0x470   : > { %v1993_v28 = vpack.c.bf16 %v1989_v36, %v1988_v20  ;;  %v1935_v50 = vsel %vm6001_vm9, %v1922_v54, 0.0  ;;  %vm6002_vm14 = vcmp.ge.s32.totalorder %v4564_v39, 0  ;;  %vm6003_vm12 = vcmp.lt.s32.totalorder %v4463_v45, 2  ;;  %vm6013_vm8 = vmmov %vm6008_vm4  ;;  %v4004_v37 = vld [vmem:[%s5783_s10 + $0x40] sm:$0xff]   ;;  %v4007_v36 = vld [vmem:[%s5783_s10 + $0x48] sm:$0xff]  }
 0x471   : > { %v1936_v51 = vsel %vm6002_vm14, %v1921_v19, 0.0  ;;  %v1896_v60 = vsel %vm6003_vm12, %v1888_v48, %v1881_v32  ;;  %1945 = vrot.lane.b32.xlu1 %v1937_v0, %s4181_s30  ;;  %vm6005_vm15 = vcmp.ge.s32.totalorder %v6004_v58, 0  ;;  %v1880_v10 = vpack.c.bf16 %v1876_v26, %v5283_v1  ;;  %vm6006_vm10 = vmmov %vm6003_vm12  ;;  %v6009_v32 = vld [vmem:[#allocation19_spill] sm:$0xff]  ;;  %v6011_v1 = vld [vmem:[#allocation20_spill] sm:$0xff]  ;;  %3588 = vmatprep.subr.bf16.mxu1 %v4004_v37 }
 0x472   : > { %v1940_v13 = vpack.c.bf16 %v1936_v51, %v1935_v50  ;;  %v1897_v41 = vsel %vm6005_vm15, %v1896_v60, 0.0  ;;  %v1907_v14 = vpack.c.bf16 %v1902_v16, %v1901_v59  ;;  %2004 = vrot.lane.b32.xlu0 %v1993_v28, %s4181_s30  ;;  %v1889_v21 = vsel %vm6006_vm10, %v1887_v22, %v1888_v48  ;;  %vm6007_vm7 = vmmov %vm6006_vm10  ;;  %v4001_v48 = vld [vmem:[%s5781_s8 + $0x90] sm:$0xff]   ;;  %v4005_v20 = vld [vmem:[%s5783_s10] sm:$0xff]  }
 0x473   : > { %v1905_v52 = vpack.c.bf16 %v1898_v18, %v1897_v41  ;;  %v1890_v49 = vsel %vm6007_vm7, %v1886_v11, %v1887_v22  ;;  %1965 = vst.msk [vmem:[#allocation3 + $0x50] sm:$0xff] %vm5995_vm6, %v1880_v10  ;;  %vm6010_vm1 = vcmp.ge.s32.totalorder %v6009_v32, 0  ;;  %vm6012_vm13 = vcmp.ge.s32.totalorder %v6011_v1, 0  ;;  %vm6014_vm11 = vmmov %vm6008_vm4  ;;  %v4006_v0 = vld [vmem:[%s5783_s10 + $0x88] sm:$0xff]   ;;  %3589 = vmatpush3.bf16.msra.mxu1 %v4005_v20  ;;  %v4009_v54 = vld [vmem:[%s5783_s10 + $0x90] sm:$0xff]  }
 0x474   : > { %1911 = vst.msk [vmem:[#allocation3 + $0x30] sm:$0xff] %vm6008_vm4, %v1907_v14  ;;  %v1903_v24 = vsel %vm6010_vm1, %v1890_v49, 0.0  ;;  %v1904_v26 = vsel %vm6012_vm13, %v1889_v21, 0.0  ;;  %vm1957_vm9 = vcmask 1048064   ;;  %vm6015_vm14 = vmmov %vm6008_vm4  ;;  %3590 = vmatprep.subr.bf16.mxu1 %v4007_v36  ;;  %v4008_v19 = vld [vmem:[%s5783_s10 + $0x8] sm:$0xff]   ;;  %v4010_v28 = vld [vmem:[%s5783_s10 + $0x50] sm:$0xff]  }
 0x475   : > { %1909 = vst.msk [vmem:[#allocation3] sm:$0xff] %vm6013_vm8, %v1905_v52  ;;  %v1908_v18 = vpack.c.bf16 %v1904_v26, %v1903_v24  ;;  %1947 = vrot.lane.b32.xlu1 %v1938_v47, %s4181_s30  ;;  %vm6016_vm12 = vmmov %vm6008_vm4  ;;  %v2054_v57 = vld [vmem:[#allocation3 + $0x40] sm:$0xff]  ;;  %v4011_v50 = vld [vmem:[%s5783_s10 + $0x10] sm:$0xff]   ;;  %vm6020_vm7 = vcmp.lt.s32.totalorder %v4463_v45, 1  ;;  %vm6023_vm1 = vcmp.lt.s32.totalorder %v5899_v23, 8 }
 0x476   : > { %vm6017_vm15 = vmmov %vm6008_vm4  ;;  %v2057_v15 = vld [vmem:[#allocation3 + $0x58] sm:$0xff]  ;;  %v4015_v58 = vld [vmem:[%s5783_s10 + $0xa0] sm:$0xff]  }
 0x477   : > { %1912 = vst.msk [vmem:[#allocation3 + $0x48] sm:$0xff] %vm6014_vm11, %v1908_v18  ;;  %vm6018_vm10 = vmmov %vm6008_vm4  ;;  %3591 = vmatpush3.bf16.msra.mxu1 %v4008_v19  ;;  %v4012_v51 = vld [vmem:[%s5783_s10 + $0x98] sm:$0xff]   ;;  %v4016_v41 = vld [vmem:[%s5783_s10 + $0x60] sm:$0xff]   ;;  %vm6022_vm4 = vcmp.lt.s32.totalorder %v4578_v44, 8 }
 0x478   : > { %3592 = vmatprep.subr.bf16.mxu1 %v4010_v28  ;;  %v4013_v60 = vld [vmem:[%s5783_s10 + $0x58] sm:$0xff]   ;;  %v4017_v10 = vld [vmem:[%s5783_s10 + $0x20] sm:$0xff]   ;;  %v4018_v14 = vld [vmem:[%s5783_s10 + $0xa8] sm:$0xff]  }
 0x479   : > { %1949 = vrot.lane.b32.xlu1 %v1939_v3, %s4181_s30  ;;  %v4019_v52 = vld [vmem:[%s5783_s10 + $0x68] sm:$0xff]   ;;  %v4021_v49 = vld [vmem:[%s5783_s10 + $0xb0] sm:$0xff]   ;;  %v4024_v1 = vld [vmem:[%s5783_s10 + $0xb8] sm:$0xff]  }
 0x47a   : > { %v4020_v21 = vld [vmem:[%s5783_s10 + $0x28] sm:$0xff]   ;;  %v4022_v32 = vld [vmem:[%s5783_s10 + $0x70] sm:$0xff]   ;;  %v4025_v26 = vld [vmem:[%s5783_s10 + $0x78] sm:$0xff]  }
 0x47b   : > { %3593 = vmatpush3.bf16.msra.mxu1 %v4011_v50  ;;  %v4023_v24 = vld [vmem:[%s5783_s10 + $0x30] sm:$0xff]   ;;  %v4026_v18 = vld [vmem:[%s5783_s10 + $0x38] sm:$0xff]   ;;  %vm6021_vm6 = vmmov %vm6020_vm7 }
 0x47c   : > { %3594 = vmatprep.subr.bf16.mxu1 %v4013_v60  ;;  %vm3499_vm13 = vmpackc.low %vm6023_vm1, %vm6022_vm4  ;;  %vm6033_vm1 = vcmp.lt.s32.totalorder %v5920_v56, 8 }
 0x47d   : > { %1951 = vrot.lane.b32.xlu1 %v1940_v13, %s4181_s30  ;;  %v4014_v13 = vld [vmem:[%s5783_s10 + $0x18] sm:$0xff]   ;;  %vm6024_vm8 = vmmov %vm6021_vm6  ;;  %s4111_s30 = scalar_lea.vmem %s4110_s19, 256 }
 0x47e   : > { %vm3502_vm11 = vmpackc.low %vm1425_vm0, %vm1424_vm3  ;;  %vm6028_vm0 = vcmp.lt.s32.totalorder %v5914_v46, 8  ;;  %vm6029_vm3 = vcmp.lt.s32.totalorder %v5917_v9, 8  ;;  %p4113_p3 = scmp.lt.s32.totalorder %s4111_s30, %s4105_s25 }
 0x47f   : > { %3595 = vmatpush3.bf16.msra.mxu1 %v4014_v13  ;;  %vm6031_vm4 = vmmov %vm6021_vm6 }
 0x480   : > { %3596 = vmatprep.subr.bf16.mxu1 %v4016_v41  ;;  %p4114_p4 = por %p4113_p3, %p4112_p2 }
 0x482   : > { %p4115_p7 = pnand %p4114_p4, %p4108_p12 }
 0x483   : > { %3597 = vmatpush3.bf16.msra.mxu1 %v4017_v10 }
 0x484   : > { %3598 = vmatprep.subr.bf16.mxu1 %v4019_v52 }
 0x487   : > { %3599 = vmatpush3.bf16.msra.mxu1 %v4020_v21 }
 0x488   : > { %3600 = vmatprep.subr.bf16.mxu1 %v4022_v32 }
 0x48b   : > { %3601 = vmatpush3.bf16.msra.mxu1 %v4023_v24 }
 0x48c   : > { %3602 = vmatprep.subr.bf16.mxu1 %v4025_v26 }
 0x48f   : > { %3603 = vmatpush3.bf16.msra.mxu1 %v4026_v18 }
 0x4c2   : > { %v1999_v40 = vpop.permute.xlu0 %1998 }
 0x4c3   : > { %2010 = vst.msk [vmem:[#allocation3 + $0x8] sm:$0xff] %vm1957_vm9, %v1999_v40  ;;  %v6019_v40 = vmov 0.0|0.0  }
 0x4ca   : > { %v2047_v11 = vld [vmem:[#allocation3 + $0x8] sm:$0xff] }
 0x4cb   : > { %2269 = vmatprep.mubr.bf16.mxu0 %v2047_v11  ;;  %v5500_v11 = vld [vmem:[%s5785_s12] sm:$0xff]  }
 0x4cc   : > { %3775 = vmatprep.subr.bf16.mxu1 %v5500_v11 }
 0x4d4   : > { %v2001_v22 = vpop.permute.xlu0 %2000 }
 0x4d5   : > { %2011 = vst.msk [vmem:[#allocation3 + $0x20] sm:$0xff] %vm1957_vm9, %v2001_v22 }
 0x4dc   : > { %v2050_v16 = vld [vmem:[#allocation3 + $0x20] sm:$0xff] }
 0x4df   : > { %v2003_v63 = vpop.permute.xlu0 %2002 }
 0x4e0   : > { %2012 = vst.msk [vmem:[#allocation3 + $0x38] sm:$0xff] %vm1957_vm9, %v2003_v63 }
 0x4e3   : > { %v1946_v34 = vpop.permute.xlu1 %1945 }
 0x4e4   : > { %1958 = vst.msk [vmem:[#allocation3] sm:$0xff] %vm1957_vm9, %v1946_v34  ;;  %v2005_v47 = vpop.permute.xlu0 %2004 }
 0x4e5   : > { %2013 = vst.msk [vmem:[#allocation3 + $0x50] sm:$0xff] %vm1957_vm9, %v2005_v47 }
 0x4e7   : > { %v1948_v6 = vpop.permute.xlu1 %1947  ;;  %v2053_v5 = vld [vmem:[#allocation3 + $0x38] sm:$0xff] }
 0x4e8   : > { %1959 = vst.msk [vmem:[#allocation3 + $0x18] sm:$0xff] %vm1957_vm9, %v1948_v6 }
 0x4eb   : > { %v1950_v3 = vpop.permute.xlu1 %1949  ;;  %v2046_v59 = vld [vmem:[#allocation3] sm:$0xff] }
 0x4ec   : > { %1960 = vst.msk [vmem:[#allocation3 + $0x30] sm:$0xff] %vm1957_vm9, %v1950_v3  ;;  %2270 = vmatmul.mubr.bf16.vlgmr.msra.gmra.mrb[12].mxu0 %v2046_v59 }
 0x4ed   : > { %2277 = vmatprep.mubr.bf16.mxu0 %v2050_v16  ;;  %3736 = vmatpush3.bf16.msra.mxu0 %v3999_v29  ;;  %v2056_v29 = vld [vmem:[#allocation3 + $0x50] sm:$0xff] }
 0x4ee   : > { %3737 = vmatprep.subr.bf16.mxu0 %v4000_v7 }
 0x4ef   : > { %v1952_v17 = vpop.permute.xlu1 %1951  ;;  %v2049_v62 = vld [vmem:[#allocation3 + $0x18] sm:$0xff] }
 0x4f0   : > { %1961 = vst.msk [vmem:[#allocation3 + $0x48] sm:$0xff] %vm1957_vm9, %v1952_v17  ;;  %vm6025_vm9 = vmmov %vm6021_vm6 }
 0x4f1   : > { %3738 = vmatpush3.bf16.msra.mxu0 %v4000_v7 }
 0x4f2   : > { %3739 = vmatprep.subr.bf16.mxu0 %v4001_v48 }
 0x4f3   : > { %v2052_v53 = vld [vmem:[#allocation3 + $0x30] sm:$0xff] }
 0x4f4   : > { %2278 = vmatmul.mubr.bf16.gmra.mrb[16].mxu0 %v2049_v62 }
 0x4f5   : > { %2285 = vmatprep.mubr.bf16.mxu0 %v2053_v5  ;;  %3740 = vmatpush3.bf16.msra.mxu0 %v4001_v48 }
 0x4f6   : > { %3741 = vmatprep.subr.bf16.mxu0 %v4002_v25 }
 0x4f7   : > { %v2055_v55 = vld [vmem:[#allocation3 + $0x48] sm:$0xff] }
 0x4f9   : > { %3742 = vmatpush3.bf16.msra.mxu0 %v4002_v25 }
 0x4fa   : > { %3751 = vmatprep.subr.bf16.mxu0 %v4003_v35 }
 0x4fc   : > { %2286 = vmatmul.mubr.bf16.gmra.mrb[20].mxu0 %v2052_v53 }
 0x4fd   : > { %2293 = vmatprep.mubr.bf16.mxu0 %v2056_v29 }
 0x504   : > { %2294 = vmatmul.mubr.bf16.gmra.mrb[24].mxu0 %v2055_v55 }
 0x505   : > { %3743 = vmatprep.mubr.msk.bf16.mxu0 %vm6015_vm14, %v2048_v42  ;;  %vm6026_vm14 = vcmp.ge.s32.totalorder %v4515_v12, 0 }
 0x50c   : > { %3744 = vmatmul.mubr.msk.bf16.vlgmr.msra.gmra.mrb[28].mxu0 %vm6016_vm12, %v2051_v61  ;;  %vm6027_vm12 = vcmp.ge.s32.totalorder %v4494_v2, 0 }
 0x50d   : > { %3747 = vmatprep.mubr.msk.bf16.mxu0 %vm6017_vm15, %v2054_v57  ;;  %3752 = vmatpush3.bf16.msra.mxu0 %v4003_v35  ;;  %vm3487_vm15 = vmpackc.low %vm6027_vm12, %vm6026_vm14  ;;  %vm6037_vm14 = vmmov 0   ;;  %vm6038_vm12 = vcmp.ge.s32.totalorder %v4530_v27, 0  ;;  %v4032_v27 = vld [vmem:[%s5785_s12 + $0x28] sm:$0xff]  }
 0x50e   : > { %3753 = vmatprep.subr.bf16.mxu0 %v4006_v0 }
 0x511   : > { %3754 = vmatpush3.bf16.msra.mxu0 %v4006_v0  ;;  %v3414_v0 = vld [vmem:[%s5782_s9] ss:$0 sm:$0xff] }
 0x512   : > { %3755 = vmatprep.subr.bf16.mxu0 %v4009_v54 }
 0x514   : > { %3748 = vmatmul.mubr.msk.bf16.gmra.mrb[32].mxu0 %vm6018_vm10, %v2057_v15  ;;  %vm3505_vm10 = vmpackc.low %vm6029_vm3, %vm6028_vm0  ;;  %vm6041_vm3 = vcmp.ge.s32.totalorder %v4564_v39, 0 }
 0x515   : > { %3756 = vmatpush3.bf16.msra.mxu0 %v4009_v54 }
 0x516   : > { %3757 = vmatprep.subr.bf16.mxu0 %v4012_v51 }
 0x519   : > { %3758 = vmatpush3.bf16.msra.mxu0 %v4012_v51 }
 0x51a   : > { %3759 = vmatprep.subr.bf16.mxu0 %v4015_v58 }
 0x51d   : > { %3760 = vmatpush3.bf16.msra.mxu0 %v4015_v58 }
 0x51e   : > { %3761 = vmatprep.subr.bf16.mxu0 %v4018_v14 }
 0x521   : > { %3762 = vmatpush3.bf16.msra.mxu0 %v4018_v14 }
 0x522   : > { %3763 = vmatprep.subr.bf16.mxu0 %v4021_v49 }
 0x525   : > { %3764 = vmatpush3.bf16.msra.mxu0 %v4021_v49 }
 0x526   : > { %3765 = vmatprep.subr.bf16.mxu0 %v4024_v1 }
 0x529   : > { %3766 = vmatpush3.bf16.msra.mxu0 %v4024_v1 }
 0x52a   : > { %3875 = vmatprep.subr.bf16.mxu0 %v6019_v40 }
 0x5bf   : > { %v3556_v22 = vpop.f32.mrb[12].mxu0 }
 0x5c0   : > { %v3557_v63 = vpop.f32.mrb[13].mxu0 }
 0x5c1   : > { %v3558_v34 = vadd.f32 %v3557_v63, %v3556_v22  ;;  %v3559_v47 = vpop.f32.mrb[14].mxu0 }
 0x5c2   : > { %v3560_v6 = vpop.f32.mrb[15].mxu0 }
 0x5c3   : > { %v3561_v7 = vadd.f32 %v3560_v6, %v3559_v47  ;;  %v2272_v54 = vadd.f32 %v3558_v34, %v3414_v0 }
 0x5c5   : > { %v2275_v58 = vadd.f32 %v3561_v7, %v3414_v0 }
 0x5c7   : > { %v3562_v3 = vpop.f32.mrb[16].mxu0 }
 0x5c8   : > { %v3563_v59 = vpop.f32.mrb[17].mxu0 }
 0x5c9   : > { %v3564_v16 = vadd.f32 %v3563_v59, %v3562_v3  ;;  %v3565_v48 = vpop.f32.mrb[18].mxu0 }
 0x5ca   : > { %v3566_v17 = vpop.f32.mrb[19].mxu0 }
 0x5cb   : > { %v3567_v25 = vadd.f32 %v3566_v17, %v3565_v48  ;;  %v2280_v36 = vadd.f32 %v3564_v16, %v3414_v0 }
 0x5cd   : > { %v2283_v51 = vadd.f32 %v3567_v25, %v3414_v0 }
 0x5cf   : > { %v3568_v62 = vpop.f32.mrb[20].mxu0 }
 0x5d0   : > { %v3569_v5 = vpop.f32.mrb[21].mxu0 }
 0x5d1   : > { %v3570_v53 = vadd.f32 %v3569_v5, %v3568_v62  ;;  %v3571_v29 = vpop.f32.mrb[22].mxu0 }
 0x5d2   : > { %v3572_v55 = vpop.f32.mrb[23].mxu0 }
 0x5d3   : > { %v3573_v42 = vadd.f32 %v3572_v55, %v3571_v29  ;;  %v2288_v32 = vadd.f32 %v3570_v53, %v3414_v0 }
 0x5d5   : > { %v2291_v24 = vadd.f32 %v3573_v42, %v3414_v0 }
 0x5d7   : > { %v3574_v61 = vpop.f32.mrb[24].mxu0 }
 0x5d8   : > { %v3575_v57 = vpop.f32.mrb[25].mxu0 }
 0x5d9   : > { %v3576_v15 = vadd.f32 %v3575_v57, %v3574_v61  ;;  %v3577_v35 = vpop.f32.mrb[26].mxu0 }
 0x5da   : > { %v3578_v37 = vpop.f32.mrb[27].mxu0 }
 0x5db   : > { %v3579_v20 = vadd.f32 %v3578_v37, %v3577_v35  ;;  %v2296_v22 = vadd.f32 %v3576_v15, %v3414_v0 }
 0x5dd   : > { %v2299_v5 = vadd.f32 %v3579_v20, %v3414_v0 }
 0x5df   : > { %v3745_v19 = vpop.f32.mrb[28].mxu0 }
 0x5e0   : > { %v2345_v28 = vadd.f32 %v3745_v19, %v2280_v36  ;;  %v2336_v50 = vpop.f32.mrb[29].mxu0 }
 0x5e1   : > { %v2337_v60 = vadd.f32 %v2336_v50, %v2272_v54  ;;  %v3746_v13 = vpop.f32.mrb[30].mxu0 }
 0x5e2   : > { %v5506_v41 = vmax.f32 %v2345_v28, 0.0  ;;  %v2348_v10 = vadd.f32 %v3746_v13, %v2283_v51  ;;  %v2339_v14 = vpop.f32.mrb[31].mxu0 }
 0x5e3   : > { %v2367_v52 = vmax.f32 %v2337_v60, 0.0  ;;  %v2340_v21 = vadd.f32 %v2339_v14, %v2275_v58 }
 0x5e4   : > { %v5508_v49 = vmax.f32 %v2348_v10, 0.0  ;;  %v2381_v1 = vrot.slane %v5506_v41, 7  ;;  %v2417_v26 = vrot.slane %v5506_v41, 1 }
 0x5e5   : > { %v2368_v18 = vmax.f32 %v2340_v21, 0.0  ;;  %v2379_v63 = vrot.slane %v2367_v52, 7  ;;  %v2415_v7 = vrot.slane %v2367_v52, 1 }
 0x5e6   : > { %v2382_v34 = vrot.slane %v5508_v49, 7  ;;  %v2418_v47 = vrot.slane %v5508_v49, 1  ;;  %v2376_v6 = vpack.c.bf16 %v5508_v49, %v5506_v41 }
 0x5e7   : > { %v2380_v3 = vrot.slane %v2368_v18, 7  ;;  %v2416_v59 = vrot.slane %v2368_v18, 1  ;;  %v3749_v16 = vpop.f32.mrb[32].mxu0  ;;  %v2375_v48 = vpack.c.bf16 %v2368_v18, %v2367_v52 }
 0x5e8   : > { %v2427_v17 = vsel %vm1397_vm2, %v2417_v26, %v2418_v47  ;;  %v2361_v25 = vadd.f32 %v3749_v16, %v2296_v22  ;;  %v2352_v62 = vpop.f32.mrb[33].mxu0  ;;  %v2391_v53 = vsel %vm6020_vm7, %v2381_v1, %v2382_v34  ;;  %vm6030_vm7 = vmmov %vm6021_vm6 }
 0x5e9   : > { %v2393_v29 = vsel %vm6021_vm6, %v2379_v63, %v2380_v3  ;;  %v2353_v55 = vadd.f32 %v2352_v62, %v2288_v32  ;;  %v3750_v42 = vpop.f32.mrb[34].mxu0  ;;  %2690 = vmatprep.mubr.bf16.mxu1 %v2375_v48  ;;  %v2428_v61 = vsel %vm1397_vm2, %v2416_v59, %v2417_v26  ;;  %v2429_v57 = vsel %vm1397_vm2, %v2415_v7, %v2416_v59 }
 0x5ea   : > { %v2373_v15 = vmax.f32 %v2361_v25, 0.0  ;;  %v2364_v35 = vadd.f32 %v3750_v42, %v2299_v5  ;;  %v2355_v37 = vpop.f32.mrb[35].mxu0  ;;  %v3500_v20 = vpack.c.bf16 %v2428_v61, %v2429_v57  ;;  %v2392_v0 = vsel %vm6024_vm8, %v2380_v3, %v2381_v1 }
 0x5eb   : > { %v2371_v36 = vmax.f32 %v2353_v55, 0.0  ;;  %v2356_v19 = vadd.f32 %v2355_v37, %v2291_v24  ;;  %v3491_v54 = vpack.c.bf16 %v2391_v53, %v2392_v0  ;;  %vm6034_vm8 = vcmp.ge.s32.totalorder %v4500_v4, 0  ;;  %v4030_v4 = vld [vmem:[%s5785_s12 + $0x18] sm:$0xff]  }
 0x5ec   : > { %v2374_v28 = vmax.f32 %v2364_v35, 0.0  ;;  %3767 = vmatprep.mubr.msk.bf16.mxu0 %vm3499_vm13, %v3500_v20  ;;  %v2385_v50 = vrot.slane %v2373_v15, 7  ;;  %v2421_v51 = vrot.slane %v2373_v15, 1  ;;  %vm3508_vm13 = vmpackc.low %vm6033_vm1, %vm1428_vm5  ;;  %vm6040_vm5 = vcmp.ge.s32.totalorder %v4561_v38, 0 }
 0x5ed   : > { %v2419_v60 = vrot.slane %v2371_v36, 1  ;;  %v2372_v13 = vmax.f32 %v2356_v19, 0.0  ;;  %v2383_v44 = vrot.slane %v2371_v36, 7 }
 0x5ee   : > { %v2386_v58 = vrot.slane %v2374_v28, 7  ;;  %v2422_v23 = vrot.slane %v2374_v28, 1  ;;  %v2378_v41 = vpack.c.bf16 %v2374_v28, %v2373_v15 }
 0x5ef   : > { %v2426_v10 = vsel %vm1397_vm2, %v2418_v47, %v2419_v60  ;;  %v2384_v14 = vrot.slane %v2372_v13, 7  ;;  %v2420_v52 = vrot.slane %v2372_v13, 1  ;;  %v2377_v21 = vpack.c.bf16 %v2372_v13, %v2371_v36  ;;  %v4028_v47 = vld [vmem:[%s5785_s12 + $0x8] sm:$0xff]  }
 0x5f0   : > { %v3503_v49 = vpack.c.bf16 %v2426_v10, %v2427_v17  ;;  %v2394_v32 = vsel %vm6025_vm9, %v2386_v58, %v2379_v63  ;;  %v2423_v24 = vsel %vm1397_vm2, %v2421_v51, %v2422_v23  ;;  %v2430_v1 = vsel %vm1397_vm2, %v2422_v23, %v2415_v7 }
 0x5f1   : > { %v3488_v43 = vpack.c.bf16 %v2393_v29, %v2394_v32  ;;  %v2424_v31 = vsel %vm1397_vm2, %v2420_v52, %v2421_v51  ;;  %v2425_v26 = vsel %vm1397_vm2, %v2419_v60, %v2420_v52  ;;  %v3509_v2 = vpack.c.bf16 %v2430_v1, %v2423_v24  ;;  %vm6032_vm2 = vmmov %vm6031_vm4 }
 0x5f2   : > { %3768 = vmatmul.mubr.msk.bf16.vlgmr.msra.gmra.mrb[36].mxu0 %vm3502_vm11, %v3503_v49  ;;  %v3506_v12 = vpack.c.bf16 %v2424_v31, %v2425_v26  ;;  %v2389_v18 = vsel %vm6030_vm7, %v2383_v44, %v2384_v14  ;;  %v2390_v22 = vsel %vm6021_vm6, %v2382_v34, %v2383_v44  ;;  %v2387_v63 = vsel %vm6031_vm4, %v2385_v50, %v2386_v58  ;;  %v4029_v34 = vld [vmem:[%s5785_s12 + $0x10] sm:$0xff]  }
 0x5f3   : > { %3489 = vmatmul.mubr.msk.bf16.vlgmr.msra.gmra.mrb[24].mxu1 %vm3487_vm15, %v3488_v43  ;;  %v3494_v46 = vpack.c.bf16 %v2389_v18, %v2390_v22  ;;  %v2388_v9 = vsel %vm6032_vm2, %v2384_v14, %v2385_v50  ;;  %vm6035_vm11 = vcmp.ge.s32.totalorder %v4505_v8, 0  ;;  %vm6039_vm15 = vcmp.ge.s32.totalorder %v4539_v30, 0  ;;  %v4031_v8 = vld [vmem:[%s5785_s12 + $0x20] sm:$0xff]   ;;  %v4033_v30 = vld [vmem:[%s5785_s12 + $0x30] sm:$0xff]  }
 0x5f4   : > { %2698 = vmatprep.mubr.bf16.mxu1 %v2376_v6  ;;  %3771 = vmatprep.mubr.msk.bf16.mxu0 %vm3505_vm10, %v3506_v12  ;;  %v3497_v7 = vpack.c.bf16 %v2387_v63, %v2388_v9  ;;  %vm3490_vm9 = vmpackc.low %vm6035_vm11, %vm6034_vm8  ;;  %v3439_v6 = vld [vmem:[%s5784_s11] ss:$0 sm:$0xff]  ;;  %vm2977_vm7 = vcmask 516096   ;;  %vm6042_vm6 = vcmask 523264  }
 0x5f5   : > { %3776 = vmatpush3.bf16.msra.mxu1 %v5500_v11  ;;  %v6036_v11 = vmov 0.0   ;;  %vm3493_vm0 = vmpackc.low %vm6039_vm15, %vm6038_vm12 }
 0x5f6   : > { %3777 = vmatprep.subr.bf16.mxu1 %v4028_v47  ;;  %vm3496_vm10 = vmpackc.low %vm6041_vm3, %vm6040_vm5 }
 0x5f7   : > { %vm6043_vm4 = vmmov %vm6042_vm6 }
 0x5f8   : > { %vm6044_vm2 = vmmov %vm6043_vm4 }
 0x5f9   : > { %3778 = vmatpush3.bf16.msra.mxu1 %v4028_v47  ;;  %vm6045_vm1 = vmmov %vm6044_vm2 }
 0x5fa   : > { %3772 = vmatmul.mubr.msk.bf16.gmra.mrb[40].mxu0 %vm3508_vm13, %v3509_v2  ;;  %3779 = vmatprep.subr.bf16.mxu1 %v4029_v34  ;;  %vm6046_vm13 = vmmov %vm6045_vm1 }
 0x5fb   : > { %3492 = vmatmul.mubr.msk.bf16.gmra.mrb[28].mxu1 %vm3490_vm9, %v3491_v54  ;;  %3815 = vmatprep.mubr.msk.f32.mxu0 %vm6037_vm14, %v6036_v11  ;;  %vm6047_vm8 = vmmov %vm6045_vm1 }
 0x5fc   : > { %2706 = vmatprep.mubr.bf16.mxu1 %v2377_v21  ;;  %vm6048_vm11 = vmmov %vm6045_vm1 }
 0x5fd   : > { %3780 = vmatpush3.bf16.msra.mxu1 %v4029_v34  ;;  %vm6049_vm9 = vmmov %vm6045_vm1 }
 0x5fe   : > { %3781 = vmatprep.subr.bf16.mxu1 %v4030_v4  ;;  %vm6050_vm12 = vmmov %vm6045_vm1 }
 0x601   : > { %3782 = vmatpush3.bf16.msra.mxu1 %v4030_v4 }
 0x602   : > { %3783 = vmatprep.subr.bf16.mxu1 %v4031_v8 }
 0x603   : > { %3495 = vmatmul.mubr.msk.bf16.gmra.mrb[32].mxu1 %vm3493_vm0, %v3494_v46 }
 0x604   : > { %2714 = vmatprep.mubr.bf16.mxu1 %v2378_v41 }
 0x605   : > { %3784 = vmatpush3.bf16.msra.mxu1 %v4031_v8 }
 0x606   : > { %3785 = vmatprep.subr.bf16.mxu1 %v4032_v27 }
 0x609   : > { %3786 = vmatpush3.bf16.msra.mxu1 %v4032_v27 }
 0x60a   : > { %3787 = vmatprep.subr.bf16.mxu1 %v4033_v30 }
 0x60b   : > { %3498 = vmatmul.mubr.msk.bf16.gmra.mrb[36].mxu1 %vm3496_vm10, %v3497_v7 }
 0x60d   : > { %3788 = vmatpush3.bf16.msra.mxu1 %v4033_v30 }
 0x60e   : > { %3789 = vmatprep.subr.bf16.mxu1 %v4034_v33 }
 0x611   : > { %3790 = vmatpush3.bf16.msra.mxu1 %v4034_v33 }
 0x612   : > { %3837 = vmatprep.subr.bf16.mxu1 %v6036_v11 }
 0x6c5   : > { %v3769_v38 = vpop.f32.mrb[36].mxu0 }
 0x6c6   : > { %v3604_v39 = vpop.f32.mrb[24].mxu1  ;;  %v2757_v56 = vpop.f32.mrb[37].mxu0 }
 0x6c7   : > { %v3605_v3 = vpop.f32.mrb[25].mxu1  ;;  %v3770_v59 = vpop.f32.mrb[38].mxu0 }
 0x6c8   : > { %v3606_v16 = vadd.f32 %v3605_v3, %v3604_v39  ;;  %v3607_v48 = vpop.f32.mrb[26].mxu1  ;;  %v2760_v17 = vpop.f32.mrb[39].mxu0 }
 0x6c9   : > { %v3608_v25 = vpop.f32.mrb[27].mxu1 }
 0x6ca   : > { %v2693_v62 = vadd.f32 %v3606_v16, %v3439_v6  ;;  %v3609_v5 = vadd.f32 %v3608_v25, %v3607_v48  ;;  %v2941_v48 = vsub.s32 0, %v4463_v45 }
 0x6cc   : > { %v5608_v53 = vadd.f32 %v2757_v56, %v2693_v62  ;;  %v2696_v29 = vadd.f32 %v3609_v5, %v3439_v6 }
 0x6cd   : > { %v3773_v55 = vpop.f32.mrb[40].mxu0 }
 0x6ce   : > { %v5610_v42 = vadd.f32 %v2760_v17, %v2696_v29  ;;  %v3610_v61 = vpop.f32.mrb[28].mxu1  ;;  %v2773_v57 = vpop.f32.mrb[41].mxu0  ;;  %v2788_v37 = vmax.f32 %v5608_v53, 0.0 }
 0x6cf   : > { %v3611_v15 = vpop.f32.mrb[29].mxu1  ;;  %v3774_v35 = vpop.f32.mrb[42].mxu0 }
 0x6d0   : > { %v2789_v20 = vmax.f32 %v5610_v42, 0.0  ;;  %v3612_v0 = vadd.f32 %v3611_v15, %v3610_v61  ;;  %v3613_v36 = vpop.f32.mrb[30].mxu1  ;;  %v2776_v19 = vpop.f32.mrb[43].mxu0 }
 0x6d1   : > { %v3614_v54 = vpop.f32.mrb[31].mxu1 }
 0x6d2   : > { %v2701_v28 = vadd.f32 %v3612_v0, %v3439_v6  ;;  %v3615_v50 = vadd.f32 %v3614_v54, %v3613_v36  ;;  %v2796_v51 = vpack.c.bf16 %v2789_v20, %v2788_v37 }
 0x6d4   : > { %v5618_v60 = vadd.f32 %v3769_v38, %v2701_v28  ;;  %v2704_v13 = vadd.f32 %v3615_v50, %v3439_v6  ;;  %3791 = vmatprep.mubr.bf16.mxu1 %v2796_v51  ;;  %v2937_v38 = vld [vmem:[%s5786_s13] sm:$0x1] }
 0x6d5   : > { %v2976_v39 = vand.u32 2147483647, %v2937_v38  ;;  %v2942_v17 = vrot.slane %v2937_v38, %v2941_v48 }
 0x6d6   : > { %v5620_v44 = vadd.f32 %v3770_v59, %v2704_v13  ;;  %v3616_v58 = vpop.f32.mrb[32].mxu1  ;;  %v2790_v41 = vmax.f32 %v5618_v60, 0.0 }
 0x6d7   : > { %v3617_v23 = vpop.f32.mrb[33].mxu1  ;;  %v2978_v56 = vsel %vm2977_vm7, %v2976_v39, 0.0 }
 0x6d8   : > { %v2791_v10 = vmax.f32 %v5620_v44, 0.0  ;;  %v3618_v14 = vadd.f32 %v3617_v23, %v3616_v58  ;;  %v3619_v52 = vpop.f32.mrb[34].mxu1  ;;  %2979 = vadd.xlane.f32.xlu0 %v2978_v56 }
 0x6d9   : > { %v3620_v21 = vpop.f32.mrb[35].mxu1 }
 0x6da   : > { %v2797_v49 = vpack.c.bf16 %v2791_v10, %v2790_v41  ;;  %v2709_v32 = vadd.f32 %v3618_v14, %v3439_v6  ;;  %v3621_v24 = vadd.f32 %v3620_v21, %v3619_v52 }
 0x6dc   : > { %v5628_v1 = vadd.f32 %v2773_v57, %v2709_v32  ;;  %v2712_v43 = vadd.f32 %v3621_v24, %v3439_v6  ;;  %3792 = vmatmul.mubr.bf16.vlgmr.msra.gmra.mrb[40].mxu1 %v2797_v49 }
 0x6de   : > { %v5630_v31 = vadd.f32 %v2776_v19, %v2712_v43  ;;  %v3622_v26 = vpop.f32.mrb[36].mxu1  ;;  %v2792_v12 = vmax.f32 %v5628_v1, 0.0  ;;  %v4035_v1 = vld [vmem:[%s5787_s14] sm:$0xff]  }
 0x6df   : > { %v3623_v2 = vpop.f32.mrb[37].mxu1  ;;  %3838 = vmatpush3.bf16.msra.mxu1 %v4035_v1 }
 0x6e0   : > { %v2793_v18 = vmax.f32 %v5630_v31, 0.0  ;;  %v3624_v22 = vadd.f32 %v3623_v2, %v3622_v26  ;;  %v3625_v63 = vpop.f32.mrb[38].mxu1  ;;  %v4036_v31 = vld [vmem:[%s5787_s14 + $0x8] sm:$0xff]   ;;  %3839 = vmatprep.subr.bf16.mxu1 %v6036_v11 }
 0x6e1   : > { %v3626_v47 = vpop.f32.mrb[39].mxu1 }
 0x6e2   : > { %v2717_v46 = vadd.f32 %v3624_v22, %v3439_v6  ;;  %v3627_v9 = vadd.f32 %v3626_v47, %v3625_v63  ;;  %v2798_v7 = vpack.c.bf16 %v2793_v18, %v2792_v12 }
 0x6e3   : > { %3840 = vmatpush3.bf16.msra.mxu1 %v4036_v31 }
 0x6e4   : > { %v5638_v34 = vadd.f32 %v3773_v55, %v2717_v46  ;;  %v2720_v4 = vadd.f32 %v3627_v9, %v3439_v6  ;;  %3795 = vmatprep.mubr.bf16.mxu1 %v2798_v7  ;;  %3841 = vmatprep.subr.bf16.mxu1 %v6036_v11 }
 0x6e6   : > { %v5640_v8 = vadd.f32 %v3774_v35, %v2720_v4  ;;  %v2794_v27 = vmax.f32 %v5638_v34, 0.0 }
 0x6e8   : > { %v2795_v30 = vmax.f32 %v5640_v8, 0.0  ;;  %v4039_v8 = vld [vmem:[%s5787_s14 + $0x20] sm:$0xff]  }
 0x6ea   : > { %v2799_v33 = vpack.c.bf16 %v2795_v30, %v2794_v27 }
 0x6ec   : > { %3796 = vmatmul.mubr.bf16.gmra.mrb[44].mxu1 %v2799_v33 }
 0x6ed   : > { %3853 = vmatprep.mubr.msk.bf16.mxu1 %vm6037_vm14, %v6036_v11 }
 0x765   : > { %v2980_v2 = vpop.xlane.xlu0 %2979 }
 0x766   : > { %v2984_v22 = vrot.slane %v2980_v2, %v2941_v48 }
 0x7af   : > { %v3793_v6 = vpop.f32.mrb[40].mxu1 }
 0x7b0   : > { %4043 = vtanh.f32 %v3793_v6  ;;  %v2898_v3 = vpop.f32.mrb[41].mxu1 }
 0x7b1   : > { %4045 = vtanh.f32 %v2898_v3  ;;  %v3794_v59 = vpop.f32.mrb[42].mxu1 }
 0x7b2   : > { %4047 = vtanh.f32 %v3794_v59  ;;  %v2901_v16 = vpop.f32.mrb[43].mxu1 }
 0x7b3   : > { %4049 = vtanh.f32 %v2901_v16 }
 0x7ba   : > { %v4044_v25 = vpop.eup %4043 }
 0x7bb   : > { %v4046_v62 = vpop.eup %4045  ;;  %v2946_v5 = vmul.f32 %v4044_v25, %v2942_v17 }
 0x7bc   : > { %v4048_v29 = vpop.eup %4047  ;;  %v2944_v55 = vmul.f32 %v4046_v62, %v2942_v17 }
 0x7bd   : > { %v4050_v61 = vpop.eup %4049  ;;  %v2947_v57 = vmul.f32 %v4048_v29, %v2942_v17  ;;  %v2958_v50 = vsel %vm6045_vm1, %v2946_v5, 0.0 }
 0x7be   : > { %v2952_v15 = vsel %vm6042_vm6, %v2944_v55, 0.0  ;;  %v2945_v35 = vmul.f32 %v4050_v61, %v2942_v17 }
 0x7bf   : > { %2953 = vadd.xlane.f32.xlu1 %v2952_v15  ;;  %v3797_v0 = vpop.f32.mrb[44].mxu1  ;;  %v2961_v28 = vsel %vm6044_vm2, %v2947_v57, 0.0 }
 0x7c0   : > { %4051 = vtanh.f32 %v3797_v0  ;;  %v2914_v36 = vpop.f32.mrb[45].mxu1  ;;  %v2955_v19 = vsel %vm6043_vm4, %v2945_v35, 0.0 }
 0x7c1   : > { %4053 = vtanh.f32 %v2914_v36  ;;  %2956 = vadd.xlane.f32.xlu0 %v2955_v19  ;;  %v3798_v45 = vpop.f32.mrb[46].mxu1 }
 0x7c2   : > { %4055 = vtanh.f32 %v3798_v45  ;;  %v2917_v54 = vpop.f32.mrb[47].mxu1 }
 0x7c3   : > { %4057 = vtanh.f32 %v2917_v54  ;;  %2962 = vadd.xlane.f32.xlu1 %v2961_v28 }
 0x7c5   : > { %2959 = vadd.xlane.f32.xlu0 %v2958_v50 }
 0x7ca   : > { %v4052_v51 = vpop.eup %4051 }
 0x7cb   : > { %v4054_v13 = vpop.eup %4053  ;;  %v2950_v58 = vmul.f32 %v4052_v51, %v2942_v17 }
 0x7cc   : > { %v4056_v23 = vpop.eup %4055  ;;  %v2948_v14 = vmul.f32 %v4054_v13, %v2942_v17 }
 0x7cd   : > { %v4058_v52 = vpop.eup %4057  ;;  %v2951_v21 = vmul.f32 %v4056_v23, %v2942_v17  ;;  %v2970_v43 = vsel %vm6048_vm11, %v2950_v58, 0.0 }
 0x7ce   : > { %v2964_v49 = vsel %vm6046_vm13, %v2948_v14, 0.0  ;;  %v2949_v32 = vmul.f32 %v4058_v52, %v2942_v17  ;;  %v3009_v52 = vld [vmem:[%s5774_s1] sm:$0xff] }
 0x7cf   : > { %2965 = vadd.xlane.f32.xlu0 %v2964_v49  ;;  %v2973_v26 = vsel %vm6049_vm9, %v2951_v21, 0.0 }
 0x7d0   : > { %v2967_v24 = vsel %vm6047_vm8, %v2949_v32, 0.0 }
 0x7d1   : > { %2968 = vadd.xlane.f32.xlu1 %v2967_v24  ;;  %v4042_v24 = vld [vmem:[%s5787_s14 + $0x38] sm:$0xff]  }
 0x7d3   : > { %2971 = vadd.xlane.f32.xlu0 %v2970_v43 }
 0x7d5   : > { %2974 = vadd.xlane.f32.xlu1 %v2973_v26 }
 0x84c   : > { %v2954_v63 = vpop.xlane.xlu1 %2953 }
 0x84d   : > { %v2985_v47 = vsub.f32 %v2954_v63, %v2984_v22 }
 0x84e   : > { %v2957_v46 = vpop.xlane.xlu0 %2956 }
 0x84f   : > { %v2993_v9 = vmul.f32 1.442695, %v2985_v47  ;;  %v2986_v7 = vsub.f32 %v2957_v46, %v2984_v22 }
 0x850   : > { %v2963_v4 = vpop.xlane.xlu1 %2962 }
 0x851   : > { %v2995_v33 = vmul.f32 1.442695, %v2986_v7  ;;  %v2988_v38 = vsub.f32 %v2963_v4, %v2984_v22  ;;  %4059 = vpow2.f32 %v2993_v9 }
 0x852   : > { %v2960_v39 = vpop.xlane.xlu0 %2959 }
 0x853   : > { %4061 = vpow2.f32 %v2995_v33  ;;  %v2999_v56 = vmul.f32 1.442695, %v2988_v38  ;;  %v2987_v6 = vsub.f32 %v2960_v39, %v2984_v22 }
 0x855   : > { %v2997_v3 = vmul.f32 1.442695, %v2987_v6  ;;  %4063 = vpow2.f32 %v2999_v56 }
 0x857   : > { %4065 = vpow2.f32 %v2997_v3 }
 0x85b   : > { %v4060_v59 = vpop.eup %4059 }
 0x85c   : > { %v2966_v16 = vpop.xlane.xlu0 %2965  ;;  %v3083_v21 = vmul.f32 %v4060_v59, %v2788_v37 }
 0x85d   : > { %v4062_v17 = vpop.eup %4061  ;;  %v2989_v48 = vsub.f32 %v2966_v16, %v2984_v22 }
 0x85e   : > { %v2969_v25 = vpop.xlane.xlu1 %2968  ;;  %v3876_v62 = vpack.c.bf16 %v4062_v17, %v4060_v59  ;;  %v3084_v14 = vmul.f32 %v4062_v17, %v2789_v20 }
 0x85f   : > { %v3001_v5 = vmul.f32 1.442695, %v2989_v48  ;;  %v2990_v29 = vsub.f32 %v2969_v25, %v2984_v22  ;;  %v4064_v55 = vpop.eup %4063 }
 0x860   : > { %3877 = vmatpush3.bf16.msra.mxu0 %v3876_v62  ;;  %v2972_v61 = vpop.xlane.xlu0 %2971  ;;  %v3888_v49 = vpack.c.bf16 %v3084_v14, %v3083_v21  ;;  %v3086_v42 = vmul.f32 %v4064_v55, %v2791_v10 }
 0x861   : > { %v4066_v57 = vpop.eup %4065  ;;  %v3003_v15 = vmul.f32 1.442695, %v2990_v29  ;;  %v2991_v35 = vsub.f32 %v2972_v61, %v2984_v22  ;;  %3878 = vmatprep.subr.bf16.mxu0 %v6019_v40  ;;  %4067 = vpow2.f32 %v3001_v5 }
 0x862   : > { %v2975_v0 = vpop.xlane.xlu1 %2974  ;;  %v3879_v36 = vpack.c.bf16 %v4064_v55, %v4066_v57  ;;  %v3085_v32 = vmul.f32 %v4066_v57, %v2790_v41 }
 0x863   : > { %4069 = vpow2.f32 %v3003_v15  ;;  %v3005_v19 = vmul.f32 1.442695, %v2991_v35  ;;  %v2992_v45 = vsub.f32 %v2975_v0, %v2984_v22 }
 0x864   : > { %3880 = vmatpush3.bf16.msra.mxu0 %v3879_v36  ;;  %v3891_v20 = vpack.c.bf16 %v3086_v42, %v3085_v32 }
 0x865   : > { %v3007_v54 = vmul.f32 1.442695, %v2992_v45  ;;  %3881 = vmatprep.subr.bf16.mxu0 %v6019_v40  ;;  %4071 = vpow2.f32 %v3005_v19 }
 0x867   : > { %4073 = vpow2.f32 %v3007_v54 }
 0x86b   : > { %v4068_v28 = vpop.eup %4067 }
 0x86c   : > { %v3087_v37 = vmul.f32 %v4068_v28, %v2792_v12  ;;  %v4038_v12 = vld [vmem:[%s5787_s14 + $0x18] sm:$0xff]  }
 0x86d   : > { %v4070_v50 = vpop.eup %4069 }
 0x86e   : > { %v3882_v51 = vpack.c.bf16 %v4070_v50, %v4068_v28  ;;  %v3088_v53 = vmul.f32 %v4070_v50, %v2793_v18 }
 0x86f   : > { %v4072_v13 = vpop.eup %4071 }
 0x870   : > { %3883 = vmatpush3.bf16.msra.mxu0 %v3882_v51  ;;  %v3894_v60 = vpack.c.bf16 %v3088_v53, %v3087_v37  ;;  %v3089_v41 = vmul.f32 %v4072_v13, %v2794_v27  ;;  %v4040_v27 = vld [vmem:[%s5787_s14 + $0x28] sm:$0xff]  }
 0x871   : > { %v4074_v58 = vpop.eup %4073  ;;  %3884 = vmatprep.subr.bf16.mxu0 %v6019_v40 }
 0x872   : > { %v3885_v23 = vpack.c.bf16 %v4074_v58, %v4072_v13  ;;  %v3090_v44 = vmul.f32 %v4074_v58, %v2795_v30  ;;  %v4041_v30 = vld [vmem:[%s5787_s14 + $0x30] sm:$0xff]  }
 0x874   : > { %3886 = vmatpush3.bf16.msra.mxu0 %v3885_v23  ;;  %v3897_v10 = vpack.c.bf16 %v3090_v44, %v3089_v41 }
 0x875   : > { %3887 = vmatprep.subr.bf16.mxu0 %v6019_v40 }
 0x877   : > { %3816 = vmatmul.mubr.msk.f32.vlgmr.msra.gmra.mrb[44].mxu0 %vm6050_vm12, %v3009_v52 }
 0x878   : > { %3889 = vmatpush3.bf16.msra.mxu0 %v3888_v49  ;;  %3834 = vmatprep.mubr.msk.f32.mxu0 %vm6037_vm14, %v6036_v11  ;;  %vm6051_vm14 = vmmov %vm6045_vm1 }
 0x879   : > { %3890 = vmatprep.subr.bf16.mxu0 %v6019_v40 }
 0x87c   : > { %3892 = vmatpush3.bf16.msra.mxu0 %v3891_v20 }
 0x87d   : > { %3893 = vmatprep.subr.bf16.mxu0 %v6019_v40 }
 0x880   : > { %3895 = vmatpush3.bf16.msra.mxu0 %v3894_v60 }
 0x881   : > { %3896 = vmatprep.subr.bf16.mxu0 %v6019_v40  ;;  %v4037_v40 = vld [vmem:[%s5787_s14 + $0x10] sm:$0xff]  }
 0x882   : > { %3842 = vmatpush3.bf16.msra.mxu1 %v4037_v40 }
 0x883   : > { %3843 = vmatprep.subr.bf16.mxu1 %v6036_v11 }
 0x884   : > { %3898 = vmatpush3.bf16.msra.mxu0 %v3897_v10 }
 0x886   : > { %3844 = vmatpush3.bf16.msra.mxu1 %v4038_v12 }
 0x887   : > { %3835 = vmatmul.mubr.msk.f32.vlgmr.msra.gmra.mrb[46].mxu0 %vm6051_vm14, %v3009_v52  ;;  %3845 = vmatprep.subr.bf16.mxu1 %v6036_v11 }
 0x88a   : > { %3846 = vmatpush3.bf16.msra.mxu1 %v4039_v8 }
 0x88b   : > { %3847 = vmatprep.subr.bf16.mxu1 %v6036_v11 }
 0x88e   : > { %3848 = vmatpush3.bf16.msra.mxu1 %v4040_v27 }
 0x88f   : > { %3849 = vmatprep.subr.bf16.mxu1 %v6036_v11 }
 0x892   : > { %3850 = vmatpush3.bf16.msra.mxu1 %v4041_v30 }
 0x893   : > { %3851 = vmatprep.subr.bf16.mxu1 %v6036_v11  ;;  %v3474_v11 = vld [vmem:[%s5788_s15] ss:$0 sm:$0xff] }
 0x896   : > { %3852 = vmatpush3.bf16.msra.mxu1 %v4042_v24 }
 0x94a   : > { %v3079_v18 = vpop.f32.mrb[44].mxu0 }
 0x94b   : > { %3163 = vperm.xlu0 %3962, %v3079_v18   ;;  %v3817_v34 = vpop.f32.mrb[45].mxu0 }
 0x95a   : > { %v3157_v43 = vpop.f32.mrb[46].mxu0 }
 0x95b   : > { %v3836_v26 = vpop.f32.mrb[47].mxu0 }
 0x9ca   : > { %v3164_v2 = vpop.permute.xlu0 %3163 }
 0x9cb   : > { %4075 = vrcp.f32 %v3164_v2 }
 0x9d5   : > { %v4076_v22 = vpop.eup %4075 }
 0x9d6   : > { %v3167_v63 = vmul.f32 %v4076_v22, %v3157_v43 }
 0x9d8   : > { %v3168_v47 = vpack.c.bf16 %v3167_v63, %v3167_v63 }
 0x9da   : > { %3854 = vmatmul.mubr.bf16.vlgmr.msra.gmra.mrb[48].mxu1 %v3168_v47 }
 0xaad   : > { %v3274_v46 = vpop.f32.mrb[48].mxu1 }
 0xaae   : > { %v3275_v9 = vadd.f32 %v3474_v11, %v3274_v46  ;;  %v3855_v7 = vpop.f32.mrb[49].mxu1 }
 0xaaf   : > { %v3277_v4 = vpop.f32.mrb[50].mxu1 }
 0xab0   : > { %3280 = vst [vmem:[%s530_s18] sm:$0xff] %v3275_v9  ;;  %v3856_v33 = vpop.f32.mrb[51].mxu1 }
 0xab1   : > { %4118 = shalt.err (!%p4115_p7)
}
 0xab2   : > { %s4119_s26 = scalar_lea.hbm %s5731_s21, 128  ;;  %s4123_s18 = scalar_lea.hbm %s5789_s16, 512 }
 0xab3   : > { %p4120_p8 = scmp.ne.s32.totalorder %s5731_s21, %s4119_s26  ;;  %p4124_p1 = scmp.lt.u32.totalorder %s5731_s21, %s5789_s16 }
 0xab4   : > { %p4125_p0 = scmp.lt.u32.totalorder %s4123_s18, %s4119_s26  ;;  %p4127_p6 = scmp.lt.u32.totalorder %s4119_s26, %s5731_s21 }
 0xab5   : > { %p4121_p11 = pnand %p4120_p8, %p6052_p9 }
 0xab6   : > { %p4126_p5 = por %p4125_p0, %p4124_p1 }
 0xab7   : > { %p4122_p13 = pneg %p4121_p11 }
 0xab8   : > { %p4128_p10 = por %p4127_p6, %p4126_p5 }
 0xaba   : > { %p4129_p12 = pnand %p4128_p10, %p4122_p13 }
 0xabc   : > { %4132 = shalt.err (!%p4129_p12)
}
 0xabd   : > { %3907 = dma.vmem_to_hbm [thread:$0]  (%p6052_p9), %s5733_s23, 128, %s5731_s21, %s3282_s17  }
 0xabe PF: > { %s6053_s25 = sld [smem:[#allocation13_spill]]  ;;  %s6054_s24 = sld [smem:[#allocation11_spill]] }
 0xabf   : > { %s6055_s19 = sld [smem:[#allocation16_spill]] }
 0xac4   : > { %p3919_p2 = scmp.ge.s32.totalorder %s6053_s25, 2  ;;  %s3307_s30 = sand.u32 1, %s6054_s24  }
 0xac5   : > { %p6056_p3 = scmp.ne.s32.totalorder %s6055_s19, 0  ;;  %s3308_s28 = scalar_lea.sflag [#allocation7], %s3307_s30 }
 0xac7   : > { %p3914_p4 = pnand %p3919_p2, %p6056_p3 }
 0xac9   : > { %4154 = dma.done.wait (!%p3914_p4), %s3308_s28, 128  }
 0xaca   : > { %4156 = vsyncadd (!%p3914_p4), %s3308_s28, 4294967168  ;;  %s6057_s24 = sld [smem:[#allocation14_spill]]  ;;  %s6058_s26 = sld [smem:[#allocation12_spill]] }
 0xacb   : > { %s6059_s23 = sld [smem:[#allocation15_spill]]  ;;  %s6060_s21 = smov %s4163_s22 }
 0xad0   : > { %p27_p7 = scmp.ge.s32.totalorder %s6057_s24, 6   ;;  %s6061_s22 = smov %s6058_s26 }
 0xad2   :  { %29 = sbr.rel (!%p27_p7) target bundleno = 6 (0x6), region = 124 }
 0xad9   :  { %3313 = vsyncpa [#allocation6], 1 }
 0xada   :  { %3315 = vsyncpa [#allocation6 + $0x1], 1 }
 0xadb   :  { %3316 = vsyncpa [#allocation7], 1 }
 0xadc   :  { %3318 = vsyncpa [#allocation7 + $0x1], 1 }

</bundles_post_ra>
